<compile_context>
chip_gen: v5e
topology: v5e:2x2
jax: 0.10.0
libtpu: 0.0.40
codegen_flags: <defaults>
</compile_context>

<pallas_src>
import jax
import jax.numpy as jnp
from jax import lax
from jax.experimental import pallas as pl
from jax.experimental.pallas import tpu as pltpu

NEG_INF = -1e30


# ----------------------------------------------------------------------------
# Fused kernel: char LSTM -> main LSTM -> hidden2tag -> log_softmax
# ----------------------------------------------------------------------------
def _tagger_kernel(cx_ref, cm_ref, cwih_ref, cwhh_ref, cb_ref,
                   wemb_ref, mwihw_ref, mwihc_ref, mwhh_ref, mb_ref,
                   tagw_ref, tagb_ref, out_ref):
    Tc, Bc, CE = cx_ref.shape          # char steps, padded word batch, char emb
    CHp = cwhh_ref.shape[0]            # padded char hidden (multiple of 128)
    S, _E = wemb_ref.shape             # sentence length, word emb dim
    Hp = mwhh_ref.shape[0]             # padded main hidden (multiple of 128)

    def lstm_cell(gates, h, c, Hd):
        i = jax.nn.sigmoid(gates[:, 0 * Hd:1 * Hd])
        f = jax.nn.sigmoid(gates[:, 1 * Hd:2 * Hd])
        g = jnp.tanh(gates[:, 2 * Hd:3 * Hd])
        o = jax.nn.sigmoid(gates[:, 3 * Hd:4 * Hd])
        c_new = f * c + i * g
        h_new = o * jnp.tanh(c_new)
        return h_new, c_new

    # ---- char LSTM: all words batched on sublanes ---------------------------
    # time-independent input projection for all (step, word) pairs: one matmul
    cxg = (jnp.dot(cx_ref[...].reshape(Tc * Bc, CE), cwih_ref[...],
                   preferred_element_type=jnp.float32)
           + cb_ref[...])                                  # (Tc*Bc, 4*CHp)
    cmask = cm_ref[...]                                    # (Tc, Bc, 1)
    cwhh = cwhh_ref[...]
    h = jnp.zeros((Bc, CHp), jnp.float32)
    c = jnp.zeros((Bc, CHp), jnp.float32)
    # tiny static trip count (max word length) -> full unroll on purpose
    for t in range(Tc):
        gates = cxg[t * Bc:(t + 1) * Bc, :] + jnp.dot(
            h, cwhh, preferred_element_type=jnp.float32)
        h_new, c_new = lstm_cell(gates, h, c, CHp)
        m = cmask[t]                                       # (Bc, 1) validity
        h = m * h_new + (1.0 - m) * h                      # freeze after word end
        c = m * c_new + (1.0 - m) * c

    # ---- main (sentence) LSTM ------------------------------------------------
    # concat(word_emb, char_feats) @ W_ih expressed as two matmuls (no concat).
    char_feats = h[:S, :]                                  # (S, CHp)
    mxg = (jnp.dot(wemb_ref[...], mwihw_ref[...], preferred_element_type=jnp.float32)
           + jnp.dot(char_feats, mwihc_ref[...], preferred_element_type=jnp.float32)
           + mb_ref[...])                                  # (S, 4*Hp)
    mwhh = mwhh_ref[...]
    hm = jnp.zeros((1, Hp), jnp.float32)
    cm_ = jnp.zeros((1, Hp), jnp.float32)
    hs = []
    for t in range(S):                                     # static, fully unrolled
        gates = mxg[t:t + 1, :] + jnp.dot(hm, mwhh,
                                          preferred_element_type=jnp.float32)
        hm, cm_ = lstm_cell(gates, hm, cm_, Hp)
        hs.append(hm)
    h_all = jnp.concatenate(hs, axis=0)                    # (S, Hp)

    # ---- tag head: linear + log_softmax (padded tag lanes hold -1e30 bias) --
    logits = jnp.dot(h_all, tagw_ref[...],
                     preferred_element_type=jnp.float32) + tagb_ref[...]
    mx = jnp.max(logits, axis=-1, keepdims=True)
    z = logits - mx
    lse = jnp.log(jnp.sum(jnp.exp(z), axis=-1, keepdims=True))
    out_ref[...] = z - lse                                 # (S, Tgp) lane-dense


def _vmem_spec(shape):
    zeros = (0,) * len(shape)
    return pl.BlockSpec(shape, lambda i, _z=zeros: _z)


def lstm_tagger_pallas(kp, char_x, char_mask, word_emb):
    """char_x: (Tc,Bc,CE) f32, char_mask: (Tc,Bc,1) f32, word_emb: (S,E) f32."""
    Tc, Bc, CE = char_x.shape
    S, E = word_emb.shape
    Tgp = kp["tag_w"].shape[1]

    args = (char_x, char_mask,
            kp["c_wih"], kp["c_whh"], kp["c_b"],
            word_emb, kp["m_wih_w"], kp["m_wih_c"], kp["m_whh"], kp["m_b"],
            kp["tag_w"], kp["tag_b"])

    grid_spec = pltpu.PrefetchScalarGridSpec(
        num_scalar_prefetch=0,
        grid=(1,),
        in_specs=[_vmem_spec(a.shape) for a in args],
        out_specs=_vmem_spec((S, Tgp)),
        scratch_shapes=[],
    )
    return pl.pallas_call(
        _tagger_kernel,
        grid_spec=grid_spec,
        out_shape=jax.ShapeDtypeStruct((S, Tgp), jnp.float32),
        compiler_params=pltpu.CompilerParams(dimension_semantics=("arbitrary",)),
    )(*args)


# ----------------------------------------------------------------------------
# Weight padding: gate-blockwise lane padding to 128, zero rows for padded
# contraction dims, -1e30 bias on padded tag lanes.
# ----------------------------------------------------------------------------
def _pad_gate_cols(w, h, hp):
    rows = w.shape[0]
    out = jnp.zeros((rows, 4 * hp), jnp.float32)
    for k in range(4):
        out = out.at[:, k * hp:k * hp + h].set(w[:, k * h:(k + 1) * h])
    return out


def _pad_rows(w, rp):
    return jnp.zeros((rp, w.shape[1]), w.dtype).at[:w.shape[0], :].set(w)


def make_kernel_params(params, e_dim, ch_dim, h_dim, tg_dim,
                       chp=128, hp=128, tgp=128):
    assert ch_dim <= chp and h_dim <= hp and tg_dim <= tgp
    kp = {}
    kp["c_wih"] = _pad_gate_cols(params["c_wih_t"], ch_dim, chp)
    kp["c_whh"] = _pad_rows(_pad_gate_cols(params["c_whh_t"], ch_dim, chp), chp)
    kp["c_b"] = _pad_gate_cols(params["c_b"], ch_dim, chp)
    m_wih = params["m_wih_t"]                      # (E+CH, 4H), [word | char] rows
    kp["m_wih_w"] = _pad_gate_cols(m_wih[:e_dim], h_dim, hp)
    kp["m_wih_c"] = _pad_rows(_pad_gate_cols(m_wih[e_dim:], h_dim, hp), chp)
    kp["m_whh"] = _pad_rows(_pad_gate_cols(params["m_whh_t"], h_dim, hp), hp)
    kp["m_b"] = _pad_gate_cols(params["m_b"], h_dim, hp)
    kp["tag_w"] = jnp.zeros((hp, tgp), jnp.float32).at[:h_dim, :tg_dim].set(
        params["tag_w_t"])
    kp["tag_b"] = jnp.full((1, tgp), NEG_INF, jnp.float32).at[:, :tg_dim].set(
        params["tag_b"])
    return kp


# ----------------------------------------------------------------------------
# Full forward pass (embedding gathers are plain-JAX glue; everything else is
# the single fused Pallas kernel).
# ----------------------------------------------------------------------------
def lstm_tagger_forward(params, kp, sentence, char_idx, char_mask, n_tags):
    char_x = jnp.take(params["char_emb"], char_idx, axis=0)    # (Tc, Bc, CE)
    word_emb = jnp.take(params["word_emb"], sentence, axis=0)  # (S, E)
    out_padded = lstm_tagger_pallas(kp, char_x, char_mask, word_emb)
    return out_padded[:, :n_tags]


# ----------------------------------------------------------------------------
# Pure-JAX reference (lax.scan, unpadded) for correctness check.
# ----------------------------------------------------------------------------
def _lstm_ref(x, mask, w_ih_t, w_hh_t, bias):
    T, B, D = x.shape
    H = w_hh_t.shape[0]

    def step(carry, inp):
        h, c = carry
        xt, m = inp
        gates = jnp.dot(xt, w_ih_t) + jnp.dot(h, w_hh_t) + bias
        i = jax.nn.sigmoid(gates[:, :H])
        f = jax.nn.sigmoid(gates[:, H:2 * H])
        g = jnp.tanh(gates[:, 2 * H:3 * H])
        o = jax.nn.sigmoid(gates[:, 3 * H:])
        c_new = f * c + i * g
        h_new = o * jnp.tanh(c_new)
        h2 = m * h_new + (1.0 - m) * h
        c2 = m * c_new + (1.0 - m) * c
        return (h2, c2), h2

    init = (jnp.zeros((B, H), jnp.float32), jnp.zeros((B, H), jnp.float32))
    (hf, _), allh = lax.scan(step, init, (x, mask))
    return allh, hf


def _forward_ref(params, sentence, char_idx, char_mask):
    char_emb = params["char_emb"][char_idx]
    _, char_feats = _lstm_ref(char_emb, char_mask,
                              params["c_wih_t"], params["c_whh_t"], params["c_b"])
    word_emb = params["word_emb"][sentence]
    embeds = jnp.concatenate([word_emb, char_feats], axis=1)
    S = embeds.shape[0]
    all_h, _ = _lstm_ref(embeds.reshape(S, 1, -1), jnp.ones((S, 1, 1), jnp.float32),
                         params["m_wih_t"], params["m_whh_t"], params["m_b"])
    h = all_h.reshape(S, -1)
    logits = jnp.dot(h, params["tag_w_t"]) + params["tag_b"]
    return jax.nn.log_softmax(logits, axis=-1)


# ----------------------------------------------------------------------------
if __name__ == "__main__":
    EMBEDDING_DIM = 8
    CHAR_EMBEDDING_DIM = 12
    HIDDEN_DIM = 15
    CHAR_HIDDEN_DIM = 10

    training_data = [
        ("The dog ate the apple".split(), ["DET", "NN", "V", "DET", "NN"]),
        ("Everybody read that book".split(), ["NN", "V", "DET", "NN"]),
    ]
    word_to_ix, char_to_ix = {}, {}
    for sent, _tags in training_data:
        for w in sent:
            if w not in word_to_ix:
                word_to_ix[w] = len(word_to_ix)
            for ch in w:
                if ch not in char_to_ix:
                    char_to_ix[ch] = len(char_to_ix)
    tag_to_ix = {"DET": 0, "NN": 1, "V": 2}

    VOCAB = len(word_to_ix)
    CHAR_VOCAB = len(char_to_ix)
    TAGSET = len(tag_to_ix)

    sentence_words = training_data[0][0]
    sentence = jnp.array([word_to_ix[w] for w in sentence_words], dtype=jnp.int32)

    char_seqs = [[char_to_ix[c] for c in w] for w in sentence_words]
    n_words = len(char_seqs)
    max_len = max(len(s) for s in char_seqs)
    BC = 8                      # word batch padded to a sublane multiple
    ci = [[0] * BC for _ in range(max_len)]
    cmk = [[[0.0] for _ in range(BC)] for _ in range(max_len)]
    for w, seq in enumerate(char_seqs):
        for t, idx in enumerate(seq):
            ci[t][w] = idx
            cmk[t][w] = [1.0]
    char_idx = jnp.array(ci, dtype=jnp.int32)          # (Tc, BC)
    char_mask = jnp.array(cmk, dtype=jnp.float32)      # (Tc, BC, 1)

    # deterministic parameter init (shapes follow nn.Embedding / nn.LSTM / nn.Linear)
    key = jax.random.PRNGKey(0)
    ks = jax.random.split(key, 12)

    def uni(k, shape, bound):
        return jax.random.uniform(k, shape, jnp.float32, -bound, bound)

    kc = 1.0 / jnp.sqrt(CHAR_HIDDEN_DIM)
    km = 1.0 / jnp.sqrt(HIDDEN_DIM)
    MAIN_IN = EMBEDDING_DIM + CHAR_HIDDEN_DIM

    params = {
        "word_emb": jax.random.normal(ks[0], (VOCAB, EMBEDDING_DIM), jnp.float32),
        "char_emb": jax.random.normal(ks[1], (CHAR_VOCAB, CHAR_EMBEDDING_DIM), jnp.float32),
        # char LSTM (gate order i,f,g,o), pre-transposed + fused biases
        "c_wih_t": uni(ks[2], (CHAR_EMBEDDING_DIM, 4 * CHAR_HIDDEN_DIM), kc),
        "c_whh_t": uni(ks[3], (CHAR_HIDDEN_DIM, 4 * CHAR_HIDDEN_DIM), kc),
        "c_b": (uni(ks[4], (1, 4 * CHAR_HIDDEN_DIM), kc)
                + uni(ks[5], (1, 4 * CHAR_HIDDEN_DIM), kc)),
        # main LSTM
        "m_wih_t": uni(ks[6], (MAIN_IN, 4 * HIDDEN_DIM), km),
        "m_whh_t": uni(ks[7], (HIDDEN_DIM, 4 * HIDDEN_DIM), km),
        "m_b": (uni(ks[8], (1, 4 * HIDDEN_DIM), km)
                + uni(ks[9], (1, 4 * HIDDEN_DIM), km)),
        # hidden2tag linear
        "tag_w_t": uni(ks[10], (HIDDEN_DIM, TAGSET), km),
        "tag_b": uni(ks[11], (1, TAGSET), km),
    }

    # lane/sublane-padded kernel-side weights
    kp = make_kernel_params(params, EMBEDDING_DIM, CHAR_HIDDEN_DIM,
                            HIDDEN_DIM, TAGSET)

    tag_scores = lstm_tagger_forward(params, kp, sentence, char_idx, char_mask, TAGSET)
    tag_scores = jax.block_until_ready(tag_scores)

    ref = _forward_ref(params, sentence,
                       char_idx[:, :n_words], char_mask[:, :n_words, :])
    assert tag_scores.shape == (len(sentence_words), TAGSET)
    assert jnp.allclose(tag_scores, ref, atol=1e-2, rtol=1e-2), (
        f"mismatch: max abs err {jnp.max(jnp.abs(tag_scores - ref))}")

    print("KERNEL_OK")
</pallas_src>

<mosaic_0001>
module attributes {stable_mosaic.version = 11 : i64} {
  func.func @_tagger_kernel(%arg0: i32, %arg1: memref<5x8x12xf32, #tpu.memory_space<vmem>>, %arg2: memref<5x8x1xf32, #tpu.memory_space<vmem>>, %arg3: memref<12x512xf32, #tpu.memory_space<vmem>>, %arg4: memref<128x512xf32, #tpu.memory_space<vmem>>, %arg5: memref<1x512xf32, #tpu.memory_space<vmem>>, %arg6: memref<5x8xf32, #tpu.memory_space<vmem>>, %arg7: memref<8x512xf32, #tpu.memory_space<vmem>>, %arg8: memref<128x512xf32, #tpu.memory_space<vmem>>, %arg9: memref<128x512xf32, #tpu.memory_space<vmem>>, %arg10: memref<1x512xf32, #tpu.memory_space<vmem>>, %arg11: memref<128x128xf32, #tpu.memory_space<vmem>>, %arg12: memref<1x128xf32, #tpu.memory_space<vmem>>, %arg13: memref<5x128xf32, #tpu.memory_space<vmem>>) attributes {dimension_semantics = [#tpu.dimension_semantics<arbitrary>], iteration_bounds = array<i64: 1>, scalar_prefetch = 0 : i64, scratch_operands = 0 : i64, tpu.core_type = #tpu.core_type<tc>, window_params = [{pipeline_mode = #tpu.pipeline_mode<synchronous>, transform_indices = @transform_0, window_bounds = array<i64: 5, 8, 12>}, {pipeline_mode = #tpu.pipeline_mode<synchronous>, transform_indices = @transform_1, window_bounds = array<i64: 5, 8, 1>}, {pipeline_mode = #tpu.pipeline_mode<synchronous>, transform_indices = @transform_2, window_bounds = array<i64: 12, 512>}, {pipeline_mode = #tpu.pipeline_mode<synchronous>, transform_indices = @transform_3, window_bounds = array<i64: 128, 512>}, {pipeline_mode = #tpu.pipeline_mode<synchronous>, transform_indices = @transform_4, window_bounds = array<i64: 1, 512>}, {pipeline_mode = #tpu.pipeline_mode<synchronous>, transform_indices = @transform_5, window_bounds = array<i64: 5, 8>}, {pipeline_mode = #tpu.pipeline_mode<synchronous>, transform_indices = @transform_6, window_bounds = array<i64: 8, 512>}, {pipeline_mode = #tpu.pipeline_mode<synchronous>, transform_indices = @transform_7, window_bounds = array<i64: 128, 512>}, {pipeline_mode = #tpu.pipeline_mode<synchronous>, transform_indices = @transform_8, window_bounds = array<i64: 128, 512>}, {pipeline_mode = #tpu.pipeline_mode<synchronous>, transform_indices = @transform_9, window_bounds = array<i64: 1, 512>}, {pipeline_mode = #tpu.pipeline_mode<synchronous>, transform_indices = @transform_10, window_bounds = array<i64: 128, 128>}, {pipeline_mode = #tpu.pipeline_mode<synchronous>, transform_indices = @transform_11, window_bounds = array<i64: 1, 128>}, {pipeline_mode = #tpu.pipeline_mode<synchronous>, transform_indices = @transform_12, window_bounds = array<i64: 5, 128>}]} {
    %c0 = arith.constant 0 : index
    %c0_0 = arith.constant 0 : index
    %c0_1 = arith.constant 0 : index
    %0 = vector.load %arg1[%c0, %c0_0, %c0_1] : memref<5x8x12xf32, #tpu.memory_space<vmem>>, vector<5x8x12xf32>
    %1 = vector.shape_cast %0 : vector<5x8x12xf32> to vector<40x12xf32>
    %c0_2 = arith.constant 0 : index
    %c0_3 = arith.constant 0 : index
    %2 = vector.load %arg3[%c0_2, %c0_3] : memref<12x512xf32, #tpu.memory_space<vmem>>, vector<12x512xf32>
    %cst = arith.constant dense<0.000000e+00> : vector<40x512xf32>
    %3 = tpu.matmul %1, %2, %cst {dimension_numbers = #tpu.dot_dimension_numbers<[1], [0], [0], [1], [0, 0, 1, 1], [], []>} : vector<40x12xf32>, vector<12x512xf32>, vector<40x512xf32> -> vector<40x512xf32>
    %c0_4 = arith.constant 0 : index
    %c0_5 = arith.constant 0 : index
    %4 = vector.load %arg5[%c0_4, %c0_5] : memref<1x512xf32, #tpu.memory_space<vmem>>, vector<1x512xf32>
    %5 = vector.broadcast %4 : vector<1x512xf32> to vector<40x512xf32>
    %6 = arith.addf %3, %5 : vector<40x512xf32>
    %c0_6 = arith.constant 0 : index
    %c0_7 = arith.constant 0 : index
    %c0_8 = arith.constant 0 : index
    %7 = vector.load %arg2[%c0_6, %c0_7, %c0_8] : memref<5x8x1xf32, #tpu.memory_space<vmem>>, vector<5x8x1xf32>
    %c0_9 = arith.constant 0 : index
    %c0_10 = arith.constant 0 : index
    %8 = vector.load %arg4[%c0_9, %c0_10] : memref<128x512xf32, #tpu.memory_space<vmem>>, vector<128x512xf32>
    %cst_11 = arith.constant 0.000000e+00 : f32
    %9 = vector.broadcast %cst_11 : f32 to vector<8x128xf32>
    %cst_12 = arith.constant 0.000000e+00 : f32
    %10 = vector.broadcast %cst_12 : f32 to vector<8x128xf32>
    %11 = vector.extract_strided_slice %6 {offsets = [0, 0], sizes = [8, 512], strides = [1, 1]} : vector<40x512xf32> to vector<8x512xf32>
    %cst_13 = arith.constant dense<0.000000e+00> : vector<8x512xf32>
    %12 = tpu.matmul %9, %8, %cst_13 {dimension_numbers = #tpu.dot_dimension_numbers<[1], [0], [0], [1], [0, 0, 1, 1], [], []>} : vector<8x128xf32>, vector<128x512xf32>, vector<8x512xf32> -> vector<8x512xf32>
    %13 = arith.addf %11, %12 : vector<8x512xf32>
    %14 = vector.extract_strided_slice %13 {offsets = [0, 0], sizes = [8, 128], strides = [1, 1]} : vector<8x512xf32> to vector<8x128xf32>
    %15 = arith.negf %14 : vector<8x128xf32>
    %16 = math.exp %15 : vector<8x128xf32>
    %cst_14 = arith.constant 1.000000e+00 : f32
    %17 = vector.broadcast %cst_14 : f32 to vector<8x128xf32>
    %18 = arith.addf %17, %16 : vector<8x128xf32>
    %19 = arith.divf %17, %18 : vector<8x128xf32>
    %20 = vector.extract_strided_slice %13 {offsets = [0, 128], sizes = [8, 128], strides = [1, 1]} : vector<8x512xf32> to vector<8x128xf32>
    %21 = arith.negf %20 : vector<8x128xf32>
    %22 = math.exp %21 : vector<8x128xf32>
    %cst_15 = arith.constant 1.000000e+00 : f32
    %23 = vector.broadcast %cst_15 : f32 to vector<8x128xf32>
    %24 = arith.addf %23, %22 : vector<8x128xf32>
    %25 = arith.divf %23, %24 : vector<8x128xf32>
    %26 = vector.extract_strided_slice %13 {offsets = [0, 256], sizes = [8, 128], strides = [1, 1]} : vector<8x512xf32> to vector<8x128xf32>
    %27 = math.tanh %26 : vector<8x128xf32>
    %28 = vector.extract_strided_slice %13 {offsets = [0, 384], sizes = [8, 128], strides = [1, 1]} : vector<8x512xf32> to vector<8x128xf32>
    %29 = arith.negf %28 : vector<8x128xf32>
    %30 = math.exp %29 : vector<8x128xf32>
    %cst_16 = arith.constant 1.000000e+00 : f32
    %31 = vector.broadcast %cst_16 : f32 to vector<8x128xf32>
    %32 = arith.addf %31, %30 : vector<8x128xf32>
    %33 = arith.divf %31, %32 : vector<8x128xf32>
    %34 = arith.mulf %25, %10 : vector<8x128xf32>
    %35 = arith.mulf %19, %27 : vector<8x128xf32>
    %36 = arith.addf %34, %35 : vector<8x128xf32>
    %37 = math.tanh %36 : vector<8x128xf32>
    %38 = arith.mulf %33, %37 : vector<8x128xf32>
    %39 = vector.extract_strided_slice %7 {offsets = [0, 0, 0], sizes = [1, 8, 1], strides = [1, 1, 1]} : vector<5x8x1xf32> to vector<1x8x1xf32>
    %40 = vector.shape_cast %39 : vector<1x8x1xf32> to vector<8x1xf32>
    %41 = vector.broadcast %40 : vector<8x1xf32> to vector<8x128xf32>
    %42 = arith.mulf %41, %38 : vector<8x128xf32>
    %cst_17 = arith.constant 1.000000e+00 : f32
    %43 = vector.broadcast %cst_17 : f32 to vector<8x1xf32>
    %44 = arith.subf %43, %40 : vector<8x1xf32>
    %45 = vector.broadcast %44 : vector<8x1xf32> to vector<8x128xf32>
    %46 = arith.mulf %45, %9 : vector<8x128xf32>
    %47 = arith.addf %42, %46 : vector<8x128xf32>
    %48 = vector.broadcast %40 : vector<8x1xf32> to vector<8x128xf32>
    %49 = arith.mulf %48, %36 : vector<8x128xf32>
    %cst_18 = arith.constant 1.000000e+00 : f32
    %50 = vector.broadcast %cst_18 : f32 to vector<8x1xf32>
    %51 = arith.subf %50, %40 : vector<8x1xf32>
    %52 = vector.broadcast %51 : vector<8x1xf32> to vector<8x128xf32>
    %53 = arith.mulf %52, %10 : vector<8x128xf32>
    %54 = arith.addf %49, %53 : vector<8x128xf32>
    %55 = vector.extract_strided_slice %6 {offsets = [8, 0], sizes = [8, 512], strides = [1, 1]} : vector<40x512xf32> to vector<8x512xf32>
    %cst_19 = arith.constant dense<0.000000e+00> : vector<8x512xf32>
    %56 = tpu.matmul %47, %8, %cst_19 {dimension_numbers = #tpu.dot_dimension_numbers<[1], [0], [0], [1], [0, 0, 1, 1], [], []>} : vector<8x128xf32>, vector<128x512xf32>, vector<8x512xf32> -> vector<8x512xf32>
    %57 = arith.addf %55, %56 : vector<8x512xf32>
    %58 = vector.extract_strided_slice %57 {offsets = [0, 0], sizes = [8, 128], strides = [1, 1]} : vector<8x512xf32> to vector<8x128xf32>
    %59 = arith.negf %58 : vector<8x128xf32>
    %60 = math.exp %59 : vector<8x128xf32>
    %cst_20 = arith.constant 1.000000e+00 : f32
    %61 = vector.broadcast %cst_20 : f32 to vector<8x128xf32>
    %62 = arith.addf %61, %60 : vector<8x128xf32>
    %63 = arith.divf %61, %62 : vector<8x128xf32>
    %64 = vector.extract_strided_slice %57 {offsets = [0, 128], sizes = [8, 128], strides = [1, 1]} : vector<8x512xf32> to vector<8x128xf32>
    %65 = arith.negf %64 : vector<8x128xf32>
    %66 = math.exp %65 : vector<8x128xf32>
    %cst_21 = arith.constant 1.000000e+00 : f32
    %67 = vector.broadcast %cst_21 : f32 to vector<8x128xf32>
    %68 = arith.addf %67, %66 : vector<8x128xf32>
    %69 = arith.divf %67, %68 : vector<8x128xf32>
    %70 = vector.extract_strided_slice %57 {offsets = [0, 256], sizes = [8, 128], strides = [1, 1]} : vector<8x512xf32> to vector<8x128xf32>
    %71 = math.tanh %70 : vector<8x128xf32>
    %72 = vector.extract_strided_slice %57 {offsets = [0, 384], sizes = [8, 128], strides = [1, 1]} : vector<8x512xf32> to vector<8x128xf32>
    %73 = arith.negf %72 : vector<8x128xf32>
    %74 = math.exp %73 : vector<8x128xf32>
    %cst_22 = arith.constant 1.000000e+00 : f32
    %75 = vector.broadcast %cst_22 : f32 to vector<8x128xf32>
    %76 = arith.addf %75, %74 : vector<8x128xf32>
    %77 = arith.divf %75, %76 : vector<8x128xf32>
    %78 = arith.mulf %69, %54 : vector<8x128xf32>
    %79 = arith.mulf %63, %71 : vector<8x128xf32>
    %80 = arith.addf %78, %79 : vector<8x128xf32>
    %81 = math.tanh %80 : vector<8x128xf32>
    %82 = arith.mulf %77, %81 : vector<8x128xf32>
    %83 = vector.extract_strided_slice %7 {offsets = [1, 0, 0], sizes = [1, 8, 1], strides = [1, 1, 1]} : vector<5x8x1xf32> to vector<1x8x1xf32>
    %84 = vector.shape_cast %83 : vector<1x8x1xf32> to vector<8x1xf32>
    %85 = vector.broadcast %84 : vector<8x1xf32> to vector<8x128xf32>
    %86 = arith.mulf %85, %82 : vector<8x128xf32>
    %cst_23 = arith.constant 1.000000e+00 : f32
    %87 = vector.broadcast %cst_23 : f32 to vector<8x1xf32>
    %88 = arith.subf %87, %84 : vector<8x1xf32>
    %89 = vector.broadcast %88 : vector<8x1xf32> to vector<8x128xf32>
    %90 = arith.mulf %89, %47 : vector<8x128xf32>
    %91 = arith.addf %86, %90 : vector<8x128xf32>
    %92 = vector.broadcast %84 : vector<8x1xf32> to vector<8x128xf32>
    %93 = arith.mulf %92, %80 : vector<8x128xf32>
    %cst_24 = arith.constant 1.000000e+00 : f32
    %94 = vector.broadcast %cst_24 : f32 to vector<8x1xf32>
    %95 = arith.subf %94, %84 : vector<8x1xf32>
    %96 = vector.broadcast %95 : vector<8x1xf32> to vector<8x128xf32>
    %97 = arith.mulf %96, %54 : vector<8x128xf32>
    %98 = arith.addf %93, %97 : vector<8x128xf32>
    %99 = vector.extract_strided_slice %6 {offsets = [16, 0], sizes = [8, 512], strides = [1, 1]} : vector<40x512xf32> to vector<8x512xf32>
    %cst_25 = arith.constant dense<0.000000e+00> : vector<8x512xf32>
    %100 = tpu.matmul %91, %8, %cst_25 {dimension_numbers = #tpu.dot_dimension_numbers<[1], [0], [0], [1], [0, 0, 1, 1], [], []>} : vector<8x128xf32>, vector<128x512xf32>, vector<8x512xf32> -> vector<8x512xf32>
    %101 = arith.addf %99, %100 : vector<8x512xf32>
    %102 = vector.extract_strided_slice %101 {offsets = [0, 0], sizes = [8, 128], strides = [1, 1]} : vector<8x512xf32> to vector<8x128xf32>
    %103 = arith.negf %102 : vector<8x128xf32>
    %104 = math.exp %103 : vector<8x128xf32>
    %cst_26 = arith.constant 1.000000e+00 : f32
    %105 = vector.broadcast %cst_26 : f32 to vector<8x128xf32>
    %106 = arith.addf %105, %104 : vector<8x128xf32>
    %107 = arith.divf %105, %106 : vector<8x128xf32>
    %108 = vector.extract_strided_slice %101 {offsets = [0, 128], sizes = [8, 128], strides = [1, 1]} : vector<8x512xf32> to vector<8x128xf32>
    %109 = arith.negf %108 : vector<8x128xf32>
    %110 = math.exp %109 : vector<8x128xf32>
    %cst_27 = arith.constant 1.000000e+00 : f32
    %111 = vector.broadcast %cst_27 : f32 to vector<8x128xf32>
    %112 = arith.addf %111, %110 : vector<8x128xf32>
    %113 = arith.divf %111, %112 : vector<8x128xf32>
    %114 = vector.extract_strided_slice %101 {offsets = [0, 256], sizes = [8, 128], strides = [1, 1]} : vector<8x512xf32> to vector<8x128xf32>
    %115 = math.tanh %114 : vector<8x128xf32>
    %116 = vector.extract_strided_slice %101 {offsets = [0, 384], sizes = [8, 128], strides = [1, 1]} : vector<8x512xf32> to vector<8x128xf32>
    %117 = arith.negf %116 : vector<8x128xf32>
    %118 = math.exp %117 : vector<8x128xf32>
    %cst_28 = arith.constant 1.000000e+00 : f32
    %119 = vector.broadcast %cst_28 : f32 to vector<8x128xf32>
    %120 = arith.addf %119, %118 : vector<8x128xf32>
    %121 = arith.divf %119, %120 : vector<8x128xf32>
    %122 = arith.mulf %113, %98 : vector<8x128xf32>
    %123 = arith.mulf %107, %115 : vector<8x128xf32>
    %124 = arith.addf %122, %123 : vector<8x128xf32>
    %125 = math.tanh %124 : vector<8x128xf32>
    %126 = arith.mulf %121, %125 : vector<8x128xf32>
    %127 = vector.extract_strided_slice %7 {offsets = [2, 0, 0], sizes = [1, 8, 1], strides = [1, 1, 1]} : vector<5x8x1xf32> to vector<1x8x1xf32>
    %128 = vector.shape_cast %127 : vector<1x8x1xf32> to vector<8x1xf32>
    %129 = vector.broadcast %128 : vector<8x1xf32> to vector<8x128xf32>
    %130 = arith.mulf %129, %126 : vector<8x128xf32>
    %cst_29 = arith.constant 1.000000e+00 : f32
    %131 = vector.broadcast %cst_29 : f32 to vector<8x1xf32>
    %132 = arith.subf %131, %128 : vector<8x1xf32>
    %133 = vector.broadcast %132 : vector<8x1xf32> to vector<8x128xf32>
    %134 = arith.mulf %133, %91 : vector<8x128xf32>
    %135 = arith.addf %130, %134 : vector<8x128xf32>
    %136 = vector.broadcast %128 : vector<8x1xf32> to vector<8x128xf32>
    %137 = arith.mulf %136, %124 : vector<8x128xf32>
    %cst_30 = arith.constant 1.000000e+00 : f32
    %138 = vector.broadcast %cst_30 : f32 to vector<8x1xf32>
    %139 = arith.subf %138, %128 : vector<8x1xf32>
    %140 = vector.broadcast %139 : vector<8x1xf32> to vector<8x128xf32>
    %141 = arith.mulf %140, %98 : vector<8x128xf32>
    %142 = arith.addf %137, %141 : vector<8x128xf32>
    %143 = vector.extract_strided_slice %6 {offsets = [24, 0], sizes = [8, 512], strides = [1, 1]} : vector<40x512xf32> to vector<8x512xf32>
    %cst_31 = arith.constant dense<0.000000e+00> : vector<8x512xf32>
    %144 = tpu.matmul %135, %8, %cst_31 {dimension_numbers = #tpu.dot_dimension_numbers<[1], [0], [0], [1], [0, 0, 1, 1], [], []>} : vector<8x128xf32>, vector<128x512xf32>, vector<8x512xf32> -> vector<8x512xf32>
    %145 = arith.addf %143, %144 : vector<8x512xf32>
    %146 = vector.extract_strided_slice %145 {offsets = [0, 0], sizes = [8, 128], strides = [1, 1]} : vector<8x512xf32> to vector<8x128xf32>
    %147 = arith.negf %146 : vector<8x128xf32>
    %148 = math.exp %147 : vector<8x128xf32>
    %cst_32 = arith.constant 1.000000e+00 : f32
    %149 = vector.broadcast %cst_32 : f32 to vector<8x128xf32>
    %150 = arith.addf %149, %148 : vector<8x128xf32>
    %151 = arith.divf %149, %150 : vector<8x128xf32>
    %152 = vector.extract_strided_slice %145 {offsets = [0, 128], sizes = [8, 128], strides = [1, 1]} : vector<8x512xf32> to vector<8x128xf32>
    %153 = arith.negf %152 : vector<8x128xf32>
    %154 = math.exp %153 : vector<8x128xf32>
    %cst_33 = arith.constant 1.000000e+00 : f32
    %155 = vector.broadcast %cst_33 : f32 to vector<8x128xf32>
    %156 = arith.addf %155, %154 : vector<8x128xf32>
    %157 = arith.divf %155, %156 : vector<8x128xf32>
    %158 = vector.extract_strided_slice %145 {offsets = [0, 256], sizes = [8, 128], strides = [1, 1]} : vector<8x512xf32> to vector<8x128xf32>
    %159 = math.tanh %158 : vector<8x128xf32>
    %160 = vector.extract_strided_slice %145 {offsets = [0, 384], sizes = [8, 128], strides = [1, 1]} : vector<8x512xf32> to vector<8x128xf32>
    %161 = arith.negf %160 : vector<8x128xf32>
    %162 = math.exp %161 : vector<8x128xf32>
    %cst_34 = arith.constant 1.000000e+00 : f32
    %163 = vector.broadcast %cst_34 : f32 to vector<8x128xf32>
    %164 = arith.addf %163, %162 : vector<8x128xf32>
    %165 = arith.divf %163, %164 : vector<8x128xf32>
    %166 = arith.mulf %157, %142 : vector<8x128xf32>
    %167 = arith.mulf %151, %159 : vector<8x128xf32>
    %168 = arith.addf %166, %167 : vector<8x128xf32>
    %169 = math.tanh %168 : vector<8x128xf32>
    %170 = arith.mulf %165, %169 : vector<8x128xf32>
    %171 = vector.extract_strided_slice %7 {offsets = [3, 0, 0], sizes = [1, 8, 1], strides = [1, 1, 1]} : vector<5x8x1xf32> to vector<1x8x1xf32>
    %172 = vector.shape_cast %171 : vector<1x8x1xf32> to vector<8x1xf32>
    %173 = vector.broadcast %172 : vector<8x1xf32> to vector<8x128xf32>
    %174 = arith.mulf %173, %170 : vector<8x128xf32>
    %cst_35 = arith.constant 1.000000e+00 : f32
    %175 = vector.broadcast %cst_35 : f32 to vector<8x1xf32>
    %176 = arith.subf %175, %172 : vector<8x1xf32>
    %177 = vector.broadcast %176 : vector<8x1xf32> to vector<8x128xf32>
    %178 = arith.mulf %177, %135 : vector<8x128xf32>
    %179 = arith.addf %174, %178 : vector<8x128xf32>
    %180 = vector.broadcast %172 : vector<8x1xf32> to vector<8x128xf32>
    %181 = arith.mulf %180, %168 : vector<8x128xf32>
    %cst_36 = arith.constant 1.000000e+00 : f32
    %182 = vector.broadcast %cst_36 : f32 to vector<8x1xf32>
    %183 = arith.subf %182, %172 : vector<8x1xf32>
    %184 = vector.broadcast %183 : vector<8x1xf32> to vector<8x128xf32>
    %185 = arith.mulf %184, %142 : vector<8x128xf32>
    %186 = arith.addf %181, %185 : vector<8x128xf32>
    %187 = vector.extract_strided_slice %6 {offsets = [32, 0], sizes = [8, 512], strides = [1, 1]} : vector<40x512xf32> to vector<8x512xf32>
    %cst_37 = arith.constant dense<0.000000e+00> : vector<8x512xf32>
    %188 = tpu.matmul %179, %8, %cst_37 {dimension_numbers = #tpu.dot_dimension_numbers<[1], [0], [0], [1], [0, 0, 1, 1], [], []>} : vector<8x128xf32>, vector<128x512xf32>, vector<8x512xf32> -> vector<8x512xf32>
    %189 = arith.addf %187, %188 : vector<8x512xf32>
    %190 = vector.extract_strided_slice %189 {offsets = [0, 0], sizes = [8, 128], strides = [1, 1]} : vector<8x512xf32> to vector<8x128xf32>
    %191 = arith.negf %190 : vector<8x128xf32>
    %192 = math.exp %191 : vector<8x128xf32>
    %cst_38 = arith.constant 1.000000e+00 : f32
    %193 = vector.broadcast %cst_38 : f32 to vector<8x128xf32>
    %194 = arith.addf %193, %192 : vector<8x128xf32>
    %195 = arith.divf %193, %194 : vector<8x128xf32>
    %196 = vector.extract_strided_slice %189 {offsets = [0, 128], sizes = [8, 128], strides = [1, 1]} : vector<8x512xf32> to vector<8x128xf32>
    %197 = arith.negf %196 : vector<8x128xf32>
    %198 = math.exp %197 : vector<8x128xf32>
    %cst_39 = arith.constant 1.000000e+00 : f32
    %199 = vector.broadcast %cst_39 : f32 to vector<8x128xf32>
    %200 = arith.addf %199, %198 : vector<8x128xf32>
    %201 = arith.divf %199, %200 : vector<8x128xf32>
    %202 = vector.extract_strided_slice %189 {offsets = [0, 256], sizes = [8, 128], strides = [1, 1]} : vector<8x512xf32> to vector<8x128xf32>
    %203 = math.tanh %202 : vector<8x128xf32>
    %204 = vector.extract_strided_slice %189 {offsets = [0, 384], sizes = [8, 128], strides = [1, 1]} : vector<8x512xf32> to vector<8x128xf32>
    %205 = arith.negf %204 : vector<8x128xf32>
    %206 = math.exp %205 : vector<8x128xf32>
    %cst_40 = arith.constant 1.000000e+00 : f32
    %207 = vector.broadcast %cst_40 : f32 to vector<8x128xf32>
    %208 = arith.addf %207, %206 : vector<8x128xf32>
    %209 = arith.divf %207, %208 : vector<8x128xf32>
    %210 = arith.mulf %201, %186 : vector<8x128xf32>
    %211 = arith.mulf %195, %203 : vector<8x128xf32>
    %212 = arith.addf %210, %211 : vector<8x128xf32>
    %213 = math.tanh %212 : vector<8x128xf32>
    %214 = arith.mulf %209, %213 : vector<8x128xf32>
    %215 = vector.extract_strided_slice %7 {offsets = [4, 0, 0], sizes = [1, 8, 1], strides = [1, 1, 1]} : vector<5x8x1xf32> to vector<1x8x1xf32>
    %216 = vector.shape_cast %215 : vector<1x8x1xf32> to vector<8x1xf32>
    %217 = vector.broadcast %216 : vector<8x1xf32> to vector<8x128xf32>
    %218 = arith.mulf %217, %214 : vector<8x128xf32>
    %cst_41 = arith.constant 1.000000e+00 : f32
    %219 = vector.broadcast %cst_41 : f32 to vector<8x1xf32>
    %220 = arith.subf %219, %216 : vector<8x1xf32>
    %221 = vector.broadcast %220 : vector<8x1xf32> to vector<8x128xf32>
    %222 = arith.mulf %221, %179 : vector<8x128xf32>
    %223 = arith.addf %218, %222 : vector<8x128xf32>
    %224 = vector.extract_strided_slice %223 {offsets = [0, 0], sizes = [5, 128], strides = [1, 1]} : vector<8x128xf32> to vector<5x128xf32>
    %c0_42 = arith.constant 0 : index
    %c0_43 = arith.constant 0 : index
    %225 = vector.load %arg6[%c0_42, %c0_43] : memref<5x8xf32, #tpu.memory_space<vmem>>, vector<5x8xf32>
    %c0_44 = arith.constant 0 : index
    %c0_45 = arith.constant 0 : index
    %226 = vector.load %arg7[%c0_44, %c0_45] : memref<8x512xf32, #tpu.memory_space<vmem>>, vector<8x512xf32>
    %cst_46 = arith.constant dense<0.000000e+00> : vector<5x512xf32>
    %227 = tpu.matmul %225, %226, %cst_46 {dimension_numbers = #tpu.dot_dimension_numbers<[1], [0], [0], [1], [0, 0, 1, 1], [], []>} : vector<5x8xf32>, vector<8x512xf32>, vector<5x512xf32> -> vector<5x512xf32>
    %c0_47 = arith.constant 0 : index
    %c0_48 = arith.constant 0 : index
    %228 = vector.load %arg8[%c0_47, %c0_48] : memref<128x512xf32, #tpu.memory_space<vmem>>, vector<128x512xf32>
    %cst_49 = arith.constant dense<0.000000e+00> : vector<5x512xf32>
    %229 = tpu.matmul %224, %228, %cst_49 {dimension_numbers = #tpu.dot_dimension_numbers<[1], [0], [0], [1], [0, 0, 1, 1], [], []>} : vector<5x128xf32>, vector<128x512xf32>, vector<5x512xf32> -> vector<5x512xf32>
    %230 = arith.addf %227, %229 : vector<5x512xf32>
    %c0_50 = arith.constant 0 : index
    %c0_51 = arith.constant 0 : index
    %231 = vector.load %arg10[%c0_50, %c0_51] : memref<1x512xf32, #tpu.memory_space<vmem>>, vector<1x512xf32>
    %232 = vector.broadcast %231 : vector<1x512xf32> to vector<5x512xf32>
    %233 = arith.addf %230, %232 : vector<5x512xf32>
    %c0_52 = arith.constant 0 : index
    %c0_53 = arith.constant 0 : index
    %234 = vector.load %arg9[%c0_52, %c0_53] : memref<128x512xf32, #tpu.memory_space<vmem>>, vector<128x512xf32>
    %cst_54 = arith.constant 0.000000e+00 : f32
    %235 = vector.broadcast %cst_54 : f32 to vector<1x128xf32>
    %cst_55 = arith.constant 0.000000e+00 : f32
    %236 = vector.broadcast %cst_55 : f32 to vector<1x128xf32>
    %237 = vector.extract_strided_slice %233 {offsets = [0, 0], sizes = [1, 512], strides = [1, 1]} : vector<5x512xf32> to vector<1x512xf32>
    %cst_56 = arith.constant dense<0.000000e+00> : vector<1x512xf32>
    %238 = tpu.matmul %235, %234, %cst_56 {dimension_numbers = #tpu.dot_dimension_numbers<[1], [0], [0], [1], [0, 0, 1, 1], [], []>} : vector<1x128xf32>, vector<128x512xf32>, vector<1x512xf32> -> vector<1x512xf32>
    %239 = arith.addf %237, %238 : vector<1x512xf32>
    %240 = vector.extract_strided_slice %239 {offsets = [0, 0], sizes = [1, 128], strides = [1, 1]} : vector<1x512xf32> to vector<1x128xf32>
    %241 = arith.negf %240 : vector<1x128xf32>
    %242 = math.exp %241 : vector<1x128xf32>
    %cst_57 = arith.constant 1.000000e+00 : f32
    %243 = vector.broadcast %cst_57 : f32 to vector<1x128xf32>
    %244 = arith.addf %243, %242 : vector<1x128xf32>
    %245 = arith.divf %243, %244 : vector<1x128xf32>
    %246 = vector.extract_strided_slice %239 {offsets = [0, 128], sizes = [1, 128], strides = [1, 1]} : vector<1x512xf32> to vector<1x128xf32>
    %247 = arith.negf %246 : vector<1x128xf32>
    %248 = math.exp %247 : vector<1x128xf32>
    %cst_58 = arith.constant 1.000000e+00 : f32
    %249 = vector.broadcast %cst_58 : f32 to vector<1x128xf32>
    %250 = arith.addf %249, %248 : vector<1x128xf32>
    %251 = arith.divf %249, %250 : vector<1x128xf32>
    %252 = vector.extract_strided_slice %239 {offsets = [0, 256], sizes = [1, 128], strides = [1, 1]} : vector<1x512xf32> to vector<1x128xf32>
    %253 = math.tanh %252 : vector<1x128xf32>
    %254 = vector.extract_strided_slice %239 {offsets = [0, 384], sizes = [1, 128], strides = [1, 1]} : vector<1x512xf32> to vector<1x128xf32>
    %255 = arith.negf %254 : vector<1x128xf32>
    %256 = math.exp %255 : vector<1x128xf32>
    %cst_59 = arith.constant 1.000000e+00 : f32
    %257 = vector.broadcast %cst_59 : f32 to vector<1x128xf32>
    %258 = arith.addf %257, %256 : vector<1x128xf32>
    %259 = arith.divf %257, %258 : vector<1x128xf32>
    %260 = arith.mulf %251, %236 : vector<1x128xf32>
    %261 = arith.mulf %245, %253 : vector<1x128xf32>
    %262 = arith.addf %260, %261 : vector<1x128xf32>
    %263 = math.tanh %262 : vector<1x128xf32>
    %264 = arith.mulf %259, %263 : vector<1x128xf32>
    %265 = vector.extract_strided_slice %233 {offsets = [1, 0], sizes = [1, 512], strides = [1, 1]} : vector<5x512xf32> to vector<1x512xf32>
    %cst_60 = arith.constant dense<0.000000e+00> : vector<1x512xf32>
    %266 = tpu.matmul %264, %234, %cst_60 {dimension_numbers = #tpu.dot_dimension_numbers<[1], [0], [0], [1], [0, 0, 1, 1], [], []>} : vector<1x128xf32>, vector<128x512xf32>, vector<1x512xf32> -> vector<1x512xf32>
    %267 = arith.addf %265, %266 : vector<1x512xf32>
    %268 = vector.extract_strided_slice %267 {offsets = [0, 0], sizes = [1, 128], strides = [1, 1]} : vector<1x512xf32> to vector<1x128xf32>
    %269 = arith.negf %268 : vector<1x128xf32>
    %270 = math.exp %269 : vector<1x128xf32>
    %cst_61 = arith.constant 1.000000e+00 : f32
    %271 = vector.broadcast %cst_61 : f32 to vector<1x128xf32>
    %272 = arith.addf %271, %270 : vector<1x128xf32>
    %273 = arith.divf %271, %272 : vector<1x128xf32>
    %274 = vector.extract_strided_slice %267 {offsets = [0, 128], sizes = [1, 128], strides = [1, 1]} : vector<1x512xf32> to vector<1x128xf32>
    %275 = arith.negf %274 : vector<1x128xf32>
    %276 = math.exp %275 : vector<1x128xf32>
    %cst_62 = arith.constant 1.000000e+00 : f32
    %277 = vector.broadcast %cst_62 : f32 to vector<1x128xf32>
    %278 = arith.addf %277, %276 : vector<1x128xf32>
    %279 = arith.divf %277, %278 : vector<1x128xf32>
    %280 = vector.extract_strided_slice %267 {offsets = [0, 256], sizes = [1, 128], strides = [1, 1]} : vector<1x512xf32> to vector<1x128xf32>
    %281 = math.tanh %280 : vector<1x128xf32>
    %282 = vector.extract_strided_slice %267 {offsets = [0, 384], sizes = [1, 128], strides = [1, 1]} : vector<1x512xf32> to vector<1x128xf32>
    %283 = arith.negf %282 : vector<1x128xf32>
    %284 = math.exp %283 : vector<1x128xf32>
    %cst_63 = arith.constant 1.000000e+00 : f32
    %285 = vector.broadcast %cst_63 : f32 to vector<1x128xf32>
    %286 = arith.addf %285, %284 : vector<1x128xf32>
    %287 = arith.divf %285, %286 : vector<1x128xf32>
    %288 = arith.mulf %279, %262 : vector<1x128xf32>
    %289 = arith.mulf %273, %281 : vector<1x128xf32>
    %290 = arith.addf %288, %289 : vector<1x128xf32>
    %291 = math.tanh %290 : vector<1x128xf32>
    %292 = arith.mulf %287, %291 : vector<1x128xf32>
    %293 = vector.extract_strided_slice %233 {offsets = [2, 0], sizes = [1, 512], strides = [1, 1]} : vector<5x512xf32> to vector<1x512xf32>
    %cst_64 = arith.constant dense<0.000000e+00> : vector<1x512xf32>
    %294 = tpu.matmul %292, %234, %cst_64 {dimension_numbers = #tpu.dot_dimension_numbers<[1], [0], [0], [1], [0, 0, 1, 1], [], []>} : vector<1x128xf32>, vector<128x512xf32>, vector<1x512xf32> -> vector<1x512xf32>
    %295 = arith.addf %293, %294 : vector<1x512xf32>
    %296 = vector.extract_strided_slice %295 {offsets = [0, 0], sizes = [1, 128], strides = [1, 1]} : vector<1x512xf32> to vector<1x128xf32>
    %297 = arith.negf %296 : vector<1x128xf32>
    %298 = math.exp %297 : vector<1x128xf32>
    %cst_65 = arith.constant 1.000000e+00 : f32
    %299 = vector.broadcast %cst_65 : f32 to vector<1x128xf32>
    %300 = arith.addf %299, %298 : vector<1x128xf32>
    %301 = arith.divf %299, %300 : vector<1x128xf32>
    %302 = vector.extract_strided_slice %295 {offsets = [0, 128], sizes = [1, 128], strides = [1, 1]} : vector<1x512xf32> to vector<1x128xf32>
    %303 = arith.negf %302 : vector<1x128xf32>
    %304 = math.exp %303 : vector<1x128xf32>
    %cst_66 = arith.constant 1.000000e+00 : f32
    %305 = vector.broadcast %cst_66 : f32 to vector<1x128xf32>
    %306 = arith.addf %305, %304 : vector<1x128xf32>
    %307 = arith.divf %305, %306 : vector<1x128xf32>
    %308 = vector.extract_strided_slice %295 {offsets = [0, 256], sizes = [1, 128], strides = [1, 1]} : vector<1x512xf32> to vector<1x128xf32>
    %309 = math.tanh %308 : vector<1x128xf32>
    %310 = vector.extract_strided_slice %295 {offsets = [0, 384], sizes = [1, 128], strides = [1, 1]} : vector<1x512xf32> to vector<1x128xf32>
    %311 = arith.negf %310 : vector<1x128xf32>
    %312 = math.exp %311 : vector<1x128xf32>
    %cst_67 = arith.constant 1.000000e+00 : f32
    %313 = vector.broadcast %cst_67 : f32 to vector<1x128xf32>
    %314 = arith.addf %313, %312 : vector<1x128xf32>
    %315 = arith.divf %313, %314 : vector<1x128xf32>
    %316 = arith.mulf %307, %290 : vector<1x128xf32>
    %317 = arith.mulf %301, %309 : vector<1x128xf32>
    %318 = arith.addf %316, %317 : vector<1x128xf32>
    %319 = math.tanh %318 : vector<1x128xf32>
    %320 = arith.mulf %315, %319 : vector<1x128xf32>
    %321 = vector.extract_strided_slice %233 {offsets = [3, 0], sizes = [1, 512], strides = [1, 1]} : vector<5x512xf32> to vector<1x512xf32>
    %cst_68 = arith.constant dense<0.000000e+00> : vector<1x512xf32>
    %322 = tpu.matmul %320, %234, %cst_68 {dimension_numbers = #tpu.dot_dimension_numbers<[1], [0], [0], [1], [0, 0, 1, 1], [], []>} : vector<1x128xf32>, vector<128x512xf32>, vector<1x512xf32> -> vector<1x512xf32>
    %323 = arith.addf %321, %322 : vector<1x512xf32>
    %324 = vector.extract_strided_slice %323 {offsets = [0, 0], sizes = [1, 128], strides = [1, 1]} : vector<1x512xf32> to vector<1x128xf32>
    %325 = arith.negf %324 : vector<1x128xf32>
    %326 = math.exp %325 : vector<1x128xf32>
    %cst_69 = arith.constant 1.000000e+00 : f32
    %327 = vector.broadcast %cst_69 : f32 to vector<1x128xf32>
    %328 = arith.addf %327, %326 : vector<1x128xf32>
    %329 = arith.divf %327, %328 : vector<1x128xf32>
    %330 = vector.extract_strided_slice %323 {offsets = [0, 128], sizes = [1, 128], strides = [1, 1]} : vector<1x512xf32> to vector<1x128xf32>
    %331 = arith.negf %330 : vector<1x128xf32>
    %332 = math.exp %331 : vector<1x128xf32>
    %cst_70 = arith.constant 1.000000e+00 : f32
    %333 = vector.broadcast %cst_70 : f32 to vector<1x128xf32>
    %334 = arith.addf %333, %332 : vector<1x128xf32>
    %335 = arith.divf %333, %334 : vector<1x128xf32>
    %336 = vector.extract_strided_slice %323 {offsets = [0, 256], sizes = [1, 128], strides = [1, 1]} : vector<1x512xf32> to vector<1x128xf32>
    %337 = math.tanh %336 : vector<1x128xf32>
    %338 = vector.extract_strided_slice %323 {offsets = [0, 384], sizes = [1, 128], strides = [1, 1]} : vector<1x512xf32> to vector<1x128xf32>
    %339 = arith.negf %338 : vector<1x128xf32>
    %340 = math.exp %339 : vector<1x128xf32>
    %cst_71 = arith.constant 1.000000e+00 : f32
    %341 = vector.broadcast %cst_71 : f32 to vector<1x128xf32>
    %342 = arith.addf %341, %340 : vector<1x128xf32>
    %343 = arith.divf %341, %342 : vector<1x128xf32>
    %344 = arith.mulf %335, %318 : vector<1x128xf32>
    %345 = arith.mulf %329, %337 : vector<1x128xf32>
    %346 = arith.addf %344, %345 : vector<1x128xf32>
    %347 = math.tanh %346 : vector<1x128xf32>
    %348 = arith.mulf %343, %347 : vector<1x128xf32>
    %349 = vector.extract_strided_slice %233 {offsets = [4, 0], sizes = [1, 512], strides = [1, 1]} : vector<5x512xf32> to vector<1x512xf32>
    %cst_72 = arith.constant dense<0.000000e+00> : vector<1x512xf32>
    %350 = tpu.matmul %348, %234, %cst_72 {dimension_numbers = #tpu.dot_dimension_numbers<[1], [0], [0], [1], [0, 0, 1, 1], [], []>} : vector<1x128xf32>, vector<128x512xf32>, vector<1x512xf32> -> vector<1x512xf32>
    %351 = arith.addf %349, %350 : vector<1x512xf32>
    %352 = vector.extract_strided_slice %351 {offsets = [0, 0], sizes = [1, 128], strides = [1, 1]} : vector<1x512xf32> to vector<1x128xf32>
    %353 = arith.negf %352 : vector<1x128xf32>
    %354 = math.exp %353 : vector<1x128xf32>
    %cst_73 = arith.constant 1.000000e+00 : f32
    %355 = vector.broadcast %cst_73 : f32 to vector<1x128xf32>
    %356 = arith.addf %355, %354 : vector<1x128xf32>
    %357 = arith.divf %355, %356 : vector<1x128xf32>
    %358 = vector.extract_strided_slice %351 {offsets = [0, 128], sizes = [1, 128], strides = [1, 1]} : vector<1x512xf32> to vector<1x128xf32>
    %359 = arith.negf %358 : vector<1x128xf32>
    %360 = math.exp %359 : vector<1x128xf32>
    %cst_74 = arith.constant 1.000000e+00 : f32
    %361 = vector.broadcast %cst_74 : f32 to vector<1x128xf32>
    %362 = arith.addf %361, %360 : vector<1x128xf32>
    %363 = arith.divf %361, %362 : vector<1x128xf32>
    %364 = vector.extract_strided_slice %351 {offsets = [0, 256], sizes = [1, 128], strides = [1, 1]} : vector<1x512xf32> to vector<1x128xf32>
    %365 = math.tanh %364 : vector<1x128xf32>
    %366 = vector.extract_strided_slice %351 {offsets = [0, 384], sizes = [1, 128], strides = [1, 1]} : vector<1x512xf32> to vector<1x128xf32>
    %367 = arith.negf %366 : vector<1x128xf32>
    %368 = math.exp %367 : vector<1x128xf32>
    %cst_75 = arith.constant 1.000000e+00 : f32
    %369 = vector.broadcast %cst_75 : f32 to vector<1x128xf32>
    %370 = arith.addf %369, %368 : vector<1x128xf32>
    %371 = arith.divf %369, %370 : vector<1x128xf32>
    %372 = arith.mulf %363, %346 : vector<1x128xf32>
    %373 = arith.mulf %357, %365 : vector<1x128xf32>
    %374 = arith.addf %372, %373 : vector<1x128xf32>
    %375 = math.tanh %374 : vector<1x128xf32>
    %376 = arith.mulf %371, %375 : vector<1x128xf32>
    %377 = tpu.concatenate %264, %292, %320, %348, %376 in 0 : vector<1x128xf32>, vector<1x128xf32>, vector<1x128xf32>, vector<1x128xf32>, vector<1x128xf32> -> vector<5x128xf32>
    %c0_76 = arith.constant 0 : index
    %c0_77 = arith.constant 0 : index
    %378 = vector.load %arg11[%c0_76, %c0_77] : memref<128x128xf32, #tpu.memory_space<vmem>>, vector<128x128xf32>
    %cst_78 = arith.constant dense<0.000000e+00> : vector<5x128xf32>
    %379 = tpu.matmul %377, %378, %cst_78 {dimension_numbers = #tpu.dot_dimension_numbers<[1], [0], [0], [1], [0, 0, 1, 1], [], []>} : vector<5x128xf32>, vector<128x128xf32>, vector<5x128xf32> -> vector<5x128xf32>
    %c0_79 = arith.constant 0 : index
    %c0_80 = arith.constant 0 : index
    %380 = vector.load %arg12[%c0_79, %c0_80] : memref<1x128xf32, #tpu.memory_space<vmem>>, vector<1x128xf32>
    %381 = vector.broadcast %380 : vector<1x128xf32> to vector<5x128xf32>
    %382 = arith.addf %379, %381 : vector<5x128xf32>
    %cst_81 = arith.constant dense<0xFF800000> : vector<5xf32>
    %383 = vector.multi_reduction <maximumf>, %382, %cst_81 [1] : vector<5x128xf32> to vector<5xf32>
    %384 = vector.shape_cast %383 : vector<5xf32> to vector<5x1xf32>
    %385 = vector.broadcast %384 : vector<5x1xf32> to vector<5x128xf32>
    %386 = arith.subf %382, %385 : vector<5x128xf32>
    %387 = math.exp %386 : vector<5x128xf32>
    %cst_82 = arith.constant dense<0.000000e+00> : vector<5xf32>
    %388 = vector.multi_reduction <add>, %387, %cst_82 [1] : vector<5x128xf32> to vector<5xf32>
    %389 = vector.shape_cast %388 : vector<5xf32> to vector<5x1xf32>
    %390 = math.log %389 : vector<5x1xf32>
    %391 = vector.broadcast %390 : vector<5x1xf32> to vector<5x128xf32>
    %392 = arith.subf %386, %391 : vector<5x128xf32>
    %c0_83 = arith.constant 0 : index
    %c0_84 = arith.constant 0 : index
    %393 = vector.load %arg13[%c0_83, %c0_84] : memref<5x128xf32, #tpu.memory_space<vmem>>, vector<5x128xf32>
    tpu.vector_store %arg13[%c0_83, %c0_84], %392 {strides = array<i32>} : memref<5x128xf32, #tpu.memory_space<vmem>>, vector<5x128xf32>,
    return
  }
  func.func @transform_0(%arg0: i32) -> (i32, i32, i32) {
    %c0_i32 = arith.constant 0 : i32
    %c0_i32_0 = arith.constant 0 : i32
    %c0_i32_1 = arith.constant 0 : i32
    %c0_i32_2 = arith.constant 0 : i32
    return %c0_i32, %c0_i32_0, %c0_i32_1 : i32, i32, i32
  }
  func.func @transform_1(%arg0: i32) -> (i32, i32, i32) {
    %c0_i32 = arith.constant 0 : i32
    %c0_i32_0 = arith.constant 0 : i32
    %c0_i32_1 = arith.constant 0 : i32
    %c0_i32_2 = arith.constant 0 : i32
    return %c0_i32, %c0_i32_0, %c0_i32_1 : i32, i32, i32
  }
  func.func @transform_2(%arg0: i32) -> (i32, i32) {
    %c0_i32 = arith.constant 0 : i32
    %c0_i32_0 = arith.constant 0 : i32
    %c0_i32_1 = arith.constant 0 : i32
    return %c0_i32, %c0_i32_0 : i32, i32
  }
  func.func @transform_3(%arg0: i32) -> (i32, i32) {
    %c0_i32 = arith.constant 0 : i32
    %c0_i32_0 = arith.constant 0 : i32
    %c0_i32_1 = arith.constant 0 : i32
    return %c0_i32, %c0_i32_0 : i32, i32
  }
  func.func @transform_4(%arg0: i32) -> (i32, i32) {
    %c0_i32 = arith.constant 0 : i32
    %c0_i32_0 = arith.constant 0 : i32
    %c0_i32_1 = arith.constant 0 : i32
    return %c0_i32, %c0_i32_0 : i32, i32
  }
  func.func @transform_5(%arg0: i32) -> (i32, i32) {
    %c0_i32 = arith.constant 0 : i32
    %c0_i32_0 = arith.constant 0 : i32
    %c0_i32_1 = arith.constant 0 : i32
    return %c0_i32, %c0_i32_0 : i32, i32
  }
  func.func @transform_6(%arg0: i32) -> (i32, i32) {
    %c0_i32 = arith.constant 0 : i32
    %c0_i32_0 = arith.constant 0 : i32
    %c0_i32_1 = arith.constant 0 : i32
    return %c0_i32, %c0_i32_0 : i32, i32
  }
  func.func @transform_7(%arg0: i32) -> (i32, i32) {
    %c0_i32 = arith.constant 0 : i32
    %c0_i32_0 = arith.constant 0 : i32
    %c0_i32_1 = arith.constant 0 : i32
    return %c0_i32, %c0_i32_0 : i32, i32
  }
  func.func @transform_8(%arg0: i32) -> (i32, i32) {
    %c0_i32 = arith.constant 0 : i32
    %c0_i32_0 = arith.constant 0 : i32
    %c0_i32_1 = arith.constant 0 : i32
    return %c0_i32, %c0_i32_0 : i32, i32
  }
  func.func @transform_9(%arg0: i32) -> (i32, i32) {
    %c0_i32 = arith.constant 0 : i32
    %c0_i32_0 = arith.constant 0 : i32
    %c0_i32_1 = arith.constant 0 : i32
    return %c0_i32, %c0_i32_0 : i32, i32
  }
  func.func @transform_10(%arg0: i32) -> (i32, i32) {
    %c0_i32 = arith.constant 0 : i32
    %c0_i32_0 = arith.constant 0 : i32
    %c0_i32_1 = arith.constant 0 : i32
    return %c0_i32, %c0_i32_0 : i32, i32
  }
  func.func @transform_11(%arg0: i32) -> (i32, i32) {
    %c0_i32 = arith.constant 0 : i32
    %c0_i32_0 = arith.constant 0 : i32
    %c0_i32_1 = arith.constant 0 : i32
    return %c0_i32, %c0_i32_0 : i32, i32
  }
  func.func @transform_12(%arg0: i32) -> (i32, i32) {
    %c0_i32 = arith.constant 0 : i32
    %c0_i32_0 = arith.constant 0 : i32
    %c0_i32_1 = arith.constant 0 : i32
    return %c0_i32, %c0_i32_0 : i32, i32
  }
}

</mosaic_0001>

<bundles_post_ra>
// kernel: tpu_custom_call.1
= control target key start
LH: loop header
LB: loop body
LE: loop exit
PB: predicated region body
PF: predicated region fallthrough
CT: control target
= control target key end

     0   :  { %17 = vsyncpa [#allocation3], 0  ;;  %s4150_s0 = inlined_call_operand.vmem [shape: f32[5,8,12], index: 0, kind: input, shape index: {}]   ;;  %s4151_s1 = inlined_call_operand.vmem [shape: f32[5,8,1], index: 1, kind: input, shape index: {}]   ;;  %s4152_s2 = inlined_call_operand.hbm [shape: f32[12,512], index: 2, kind: input, shape index: {}]   ;;  %s4153_s3 = inlined_call_operand.hbm [shape: f32[128,512], index: 3, kind: input, shape index: {}]   ;;  %s4154_s4 = inlined_call_operand.hbm [shape: f32[1,512], index: 4, kind: input, shape index: {}]   ;;  %s4155_s5 = inlined_call_operand.vmem [shape: f32[5,8], index: 5, kind: input, shape index: {}]   ;;  %s4156_s6 = inlined_call_operand.hbm [shape: f32[8,512], index: 6, kind: input, shape index: {}]   ;;  %s4157_s7 = inlined_call_operand.hbm [shape: f32[128,512], index: 7, kind: input, shape index: {}]   ;;  %s4158_s8 = inlined_call_operand.hbm [shape: f32[128,512], index: 8, kind: input, shape index: {}]   ;;  %s4159_s9 = inlined_call_operand.vmem [shape: f32[1,512], index: 9, kind: input, shape index: {}]   ;;  %s4160_s10 = inlined_call_operand.hbm [shape: f32[128,128], index: 10, kind: input, shape index: {}]   ;;  %s4161_s11 = inlined_call_operand.vmem [shape: f32[1,128], index: 11, kind: input, shape index: {}]   ;;  %s4162_s12 = inlined_call_operand.hbm [shape: f32[5,128], index: 12, kind: output, shape index: {}]  }
   0x1   :  { %18 = vsyncpa [#allocation6], 0 }
   0x2   :  { %19 = vsyncpa [#allocation9], 0 }
   0x3   :  { %20 = vsyncpa [#allocation12], 0 }
   0x4   :  { %21 = vsyncpa [#allocation4], 0  ;;  %s43_s23 = sshll.u32 %s4153_s3, 4  ;;  %s2919_s24 = smov [#allocation5]   ;;  %s44_s23 = int_to_ptr.hbm [resolvable:$true] %s43_s23 }
   0x5   :  { %s45_s25 = sshll.u32 %s2919_s24, 4  ;;  %s70_s28 = sshll.u32 %s4156_s6, 4  ;;  %s46_s25 = int_to_ptr.vmem [resolvable:$true] %s45_s25  ;;  %s71_s28 = int_to_ptr.hbm [resolvable:$true] %s70_s28 }
   0x6   :  { %s2920_s29 = smov 512   ;;  %s2921_s30 = smov 32  }
   0x7   :  { %51 = dma.hbm_to_vmem [thread:$0]  %s44_s23, 8192, %s46_s25, [#allocation6], %s2920_s29, %s2920_s29, %s2921_s30  }
   0x8   :  { %s2922_s13 = smov [#allocation8]   ;;  %s93_s3 = sshll.u32 %s4158_s8, 4  ;;  %s94_s3 = int_to_ptr.hbm [resolvable:$true] %s93_s3 }
   0x9   :  { %s72_s14 = sshll.u32 %s2922_s13, 4  ;;  %s30_s6 = sshll.u32 %s4152_s2, 4  ;;  %s73_s14 = int_to_ptr.vmem [resolvable:$true] %s72_s14  ;;  %s31_s6 = int_to_ptr.hbm [resolvable:$true] %s30_s6 }
   0xa   :  { %75 = dma.hbm_to_vmem [thread:$0]  %s71_s28, 512, %s73_s14, [#allocation9]  }
   0xb   :  { %s2923_s19 = smov [#allocation11]   ;;  %s2924_s21 = smov [#allocation2]  }
   0xc   :  { %s95_s20 = sshll.u32 %s2923_s19, 4  ;;  %s32_s22 = sshll.u32 %s2924_s21, 4  ;;  %s96_s20 = int_to_ptr.vmem [resolvable:$true] %s95_s20  ;;  %s33_s22 = int_to_ptr.vmem [resolvable:$true] %s32_s22 }
   0xd   :  { %101 = dma.hbm_to_vmem [thread:$0]  %s94_s3, 8192, %s96_s20, [#allocation12], %s2920_s29, %s2920_s29, %s2921_s30  }
   0xe   :  { %s57_s8 = sshll.u32 %s4154_s4, 4  ;;  %s80_s26 = sshll.u32 %s4157_s7, 4  ;;  %s58_s8 = int_to_ptr.hbm [resolvable:$true] %s57_s8  ;;  %s81_s26 = int_to_ptr.hbm [resolvable:$true] %s80_s26 }
   0xf   :  { %38 = dma.hbm_to_vmem [thread:$0]  %s31_s6, 1024, %s33_s22, [#allocation3], %s2920_s29, %s2920_s29, %s2921_s30  }
  0x10   :  { %s2925_s27 = smov [#allocation7]   ;;  %s2926_s13 = smov [#allocation10]  }
  0x11   :  { %s59_s28 = sshll.u32 %s2925_s27, 4  ;;  %s82_s14 = sshll.u32 %s2926_s13, 4  ;;  %s60_s28 = int_to_ptr.vmem [resolvable:$true] %s59_s28  ;;  %s83_s14 = int_to_ptr.vmem [resolvable:$true] %s82_s14 }
  0x12   :  { %62 = dma.hbm_to_vmem [thread:$0]  %s58_s8, 64, %s60_s28, [#allocation6]  }
  0x13   :  { %s108_s4 = sshll.u32 %s4160_s10, 4  ;;  %s2927_s3 = smov [#allocation13]   ;;  %s109_s4 = int_to_ptr.hbm [resolvable:$true] %s108_s4 }
  0x14   :  { %88 = dma.hbm_to_vmem [thread:$0]  %s81_s26, 8192, %s83_s14, [#allocation9], %s2920_s29, %s2920_s29, %s2921_s30  }
  0x15   :  { %s110_s17 = sshll.u32 %s2927_s3, 4  ;;  %s2928_s7 = smov 128   ;;  %s111_s17 = int_to_ptr.vmem [resolvable:$true] %s110_s17 }
  0x16   :  { %s2929_s18 = smov 8  }
  0x17   :  { %116 = dma.hbm_to_vmem [thread:$0]  %s109_s4, 2048, %s111_s17, [#allocation12], %s2928_s7, %s2928_s7, %s2929_s18  }
  0x18   :  { %2909 = dma.done.wait [#allocation3], 1024  }
  0x19   :  { %2910 = vsyncadd [#allocation3], 4294966272 }
  0x1a   :  { %2911 = dma.done.wait [#allocation6], 8256  }
  0x1b   :  { %2912 = vsyncadd [#allocation6], 4294959040 }
  0x1c   :  { %2913 = dma.done.wait [#allocation9], 8704  }
  0x1d   :  { %2914 = vsyncadd [#allocation9], 4294958592 }
  0x1e   :  { %2915 = dma.done.wait [#allocation12], 10240  }
  0x1f   :  { %2916 = vsyncadd [#allocation12], 4294957056  ;;  %vm186_vm0 = vcmask 1043456   ;;  %v156_v0 = vld [vmem:[#allocation2 + $0x20] sm:$0xf]  ;;  %v154_v4 = vld [vmem:[#allocation2 + $0x10] sm:$0xff] }
  0x20   :  { %v158_v1 = vld [vmem:[#allocation2 + $0x30] sm:$0xf]  ;;  %v159_v2 = vld [vmem:[#allocation2 + $0x38] sm:$0xf]  ;;  %2408 = vmatpush.msk.msra.mxu0 %vm186_vm0, %v156_v0  ;;  %2466 = vmatpush.msk.msra.mxu1 %vm186_vm0, %v156_v0  ;;  %v152_v3 = vld [vmem:[#allocation2] sm:$0xff]  ;;  %vm170_vm1 = vcmask 97280  }
  0x21   :  { %v155_v5 = vld [vmem:[#allocation2 + $0x18] sm:$0xff]  ;;  %2420 = vmatpush.msk.msra.mxu2 %vm186_vm0, %v158_v1  ;;  %2426 = vmatpush.msk.msra.mxu3 %vm186_vm0, %v159_v2  ;;  %v147_v6 = vld [vmem:[%s4150_s0] sm:$0xff]  ;;  %v157_v8 = vld [vmem:[#allocation2 + $0x28] sm:$0xf]  ;;  %v4163_v2 = vmov 0.0   ;;  %s2932_s17 = smov [#allocation14]  }
  0x22   :  { %v3041_v7 = vld [vmem:[%s4150_s0 + $0x20] sm:$0xff]  ;;  %214 = vmatpush.msra.mxu0 %v152_v3  ;;  %2467 = vmatpush.msra.mxu1 %v152_v3  ;;  %v153_v10 = vld [vmem:[#allocation2 + $0x8] sm:$0xff]  ;;  %v3048_v11 = vld [vmem:[#allocation5 + $0x1f0] sm:$0xff]  ;;  %s2393_s7 = sshll.u32 %s2932_s17, 4  ;;  %s2394_s7 = int_to_ptr.vmem [resolvable:$true] %s2393_s7 }
  0x23   :  { %278 = vmatpush.msra.mxu2 %v154_v4  ;;  %310 = vmatpush.msra.mxu3 %v155_v5  ;;  %v3043_v9 = vld [vmem:[#allocation5 + $0x1e0] sm:$0xff]  ;;  %v3054_v13 = vld [vmem:[#allocation5 + $0x1e8] sm:$0xff]  ;;  %v3058_v14 = vld [vmem:[#allocation5 + $0x1f8] sm:$0xff] }
  0x24   :  { %2409 = vmatmul.msk.f32.vlgmr.msra.gmra.mxu0 %vm170_vm1, %v147_v6  ;;  %2413 = vmatmul.msk.f32.vlgmr.msra.gmra.mxu1 %vm170_vm1, %v3041_v7  ;;  %v3052_v12 = vld [vmem:[#allocation5 + $0x1c0] sm:$0xff]  ;;  %v3060_v15 = vld [vmem:[#allocation5 + $0x1d0] sm:$0xff]  ;;  %v3065_v17 = vld [vmem:[#allocation5 + $0x1c8] sm:$0xff] }
  0x25   :  { %2414 = vmatpush.msk.msrb.mxu1 %vm186_vm0, %v157_v8  ;;  %2421 = vmatmul.msk.f32.vlgmr.msra.gmra.mxu2 %vm170_vm1, %v147_v6  ;;  %v3062_v16 = vld [vmem:[#allocation5 + $0x1a0] sm:$0xff]  ;;  %v3069_v18 = vld [vmem:[#allocation5 + $0x1d8] sm:$0xff]  ;;  %v3071_v19 = vld [vmem:[#allocation5 + $0x1b0] sm:$0xff] }
  0x26   :  { %2427 = vmatmul.msk.f32.vlgmr.msra.gmra.mxu3 %vm170_vm1, %v147_v6  ;;  %396 = vmatpush.msrb.mxu0 %v3043_v9  ;;  %v3073_v20 = vld [vmem:[#allocation5 + $0x180] sm:$0xff]  ;;  %v148_v21 = vld [vmem:[%s4150_s0 + $0x8] sm:$0xff]  ;;  %v3090_v24 = vld [vmem:[#allocation5 + $0x1b8] sm:$0xff] }
  0x27   :  { %246 = vmatpush.msrb.mxu1 %v153_v10  ;;  %436 = vmatpush.msrb.mxu2 %v3048_v11  ;;  %v3082_v22 = vld [vmem:[#allocation5 + $0x160] sm:$0xff]  ;;  %v3088_v23 = vld [vmem:[#allocation5 + $0x1a8] sm:$0xff]  ;;  %v3096_v26 = vld [vmem:[#allocation5 + $0x190] sm:$0xff] }
  0x28   :  { %397 = vmatpush.msrb.mxu0 %v3052_v12  ;;  %456 = vmatpush.msrb.mxu3 %v3058_v14  ;;  %v3094_v25 = vld [vmem:[#allocation5 + $0x140] sm:$0xff]  ;;  %v3100_v27 = vld [vmem:[#allocation5 + $0x198] sm:$0xff]  ;;  %v3102_v28 = vld [vmem:[#allocation5 + $0x188] sm:$0xff] }
  0x29   :  { %416 = vmatpush.msra.mxu1 %v3054_v13  ;;  %437 = vmatpush.msrb.mxu2 %v3060_v15  ;;  %v3104_v29 = vld [vmem:[#allocation5 + $0x120] sm:$0xff]  ;;  %v3108_v30 = vld [vmem:[#allocation5 + $0x170] sm:$0xff]  ;;  %v3112_v31 = vld [vmem:[#allocation5 + $0x178] sm:$0xff] }
  0x2a   :  { %398 = vmatpush.msrb.mxu0 %v3062_v16  ;;  %457 = vmatpush.msrb.mxu3 %v3069_v18  ;;  %v3114_v32 = vld [vmem:[#allocation5 + $0x168] sm:$0xff]  ;;  %v3116_v33 = vld [vmem:[#allocation5 + $0x100] sm:$0xff]  ;;  %v149_v34 = vld [vmem:[%s4150_s0 + $0x10] sm:$0xff] }
  0x2b   :  { %417 = vmatpush.msra.mxu1 %v3065_v17  ;;  %438 = vmatpush.msrb.mxu2 %v3071_v19  ;;  %v3125_v35 = vld [vmem:[#allocation5 + $0xe0] sm:$0xff]  ;;  %v3131_v36 = vld [vmem:[#allocation5 + $0x150] sm:$0xff]  ;;  %v3133_v37 = vld [vmem:[#allocation5 + $0x158] sm:$0xff] }
  0x2c   :  { %399 = vmatpush.msrb.mxu0 %v3073_v20  ;;  %2415 = vmatmul.msk.f32.vlgmr.msrb.gmra.mxu1 %vm170_vm1, %v147_v6  ;;  %v3137_v38 = vld [vmem:[#allocation5 + $0xc0] sm:$0xff]  ;;  %v3139_v39 = vld [vmem:[#allocation5 + $0x148] sm:$0xff]  ;;  %v3143_v40 = vld [vmem:[#allocation5 + $0x130] sm:$0xff] }
  0x2d   :  { %2410 = vmatmul.msk.f32.gmra.mxu0 %vm170_vm1, %v148_v21  ;;  %2422 = vmatmul.msk.f32.gmra.mxu2 %vm170_vm1, %v148_v21  ;;  %4274 = vst [vmem:[#allocation20_spill] sm:$0xff] %v3137_v38  ;;  %v3145_v41 = vld [vmem:[#allocation5 + $0x138] sm:$0xff]  ;;  %v3149_v42 = vld [vmem:[#allocation5 + $0xa0] sm:$0xff]  ;;  %v3151_v43 = vld [vmem:[#allocation5 + $0x128] sm:$0xff] }
  0x2e   :  { %2428 = vmatmul.msk.f32.gmra.mxu3 %vm170_vm1, %v148_v21  ;;  %400 = vmatpush.msrb.mxu0 %v3082_v22  ;;  %4275 = vst [vmem:[#allocation21_spill] sm:$0xff] %v3149_v42  ;;  %v3155_v44 = vld [vmem:[#allocation5 + $0x110] sm:$0xff]  ;;  %v3157_v45 = vld [vmem:[#allocation5 + $0x118] sm:$0xff]  ;;  %v3161_v46 = vld [vmem:[#allocation5 + $0x80] sm:$0xff] }
  0x2f   :  { %418 = vmatpush.msra.mxu1 %v3088_v23  ;;  %458 = vmatpush.msrb.mxu3 %v3090_v24  ;;  %4276 = vst [vmem:[#allocation22_spill] sm:$0xff] %v3161_v46  ;;  %v150_v47 = vld [vmem:[%s4150_s0 + $0x18] sm:$0xff]  ;;  %v3170_v48 = vld [vmem:[#allocation5 + $0x60] sm:$0xff]  ;;  %v3174_v49 = vld [vmem:[#allocation5 + $0xf0] sm:$0xff] }
  0x30   :  { %401 = vmatpush.msrb.mxu0 %v3094_v25  ;;  %439 = vmatpush.msrb.mxu2 %v3096_v26  ;;  %4277 = vst [vmem:[#allocation23_spill] sm:$0xff] %v3170_v48  ;;  %v3176_v50 = vld [vmem:[#allocation5 + $0xf8] sm:$0xff]  ;;  %v3180_v51 = vld [vmem:[#allocation5 + $0x108] sm:$0xff]  ;;  %v3182_v52 = vld [vmem:[#allocation5 + $0x40] sm:$0xff] }
  0x31   :  { %459 = vmatpush.msrb.mxu3 %v3100_v27  ;;  %419 = vmatpush.msra.mxu1 %v3102_v28  ;;  %4278 = vst [vmem:[#allocation24_spill] sm:$0xff] %v3182_v52  ;;  %v3186_v53 = vld [vmem:[#allocation5 + $0xd0] sm:$0xff]  ;;  %v3188_v54 = vld [vmem:[#allocation5 + $0xd8] sm:$0xff]  ;;  %v3192_v55 = vld [vmem:[#allocation5 + $0xe8] sm:$0xff] }
  0x32   :  { %402 = vmatpush.msrb.mxu0 %v3104_v29  ;;  %440 = vmatpush.msrb.mxu2 %v3108_v30  ;;  %4279 = vst [vmem:[#allocation25_spill] sm:$0xff] %v3186_v53  ;;  %v3194_v56 = vld [vmem:[#allocation5 + $0x20] sm:$0xff]  ;;  %v3198_v57 = vld [vmem:[#allocation5 + $0xb0] sm:$0xff]  ;;  %v3200_v58 = vld [vmem:[#allocation5 + $0xb8] sm:$0xff] }
  0x33   :  { %460 = vmatpush.msrb.mxu3 %v3112_v31  ;;  %420 = vmatpush.msra.mxu1 %v3114_v32  ;;  %4280 = vst [vmem:[#allocation26_spill] sm:$0xff] %v3188_v54  ;;  %v3204_v59 = vld [vmem:[#allocation5] sm:$0xff]  ;;  %v3206_v60 = vld [vmem:[#allocation5 + $0xc8] sm:$0xff]  ;;  %v3210_v61 = vld [vmem:[#allocation5 + $0x90] sm:$0xff] }
  0x34   :  { %403 = vmatpush.msrb.mxu0 %v3116_v33  ;;  %2416 = vmatmul.msk.f32.gmra.mxu1 %vm170_vm1, %v148_v21  ;;  %4281 = vst [vmem:[#allocation27_spill] sm:$0xff] %v3194_v56  ;;  %v3212_v62 = vld [vmem:[#allocation5 + $0x98] sm:$0xff]  ;;  %v3220_v63 = vld [vmem:[#allocation5 + $0xa8] sm:$0xff]  ;;  %v3222_v0 = vld [vmem:[#allocation5 + $0x70] sm:$0xff]  ;;  %v4165_v21 = vmov 0  }
  0x35   :  { %2411 = vmatmul.msk.f32.gmra.mxu0 %vm170_vm1, %v149_v34  ;;  %2423 = vmatmul.msk.f32.gmra.mxu2 %vm170_vm1, %v149_v34  ;;  %4282 = vst [vmem:[#allocation28_spill] sm:$0xff] %v3198_v57  ;;  %v3227_v1 = vld [vmem:[#allocation5 + $0x78] sm:$0xff]  ;;  %v3232_v3 = vld [vmem:[#allocation5 + $0x50] sm:$0xff]  ;;  %v3234_v4 = vld [vmem:[#allocation5 + $0x88] sm:$0xff] }
  0x36   :  { %2429 = vmatmul.msk.f32.gmra.mxu3 %vm170_vm1, %v149_v34  ;;  %404 = vmatpush.msrb.mxu0 %v3125_v35  ;;  %4283 = vst [vmem:[#allocation29_spill] sm:$0xff] %v3200_v58  ;;  %v3238_v5 = vld [vmem:[#allocation5 + $0x58] sm:$0xff]  ;;  %v327_v6 = vld [vmem:[%s4151_s1] sm:$0xff]  ;;  %v3244_v8 = vld [vmem:[#allocation5 + $0x30] sm:$0xff] }
  0x37   :  { %441 = vmatpush.msrb.mxu2 %v3131_v36  ;;  %461 = vmatpush.msrb.mxu3 %v3133_v37  ;;  %4284 = vst [vmem:[#allocation30_spill] sm:$0xff] %v3204_v59  ;;  %v3246_v10 = vld [vmem:[#allocation5 + $0x68] sm:$0xff] }
  0x38   :  { %405 = vmatpush.msrb.mxu0 %v3137_v38  ;;  %421 = vmatpush.msra.mxu1 %v3139_v39  ;;  %4285 = vst [vmem:[#allocation31_spill] sm:$0xff] %v3206_v60 }
  0x39   :  { %442 = vmatpush.msrb.mxu2 %v3143_v40  ;;  %462 = vmatpush.msrb.mxu3 %v3145_v41  ;;  %4286 = vst [vmem:[#allocation32_spill] sm:$0xff] %v3210_v61 }
  0x3a   :  { %406 = vmatpush.msrb.mxu0 %v3149_v42  ;;  %422 = vmatpush.msra.mxu1 %v3151_v43  ;;  %4287 = vst [vmem:[#allocation33_spill] sm:$0xff] %v3212_v62 }
  0x3b   :  { %443 = vmatpush.msrb.mxu2 %v3155_v44  ;;  %463 = vmatpush.msrb.mxu3 %v3157_v45  ;;  %4288 = vst [vmem:[#allocation34_spill] sm:$0xff] %v3220_v63 }
  0x3c   :  { %407 = vmatpush.msrb.mxu0 %v3161_v46  ;;  %2417 = vmatmul.msk.f32.gmra.mxu1 %vm170_vm1, %v149_v34  ;;  %4289 = vst [vmem:[#allocation35_spill] sm:$0xff] %v3222_v0  ;;  %v3251_v34 = vld [vmem:[#allocation5 + $0x38] sm:$0xff] }
  0x3d   :  { %2412 = vmatmul.msk.f32.gmra.mxu0 %vm170_vm1, %v150_v47  ;;  %2424 = vmatmul.msk.f32.gmra.mxu2 %vm170_vm1, %v150_v47  ;;  %4290 = vst [vmem:[#allocation36_spill] sm:$0xff] %v3227_v1 }
  0x3e   :  { %2430 = vmatmul.msk.f32.gmra.mxu3 %vm170_vm1, %v150_v47  ;;  %408 = vmatpush.msrb.mxu0 %v3170_v48  ;;  %4291 = vst [vmem:[#allocation37_spill] sm:$0xff] %v3232_v3 }
  0x3f   :  { %444 = vmatpush.msrb.mxu2 %v3174_v49  ;;  %464 = vmatpush.msrb.mxu3 %v3176_v50  ;;  %4292 = vst [vmem:[#allocation38_spill] sm:$0xff] %v3234_v4 }
  0x40   :  { %423 = vmatpush.msra.mxu1 %v3180_v51  ;;  %409 = vmatpush.msrb.mxu0 %v3182_v52  ;;  %4293 = vst [vmem:[#allocation39_spill] sm:$0xff] %v3238_v5 }
  0x41   :  { %445 = vmatpush.msrb.mxu2 %v3186_v53  ;;  %465 = vmatpush.msrb.mxu3 %v3188_v54  ;;  %4294 = vst [vmem:[#allocation40_spill] sm:$0xff] %v3244_v8 }
  0x42   :  { %424 = vmatpush.msra.mxu1 %v3192_v55  ;;  %410 = vmatpush.msrb.mxu0 %v3194_v56  ;;  %4295 = vst [vmem:[#allocation41_spill] sm:$0xff] %v3246_v10  ;;  %v328_v56 = vld [vmem:[%s4151_s1 + $0x8] sm:$0xff] }
  0x43   :  { %446 = vmatpush.msrb.mxu2 %v3198_v57  ;;  %466 = vmatpush.msrb.mxu3 %v3200_v58  ;;  %4296 = vst [vmem:[#allocation42_spill] sm:$0xff] %v3251_v34 }
  0x44   :  { %411 = vmatpush.msrb.mxu0 %v3204_v59  ;;  %425 = vmatpush.msra.mxu1 %v3206_v60  ;;  %v4300_v59 = vmov 0  }
  0x45   :  { %447 = vmatpush.msrb.mxu2 %v3210_v61  ;;  %467 = vmatpush.msrb.mxu3 %v3212_v62 }
  0x46   :  { %2418 = vmatmul.msk.f32.gmra.mxu1 %vm170_vm1, %v150_v47  ;;  %2425 = vmatmul.msk.f32.gmra.mxu2 %vm170_vm1, %v3041_v7  ;;  %v3254_v47 = vld [vmem:[#allocation5 + $0x10] sm:$0xff] }
  0x47   :  { %2431 = vmatmul.msk.f32.gmra.mxu3 %vm170_vm1, %v3041_v7  ;;  %412 = vmatmul.f32.vlgmr.msrb.gmra.mxu0 %v4163_v2  ;;  %4297 = vst [vmem:[#allocation43_spill] sm:$0xff] %v3254_v47  ;;  %v3258_v2 = vld [vmem:[#allocation5 + $0x18] sm:$0xff] }
  0x48   :  { %426 = vmatpush.msra.mxu1 %v3220_v63  ;;  %448 = vmatpush.msrb.mxu2 %v3222_v0  ;;  %4298 = vst [vmem:[#allocation44_spill] sm:$0xff] %v3258_v2 }
  0x49   :  { %468 = vmatpush.msrb.mxu3 %v3227_v1  ;;  %2482 = vset.pattern.permute.xlu0 %v4165_v21  ;;  %v3261_v21 = vld [vmem:[#allocation5 + $0x48] sm:$0xff] }
  0x4a   :  { %449 = vmatpush.msrb.mxu2 %v3232_v3  ;;  %427 = vmatpush.msra.mxu1 %v3234_v4  ;;  %4299 = vst [vmem:[#allocation45_spill] sm:$0xff] %v3261_v21 }
  0x4b   :  { %469 = vmatpush.msrb.mxu3 %v3238_v5  ;;  %545 = vperm.xlu0 %2482, %v327_v6   ;;  %v3272_v5 = vld [vmem:[#allocation5 + $0x28] sm:$0xff] }
  0x4c   :  { %450 = vmatpush.msrb.mxu2 %v3244_v8  ;;  %428 = vmatpush.msra.mxu1 %v3246_v10  ;;  %v4301_v8 = vmov 0.0   ;;  %4302 = vst [vmem:[#allocation46_spill] sm:$0xff] %v3272_v5 }
  0x4d   :  { %470 = vmatpush.msrb.mxu3 %v3251_v34  ;;  %2483 = vset.pattern.permute.xlu1 %v4300_v59  ;;  %v549_v34 = vsub.f32 1.0, %v327_v6  ;;  %v3276_v59 = vld [vmem:[#allocation5 + $0x8] sm:$0xff]  ;;  %v330_v6 = vld [vmem:[%s4151_s1 + $0x18] sm:$0xff] }
  0x4e   :  { %451 = vmatpush.msrb.mxu2 %v3254_v47  ;;  %2419 = vmatmul.msk.f32.gmra.mxu1 %vm170_vm1, %v3041_v7  ;;  %4303 = vst [vmem:[#allocation47_spill] sm:$0xff] %v3276_v59  ;;  %v712_v7 = vsub.f32 1.0, %v328_v56 }
  0x4f   :  { %471 = vmatpush.msrb.mxu3 %v3258_v2  ;;  %452 = vmatmul.f32.vlgmr.msrb.gmra.mxu2 %v4301_v8 }
  0x50   :  { %472 = vmatmul.f32.vlgmr.msrb.gmra.mxu3 %v4301_v8  ;;  %429 = vmatpush.msra.mxu1 %v3261_v21 }
  0x51   :  { %708 = vperm.xlu1 %2483, %v328_v56   ;;  %559 = vmatpush.msra.mxu0 %v3043_v9  ;;  %v3302_v56 = vld [vmem:[%s4151_s1 + $0x20] sm:$0xff] }
  0x52   :  { %430 = vmatpush.msra.mxu1 %v3272_v5  ;;  %599 = vmatpush.msra.mxu2 %v3048_v11  ;;  %4304 = vst [vmem:[#allocation48_spill] sm:$0xff] %v3302_v56 }
  0x53   :  { %552 = vperm.xlu0 %2482, %v549_v34   ;;  %619 = vmatpush.msra.mxu3 %v3058_v14  ;;  %v1204_v34 = vsub.f32 1.0, %v3302_v56  ;;  %v4307_v56 = vld [vmem:[#allocation40_spill] sm:$0xff] }
  0x54   :  { %431 = vmatpush.msra.mxu1 %v3276_v59  ;;  %560 = vmatpush.msra.mxu0 %v3052_v12 }
  0x55   :  { %600 = vmatpush.msra.mxu2 %v3060_v15  ;;  %620 = vmatpush.msra.mxu3 %v3069_v18 }
  0x56   :  { %579 = vmatpush.msrb.mxu1 %v3054_v13  ;;  %561 = vmatpush.msra.mxu0 %v3062_v16 }
  0x57   :  { %432 = vmatmul.f32.vlgmr.msra.gmra.mxu1 %v4301_v8  ;;  %601 = vmatpush.msra.mxu2 %v3071_v19  ;;  %v4306_v8 = vld [vmem:[#allocation27_spill] sm:$0xff] }
  0x58   :  { %580 = vmatpush.msrb.mxu1 %v3065_v17  ;;  %621 = vmatpush.msra.mxu3 %v3090_v24 }
  0x59   :  { %715 = vperm.xlu1 %2483, %v712_v7   ;;  %562 = vmatpush.msra.mxu0 %v3073_v20  ;;  %v4305_v7 = vld [vmem:[#allocation39_spill] sm:$0xff] }
  0x5a   :  { %581 = vmatpush.msrb.mxu1 %v3088_v23  ;;  %602 = vmatpush.msra.mxu2 %v3096_v26 }
  0x5b   :  { %1036 = vperm.xlu0 %2482, %v330_v6   ;;  %622 = vmatpush.msra.mxu3 %v3100_v27 }
  0x5c   :  { %582 = vmatpush.msrb.mxu1 %v3102_v28  ;;  %563 = vmatpush.msra.mxu0 %v3082_v22 }
  0x5d   :  { %603 = vmatpush.msra.mxu2 %v3108_v30  ;;  %623 = vmatpush.msra.mxu3 %v3112_v31 }
  0x5e   :  { %583 = vmatpush.msrb.mxu1 %v3114_v32  ;;  %564 = vmatpush.msra.mxu0 %v3094_v25 }
  0x5f   :  { %604 = vmatpush.msra.mxu2 %v3131_v36  ;;  %624 = vmatpush.msra.mxu3 %v3133_v37 }
  0x60   :  { %584 = vmatpush.msrb.mxu1 %v3139_v39  ;;  %565 = vmatpush.msra.mxu0 %v3104_v29 }
  0x61   :  { %605 = vmatpush.msra.mxu2 %v3143_v40  ;;  %625 = vmatpush.msra.mxu3 %v3145_v41 }
  0x62   :  { %585 = vmatpush.msrb.mxu1 %v3151_v43  ;;  %566 = vmatpush.msra.mxu0 %v3116_v33 }
  0x63   :  { %1207 = vperm.xlu0 %2482, %v1204_v34   ;;  %606 = vmatpush.msra.mxu2 %v3155_v44  ;;  %v1040_v34 = vsub.f32 1.0, %v330_v6  ;;  %v4312_v6 = vld [vmem:[#allocation35_spill] sm:$0xff] }
  0x64   :  { %586 = vmatpush.msrb.mxu1 %v3180_v51  ;;  %626 = vmatpush.msra.mxu3 %v3157_v45 }
  0x65   :  { %567 = vmatpush.msra.mxu0 %v3125_v35  ;;  %607 = vmatpush.msra.mxu2 %v3174_v49 }
  0x66   :  { %587 = vmatpush.msrb.mxu1 %v3192_v55  ;;  %627 = vmatpush.msra.mxu3 %v3176_v50 }
  0x67   :  { %568 = vmatpush.msra.mxu0 %v3137_v38  ;;  %608 = vmatpush.msra.mxu2 %v3186_v53 }
  0x68   :  { %588 = vmatpush.msrb.mxu1 %v3206_v60  ;;  %628 = vmatpush.msra.mxu3 %v3188_v54 }
  0x69   :  { %569 = vmatpush.msra.mxu0 %v3149_v42  ;;  %609 = vmatpush.msra.mxu2 %v3198_v57 }
  0x6a   :  { %589 = vmatpush.msrb.mxu1 %v3220_v63  ;;  %629 = vmatpush.msra.mxu3 %v3200_v58 }
  0x6b   :  { %570 = vmatpush.msra.mxu0 %v3161_v46  ;;  %610 = vmatpush.msra.mxu2 %v3210_v61 }
  0x6c   :  { %590 = vmatpush.msrb.mxu1 %v3234_v4  ;;  %630 = vmatpush.msra.mxu3 %v3212_v62 }
  0x6d   :  { %571 = vmatpush.msra.mxu0 %v3170_v48  ;;  %611 = vmatpush.msra.mxu2 %v3222_v0  ;;  %v4309_v0 = vld [vmem:[#allocation30_spill] sm:$0xff] }
  0x6e   :  { %591 = vmatpush.msrb.mxu1 %v3246_v10  ;;  %631 = vmatpush.msra.mxu3 %v3227_v1  ;;  %v4308_v10 = vld [vmem:[#allocation42_spill] sm:$0xff] }
  0x6f   :  { %572 = vmatpush.msra.mxu0 %v3182_v52  ;;  %612 = vmatpush.msra.mxu2 %v3232_v3  ;;  %v4310_v3 = vmov 0  }
  0x70   :  { %592 = vmatpush.msrb.mxu1 %v3261_v21  ;;  %632 = vmatpush.msra.mxu3 %v4305_v7 }
  0x71   :  { %573 = vmatpush.msra.mxu0 %v4306_v8  ;;  %613 = vmatpush.msra.mxu2 %v4307_v56 }
  0x72   :  { %593 = vmatpush.msrb.mxu1 %v3272_v5  ;;  %633 = vmatpush.msra.mxu3 %v4308_v10 }
  0x73   :  { %574 = vmatpush.msra.mxu0 %v4309_v0  ;;  %614 = vmatpush.msra.mxu2 %v3254_v47 }
  0x74   :  { %594 = vmatpush.msrb.mxu1 %v3276_v59  ;;  %634 = vmatpush.msra.mxu3 %v3258_v2 }
  0x75   :  { %1043 = vperm.xlu1 %2483, %v1040_v34   ;;  %2484 = vset.pattern.permute.xlu2 %v4310_v3  ;;  %v4311_v3 = vld [vmem:[#allocation41_spill] sm:$0xff] }
  0x76   :  { %723 = vmatpush.msrb.mxu0 %v3043_v9  ;;  %743 = vmatpush.msra.mxu1 %v3054_v13  ;;  %v4313_v34 = vld [vmem:[#allocation37_spill] sm:$0xff] }
  0x77   :  { %763 = vmatpush.msrb.mxu2 %v3048_v11  ;;  %783 = vmatpush.msrb.mxu3 %v3058_v14 }
  0x78   :  { %724 = vmatpush.msrb.mxu0 %v3052_v12  ;;  %744 = vmatpush.msra.mxu1 %v3065_v17 }
  0x79   :  { %764 = vmatpush.msrb.mxu2 %v3060_v15  ;;  %784 = vmatpush.msrb.mxu3 %v3069_v18 }
  0x7a   :  { %725 = vmatpush.msrb.mxu0 %v3062_v16  ;;  %745 = vmatpush.msra.mxu1 %v3088_v23 }
  0x7b   :  { %765 = vmatpush.msrb.mxu2 %v3071_v19  ;;  %785 = vmatpush.msrb.mxu3 %v3090_v24 }
  0x7c   :  { %726 = vmatpush.msrb.mxu0 %v3073_v20  ;;  %746 = vmatpush.msra.mxu1 %v3102_v28 }
  0x7d   :  { %766 = vmatpush.msrb.mxu2 %v3096_v26  ;;  %786 = vmatpush.msrb.mxu3 %v3100_v27 }
  0x7e   :  { %727 = vmatpush.msrb.mxu0 %v3082_v22  ;;  %747 = vmatpush.msra.mxu1 %v3114_v32 }
  0x7f   :  { %767 = vmatpush.msrb.mxu2 %v3108_v30  ;;  %787 = vmatpush.msrb.mxu3 %v3112_v31 }
  0x80   :  { %728 = vmatpush.msrb.mxu0 %v3094_v25  ;;  %748 = vmatpush.msra.mxu1 %v3139_v39 }
  0x81   :  { %768 = vmatpush.msrb.mxu2 %v3131_v36  ;;  %788 = vmatpush.msrb.mxu3 %v3133_v37 }
  0x82   :  { %729 = vmatpush.msrb.mxu0 %v3104_v29  ;;  %749 = vmatpush.msra.mxu1 %v3151_v43 }
  0x83   :  { %769 = vmatpush.msrb.mxu2 %v3143_v40  ;;  %789 = vmatpush.msrb.mxu3 %v3145_v41 }
  0x84   :  { %730 = vmatpush.msrb.mxu0 %v3116_v33  ;;  %750 = vmatpush.msra.mxu1 %v3180_v51 }
  0x85   :  { %770 = vmatpush.msrb.mxu2 %v3155_v44  ;;  %790 = vmatpush.msrb.mxu3 %v3157_v45 }
  0x86   :  { %731 = vmatpush.msrb.mxu0 %v3125_v35  ;;  %751 = vmatpush.msra.mxu1 %v3192_v55 }
  0x87   :  { %771 = vmatpush.msrb.mxu2 %v3174_v49  ;;  %791 = vmatpush.msrb.mxu3 %v3176_v50 }
  0x88   :  { %732 = vmatpush.msrb.mxu0 %v3137_v38  ;;  %752 = vmatpush.msra.mxu1 %v3206_v60 }
  0x89   :  { %772 = vmatpush.msrb.mxu2 %v3186_v53  ;;  %792 = vmatpush.msrb.mxu3 %v3188_v54 }
  0x8a   :  { %733 = vmatpush.msrb.mxu0 %v3149_v42  ;;  %753 = vmatpush.msra.mxu1 %v3220_v63 }
  0x8b   :  { %773 = vmatpush.msrb.mxu2 %v3198_v57  ;;  %793 = vmatpush.msrb.mxu3 %v3200_v58 }
  0x8c   :  { %734 = vmatpush.msrb.mxu0 %v3161_v46  ;;  %754 = vmatpush.msra.mxu1 %v3234_v4 }
  0x8d   :  { %774 = vmatpush.msrb.mxu2 %v3210_v61  ;;  %794 = vmatpush.msrb.mxu3 %v3212_v62 }
  0x8e   :  { %735 = vmatpush.msrb.mxu0 %v3170_v48  ;;  %755 = vmatpush.msra.mxu1 %v4311_v3 }
  0x8f   :  { %775 = vmatpush.msrb.mxu2 %v4312_v6  ;;  %795 = vmatpush.msrb.mxu3 %v3227_v1 }
  0x90   :  { %736 = vmatpush.msrb.mxu0 %v3182_v52  ;;  %756 = vmatpush.msra.mxu1 %v3261_v21  ;;  %v160_v21 = vld [vmem:[#allocation7] sm:$0xf] }
  0x91   :  { %776 = vmatpush.msrb.mxu2 %v4313_v34  ;;  %796 = vmatpush.msrb.mxu3 %v4305_v7  ;;  %v162_v34 = vperm.slane %v160_v21, 0  ;;  %v165_v3 = vperm.slane %v160_v21, 3 }
  0x92   :  { %737 = vmatpush.msrb.mxu0 %v4306_v8  ;;  %757 = vmatpush.msra.mxu1 %v3272_v5 }
  0x93   :  { %777 = vmatpush.msrb.mxu2 %v4307_v56  ;;  %797 = vmatpush.msrb.mxu3 %v4308_v10 }
  0x94   :  { %738 = vmatpush.msrb.mxu0 %v4309_v0  ;;  %758 = vmatpush.msra.mxu1 %v3276_v59  ;;  %v164_v0 = vperm.slane %v160_v21, 2  ;;  %v163_v59 = vperm.slane %v160_v21, 1 }
  0x95   :  { %778 = vmatpush.msrb.mxu2 %v3254_v47  ;;  %798 = vmatpush.msrb.mxu3 %v3258_v2 }
  0xa1   :  { %v216_v52 = vpop.f32.mrf.mxu0  ;;  %v228_v7 = vpop.f32.mrf.mxu1 }
  0xa2   :  { %v3419_v1 = vadd.f32 %v228_v7, %v162_v34 }
  0xa4   :  { %4314 = vst [vmem:[#allocation49_spill] sm:$0xff] %v3419_v1 }
  0xa8   :  { %v3421_v8 = vpop.f32.mrf.mxu2 }
  0xa9   :  { %v312_v5 = vpop.f32.mrf.mxu3  ;;  %v248_v56 = vpop.f32.mrf.mxu1 }
  0xaa   :  { %v219_v6 = vpop.f32.mrf.mxu0 }
  0xab   :  { %v3423_v10 = vadd.f32 %v219_v6, %v162_v34 }
  0xad   :  { %4315 = vst [vmem:[#allocation50_spill] sm:$0xff] %v3423_v10 }
  0xb0   :  { %v283_v48 = vpop.f32.mrf.mxu2 }
  0xb1   :  { %v3425_v47 = vadd.f32 %v283_v48, %v164_v0  ;;  %v315_v2 = vpop.f32.mrf.mxu3  ;;  %v251_v62 = vpop.f32.mrf.mxu1 }
  0xb2   :  { %v3427_v61 = vadd.f32 %v315_v2, %v165_v3  ;;  %v222_v4 = vpop.f32.mrf.mxu0  ;;  %v3429_v7 = vadd.f32 %v251_v62, %v163_v59 }
  0xb3   :  { %4316 = vst [vmem:[#allocation51_spill] sm:$0xff] %v3425_v47  ;;  %v3431_v1 = vadd.f32 %v222_v4, %v162_v34  ;;  %v217_v4 = vadd.f32 %v216_v52, %v162_v34  ;;  %v249_v52 = vadd.f32 %v248_v56, %v163_v59  ;;  %v329_v56 = vld [vmem:[%s4151_s1 + $0x10] sm:$0xff] }
  0xb4   :  { %4317 = vst [vmem:[#allocation52_spill] sm:$0xff] %v3427_v61  ;;  %872 = vperm.xlu2 %2484, %v329_v56  }
  0xb5   :  { %4318 = vst [vmem:[#allocation53_spill] sm:$0xff] %v3429_v7 }
  0xb6   :  { %4319 = vst [vmem:[#allocation54_spill] sm:$0xff] %v3431_v1 }
  0xb8   :  { %v286_v46 = vpop.f32.mrf.mxu2 }
  0xb9   :  { %v3433_v58 = vadd.f32 %v286_v46, %v164_v0  ;;  %v318_v6 = vpop.f32.mrf.mxu3  ;;  %v254_v10 = vpop.f32.mrf.mxu1 }
  0xba   :  { %v3435_v57 = vadd.f32 %v318_v6, %v165_v3  ;;  %v225_v21 = vpop.f32.mrf.mxu0  ;;  %v3437_v63 = vadd.f32 %v254_v10, %v163_v59 }
  0xbb   :  { %4320 = vst [vmem:[#allocation55_spill] sm:$0xff] %v3433_v58  ;;  %v3439_v48 = vadd.f32 %v225_v21, %v162_v34 }
  0xbc   :  { %4321 = vst [vmem:[#allocation56_spill] sm:$0xff] %v3435_v57 }
  0xbd   :  { %4322 = vst [vmem:[#allocation57_spill] sm:$0xff] %v3437_v63 }
  0xbe   :  { %4323 = vst [vmem:[#allocation58_spill] sm:$0xff] %v3439_v48 }
  0xc0   :  { %v289_v47 = vpop.f32.mrf.mxu2 }
  0xc1   :  { %v3441_v2 = vadd.f32 %v289_v47, %v164_v0  ;;  %v321_v61 = vpop.f32.mrf.mxu3 }
  0xc2   :  { %v3443_v62 = vadd.f32 %v321_v61, %v165_v3 }
  0xc3   :  { %4324 = vst [vmem:[#allocation59_spill] sm:$0xff] %v3441_v2  ;;  %v257_v1 = vpop.f32.mrf.mxu1 }
  0xc4   :  { %4325 = vst [vmem:[#allocation60_spill] sm:$0xff] %v3443_v62  ;;  %v3445_v7 = vadd.f32 %v257_v1, %v163_v59  ;;  %v413_v46 = vpop.f32.mrf.mxu0  ;;  %v313_v62 = vadd.f32 %v312_v5, %v165_v3 }
  0xc5   :  { %v476_v58 = vadd.f32 %v413_v46, %v217_v4 }
  0xc6   :  { %4326 = vst [vmem:[#allocation61_spill] sm:$0xff] %v3445_v7 }
  0xc7   :  { %v2432_v42 = vmul.f32 -1.442695, %v476_v58 }
  0xc9   :  { %2486 = vpow2.f32 %v2432_v42  ;;  %v292_v6 = vpop.f32.mrf.mxu2 }
  0xca   :  { %v3447_v57 = vadd.f32 %v292_v6, %v164_v0  ;;  %v324_v10 = vpop.f32.mrf.mxu3 }
  0xcb   :  { %v3449_v21 = vadd.f32 %v324_v10, %v165_v3  ;;  %v260_v48 = vpop.f32.mrf.mxu1  ;;  %v281_v3 = vadd.f32 %v3421_v8, %v164_v0 }
  0xcc   :  { %4327 = vst [vmem:[#allocation62_spill] sm:$0xff] %v3447_v57  ;;  %v3451_v47 = vadd.f32 %v260_v48, %v163_v59 }
  0xcd   :  { %4328 = vst [vmem:[#allocation63_spill] sm:$0xff] %v3449_v21 }
  0xce   :  { %4329 = vst [vmem:[#allocation64_spill] sm:$0xff] %v3451_v47 }
  0xcf   :  { %v2487_v2 = vpop.eup %2486 }
  0xd0   :  { %v483_v61 = vadd.f32 1.0, %v2487_v2 }
  0xd2   :  { %2488 = vrcp.f32 %v483_v61  ;;  %v453_v5 = vpop.f32.mrf.mxu2  ;;  %vm489_vm3 = vweird.f32 %v483_v61 }
  0xd3   :  { %v473_v34 = vpop.f32.mrf.mxu3 }
  0xd4   :  { %v433_v1 = vpop.f32.mrf.mxu1  ;;  %v479_v7 = vadd.f32 %v473_v34, %v313_v62  ;;  %v478_v62 = vadd.f32 %v453_v5, %v281_v3 }
  0xd5   :  { %v477_v4 = vadd.f32 %v433_v1, %v249_v52 }
  0xd6   :  { %v2434_v58 = vmul.f32 -1.442695, %v479_v7 }
  0xd7   :  { %v2433_v42 = vmul.f32 -1.442695, %v477_v4  ;;  %v495_v4 = vand.u32 2147483648, %v483_v61 }
  0xd8   :  { %2490 = vpow2.f32 %v2434_v58  ;;  %v2489_v46 = vpop.eup %2488  ;;  %v876_v58 = vsub.f32 1.0, %v329_v56 }
  0xd9   :  { %2492 = vpow2.f32 %v2433_v42  ;;  %v485_v6 = vmul.f32 %v2489_v46, %v483_v61  ;;  %vm490_vm2 = vweird.f32 %v2489_v46  ;;  %v496_v8 = vor.u32 1.1754944e-38, %v495_v4 }
  0xda   :  { %vm491_vm4 = vmor %vm489_vm3, %vm490_vm2  ;;  %879 = vperm.xlu2 %2484, %v876_v58  }
  0xdb   :  { %v486_v47 = vsub.f32 1.0, %v485_v6 }
  0xdd   :  { %v487_v59 = vmul.f32 %v2489_v46, %v486_v47  ;;  %v493_v47 = vand.u32 2147483647, %v483_v61 }
  0xde   :  { %v2491_v10 = vpop.eup %2490 }
  0xdf   :  { %v2493_v57 = vpop.eup %2492  ;;  %v522_v21 = vadd.f32 1.0, %v2491_v10  ;;  %v488_v34 = vadd.f32 %v2489_v46, %v487_v59  ;;  %vm494_vm6 = vcmp.eq.f32.partialorder %v493_v47, 8.507059e+37 }
  0xe0   :  { %v502_v48 = vadd.f32 1.0, %v2493_v57  ;;  %v546_v57 = vpop.permute.xlu0 %545 }
  0xe1   :  { %2494 = vrcp.f32 %v522_v21  ;;  %v492_v10 = vsel %vm491_vm4, %v2489_v46, %v488_v34  ;;  %v534_v4 = vand.u32 2147483648, %v522_v21  ;;  %vm528_vm11 = vweird.f32 %v522_v21 }
  0xe2   :  { %2496 = vrcp.f32 %v502_v48  ;;  %v514_v6 = vand.u32 2147483648, %v502_v48  ;;  %v512_v0 = vand.u32 2147483647, %v502_v48  ;;  %vm508_vm7 = vweird.f32 %v502_v48 }
  0xe3   :  { %2498 = vtanh.f32 %v478_v62  ;;  %v497_v59 = vsel %vm494_vm6, %v496_v8, %v492_v10  ;;  %v535_v47 = vor.u32 1.1754944e-38, %v534_v4 }
  0xe4   :  { %v515_v3 = vor.u32 1.1754944e-38, %v514_v6  ;;  %vm513_vm9 = vcmp.eq.f32.partialorder %v512_v0, 8.507059e+37 }
  0xe7   :  { %v2495_v7 = vpop.eup %2494 }
  0xe8   :  { %v2497_v2 = vpop.eup %2496  ;;  %v524_v1 = vmul.f32 %v2495_v7, %v522_v21  ;;  %v553_v46 = vpop.permute.xlu0 %552  ;;  %vm529_vm10 = vweird.f32 %v2495_v7 }
  0xe9   :  { %v504_v52 = vmul.f32 %v2497_v2, %v502_v48  ;;  %vm509_vm5 = vweird.f32 %v2497_v2  ;;  %v532_v48 = vand.u32 2147483647, %v522_v21  ;;  %vm530_vm12 = vmor %vm528_vm11, %vm529_vm10  ;;  %v4361_v21 = vld [vmem:[#allocation52_spill] sm:$0xff] }
  0xea   :  { %v525_v54 = vsub.f32 1.0, %v524_v1  ;;  %vm510_vm8 = vmor %vm508_vm7, %vm509_vm5  ;;  %v4330_v1 = vld [vmem:[#allocation48_spill] sm:$0xff] }
  0xeb   :  { %v505_v42 = vsub.f32 1.0, %v504_v52  ;;  %v2499_v52 = vpop.eup %2498  ;;  %1200 = vperm.xlu2 %2484, %v4330_v1   ;;  %vm533_vm13 = vcmp.eq.f32.partialorder %v532_v48, 8.507059e+37 }
  0xec   :  { %v526_v62 = vmul.f32 %v2495_v7, %v525_v54  ;;  %v539_v60 = vmul.f32 %v2499_v52, %v497_v59 }
  0xed   :  { %v506_v63 = vmul.f32 %v2497_v2, %v505_v42  ;;  %v555_v42 = vmul.f32 0.0, %v553_v46 }
  0xee   :  { %v527_v38 = vadd.f32 %v2495_v7, %v526_v62  ;;  %v4362_v62 = vld [vmem:[#allocation51_spill] sm:$0xff] }
  0xef   :  { %v507_v5 = vadd.f32 %v2497_v2, %v506_v63 }
  0xf0   :  { %v531_v58 = vsel %vm530_vm12, %v2495_v7, %v527_v38  ;;  %v4357_v38 = vld [vmem:[#allocation43_spill] sm:$0xff] }
  0xf1   :  { %v511_v56 = vsel %vm510_vm8, %v2497_v2, %v507_v5  ;;  %v536_v6 = vsel %vm533_vm13, %v535_v47, %v531_v58 }
  0xf2   :  { %v516_v61 = vsel %vm513_vm9, %v515_v3, %v511_v56 }
  0xf3   :  { %v538_v53 = vmul.f32 0.0, %v516_v61 }
  0xf5   :  { %v540_v34 = vadd.f32 %v539_v60, %v538_v53 }
  0xf7   :  { %2500 = vtanh.f32 %v540_v34  ;;  %v557_v63 = vmul.f32 %v546_v57, %v540_v34 }
  0xf9   :  { %v3458_v2 = vadd.f32 %v557_v63, %v555_v42 }
  0xfd   :  { %v2501_v54 = vpop.eup %2500 }
  0xfe   :  { %v542_v10 = vmul.f32 %v2501_v54, %v536_v6 }
 0x100   :  { %v548_v53 = vmul.f32 %v546_v57, %v542_v10 }
 0x102   :  { %v3460_v60 = vadd.f32 %v555_v42, %v548_v53 }
 0x104   :  { %575 = vmatmul.f32.vlgmr.msra.gmra.mxu0 %v3460_v60  ;;  %595 = vmatmul.f32.vlgmr.msrb.gmra.mxu1 %v3460_v60 }
 0x105   :  { %615 = vmatmul.f32.vlgmr.msra.gmra.mxu2 %v3460_v60  ;;  %635 = vmatmul.f32.vlgmr.msra.gmra.mxu3 %v3460_v60 }
 0x106   :  { %887 = vmatpush.msra.mxu0 %v3043_v9  ;;  %907 = vmatpush.msrb.mxu1 %v3054_v13  ;;  %v4331_v9 = vld [vmem:[#allocation20_spill] sm:$0xff]  ;;  %v4334_v13 = vld [vmem:[#allocation26_spill] sm:$0xff] }
 0x107   :  { %927 = vmatpush.msra.mxu2 %v3048_v11  ;;  %947 = vmatpush.msra.mxu3 %v3058_v14  ;;  %v4332_v11 = vld [vmem:[#allocation31_spill] sm:$0xff]  ;;  %v4335_v14 = vld [vmem:[#allocation21_spill] sm:$0xff] }
 0x108   :  { %888 = vmatpush.msra.mxu0 %v3052_v12  ;;  %908 = vmatpush.msrb.mxu1 %v3065_v17  ;;  %v4333_v12 = vld [vmem:[#allocation25_spill] sm:$0xff] }
 0x109   :  { %928 = vmatpush.msra.mxu2 %v3060_v15  ;;  %948 = vmatpush.msra.mxu3 %v3069_v18  ;;  %v4336_v15 = vld [vmem:[#allocation34_spill] sm:$0xff]  ;;  %v4338_v17 = vld [vmem:[#allocation29_spill] sm:$0xff] }
 0x10a   :  { %889 = vmatpush.msra.mxu0 %v3062_v16  ;;  %909 = vmatpush.msrb.mxu1 %v3088_v23  ;;  %v4337_v16 = vld [vmem:[#allocation28_spill] sm:$0xff]  ;;  %v4339_v18 = vld [vmem:[#allocation22_spill] sm:$0xff]  ;;  %v4343_v23 = vld [vmem:[#allocation23_spill] sm:$0xff] }
 0x10b   :  { %929 = vmatpush.msra.mxu2 %v3071_v19  ;;  %949 = vmatpush.msra.mxu3 %v3090_v24  ;;  %v4340_v19 = vld [vmem:[#allocation38_spill] sm:$0xff]  ;;  %v4344_v24 = vld [vmem:[#allocation41_spill] sm:$0xff] }
 0x10c   :  { %890 = vmatpush.msra.mxu0 %v3073_v20  ;;  %910 = vmatpush.msrb.mxu1 %v3102_v28  ;;  %v4341_v20 = vld [vmem:[#allocation32_spill] sm:$0xff]  ;;  %v4348_v28 = vld [vmem:[#allocation45_spill] sm:$0xff] }
 0x10d   :  { %930 = vmatpush.msra.mxu2 %v3096_v26  ;;  %950 = vmatpush.msra.mxu3 %v3100_v27  ;;  %v4346_v26 = vld [vmem:[#allocation36_spill] sm:$0xff] }
 0x10e   :  { %891 = vmatpush.msra.mxu0 %v3082_v22  ;;  %911 = vmatpush.msrb.mxu1 %v3114_v32  ;;  %v4342_v22 = vld [vmem:[#allocation33_spill] sm:$0xff]  ;;  %v4347_v27 = vld [vmem:[#allocation24_spill] sm:$0xff]  ;;  %v4352_v32 = vld [vmem:[#allocation46_spill] sm:$0xff] }
 0x10f   :  { %931 = vmatpush.msra.mxu2 %v3108_v30  ;;  %951 = vmatpush.msra.mxu3 %v3112_v31  ;;  %v4350_v30 = vld [vmem:[#allocation39_spill] sm:$0xff] }
 0x110   :  { %892 = vmatpush.msra.mxu0 %v3094_v25  ;;  %912 = vmatpush.msrb.mxu1 %v3139_v39  ;;  %v4345_v25 = vld [vmem:[#allocation35_spill] sm:$0xff]  ;;  %v4358_v39 = vld [vmem:[#allocation44_spill] sm:$0xff] }
 0x111   :  { %932 = vmatpush.msra.mxu2 %v3131_v36  ;;  %952 = vmatpush.msra.mxu3 %v3133_v37  ;;  %v4351_v31 = vld [vmem:[#allocation27_spill] sm:$0xff]  ;;  %v4355_v36 = vld [vmem:[#allocation30_spill] sm:$0xff] }
 0x112   :  { %893 = vmatpush.msra.mxu0 %v3104_v29  ;;  %913 = vmatpush.msrb.mxu1 %v3151_v43  ;;  %v4349_v29 = vld [vmem:[#allocation37_spill] sm:$0xff]  ;;  %v4356_v37 = vld [vmem:[#allocation47_spill] sm:$0xff]  ;;  %v4359_v43 = vld [vmem:[#allocation50_spill] sm:$0xff] }
 0x113   :  { %933 = vmatpush.msra.mxu2 %v3143_v40  ;;  %953 = vmatpush.msra.mxu3 %v3145_v41 }
 0x114   :  { %894 = vmatpush.msra.mxu0 %v3116_v33  ;;  %914 = vmatpush.msrb.mxu1 %v3180_v51  ;;  %v4353_v33 = vld [vmem:[#allocation40_spill] sm:$0xff] }
 0x115   :  { %934 = vmatpush.msra.mxu2 %v3155_v44  ;;  %954 = vmatpush.msra.mxu3 %v3157_v45  ;;  %v4360_v45 = vld [vmem:[#allocation53_spill] sm:$0xff] }
 0x116   :  { %895 = vmatpush.msra.mxu0 %v3125_v35  ;;  %915 = vmatpush.msrb.mxu1 %v3192_v55  ;;  %v4354_v35 = vld [vmem:[#allocation42_spill] sm:$0xff] }
 0x117   :  { %935 = vmatpush.msra.mxu2 %v3174_v49  ;;  %955 = vmatpush.msra.mxu3 %v3176_v50 }
 0x118   :  { %896 = vmatpush.msra.mxu0 %v4331_v9  ;;  %916 = vmatpush.msrb.mxu1 %v4332_v11 }
 0x119   :  { %936 = vmatpush.msra.mxu2 %v4333_v12  ;;  %956 = vmatpush.msra.mxu3 %v4334_v13 }
 0x11a   :  { %897 = vmatpush.msra.mxu0 %v4335_v14  ;;  %917 = vmatpush.msrb.mxu1 %v4336_v15 }
 0x11b   :  { %937 = vmatpush.msra.mxu2 %v4337_v16  ;;  %957 = vmatpush.msra.mxu3 %v4338_v17 }
 0x11c   :  { %898 = vmatpush.msra.mxu0 %v4339_v18  ;;  %918 = vmatpush.msrb.mxu1 %v4340_v19 }
 0x11d   :  { %938 = vmatpush.msra.mxu2 %v4341_v20  ;;  %958 = vmatpush.msra.mxu3 %v4342_v22 }
 0x11e   :  { %899 = vmatpush.msra.mxu0 %v4343_v23  ;;  %919 = vmatpush.msrb.mxu1 %v4344_v24 }
 0x11f   :  { %939 = vmatpush.msra.mxu2 %v4345_v25  ;;  %959 = vmatpush.msra.mxu3 %v4346_v26 }
 0x120   :  { %900 = vmatpush.msra.mxu0 %v4347_v27  ;;  %920 = vmatpush.msrb.mxu1 %v4348_v28 }
 0x121   :  { %940 = vmatpush.msra.mxu2 %v4349_v29  ;;  %960 = vmatpush.msra.mxu3 %v4350_v30 }
 0x122   :  { %901 = vmatpush.msra.mxu0 %v4351_v31  ;;  %921 = vmatpush.msrb.mxu1 %v4352_v32 }
 0x123   :  { %941 = vmatpush.msra.mxu2 %v4353_v33  ;;  %961 = vmatpush.msra.mxu3 %v4354_v35 }
 0x124   :  { %902 = vmatpush.msra.mxu0 %v4355_v36  ;;  %922 = vmatpush.msrb.mxu1 %v4356_v37  ;;  %v3535_v36 = vpop.permute.xlu1 %708 }
 0x125   :  { %942 = vmatpush.msra.mxu2 %v4357_v38  ;;  %962 = vmatpush.msra.mxu3 %v4358_v39 }
 0x181   :  { %v576_v40 = vpop.f32.mrf.mxu0  ;;  %v596_v41 = vpop.f32.mrf.mxu1 }
 0x182   :  { %v639_v44 = vadd.f32 %v576_v40, %v4359_v43  ;;  %v640_v49 = vadd.f32 %v596_v41, %v4360_v45 }
 0x184   :  { %v2435_v50 = vmul.f32 -1.442695, %v639_v44  ;;  %v2436_v51 = vmul.f32 -1.442695, %v640_v49 }
 0x186   :  { %2502 = vpow2.f32 %v2435_v50 }
 0x187   :  { %2504 = vpow2.f32 %v2436_v51 }
 0x188   :  { %v636_v55 = vpop.f32.mrf.mxu3  ;;  %v616_v3 = vpop.f32.mrf.mxu2 }
 0x189   :  { %v642_v7 = vadd.f32 %v636_v55, %v4361_v21  ;;  %v641_v46 = vadd.f32 %v616_v3, %v4362_v62  ;;  %v3540_v21 = vpop.permute.xlu1 %715  ;;  %v2653_v3 = vld [vmem:[#allocation5 + $0x1f8] sm:$0xff]  ;;  %v2658_v62 = vld [vmem:[#allocation5 + $0x1a0] sm:$0xff] }
 0x18b   :  { %v2437_v57 = vmul.f32 -1.442695, %v642_v7  ;;  %v718_v7 = vmul.f32 %v3540_v21, %v3460_v60  ;;  %v2654_v60 = vld [vmem:[#allocation5 + $0x1c0] sm:$0xff] }
 0x18c   :  { %v2503_v0 = vpop.eup %2502 }
 0x18d   :  { %v2505_v8 = vpop.eup %2504  ;;  %v646_v5 = vadd.f32 1.0, %v2503_v0  ;;  %2506 = vpow2.f32 %v2437_v57 }
 0x18e   :  { %v665_v59 = vadd.f32 1.0, %v2505_v8  ;;  %v2650_v8 = vld [vmem:[#allocation5 + $0x1e0] sm:$0xff] }
 0x18f   :  { %2508 = vrcp.f32 %v646_v5  ;;  %v658_v48 = vand.u32 2147483648, %v646_v5  ;;  %v656_v47 = vand.u32 2147483647, %v646_v5  ;;  %vm652_vm1 = vweird.f32 %v646_v5 }
 0x190   :  { %2510 = vrcp.f32 %v665_v59  ;;  %v677_v54 = vand.u32 2147483648, %v665_v59  ;;  %v675_v10 = vand.u32 2147483647, %v665_v59  ;;  %vm671_vm2 = vweird.f32 %v665_v59 }
 0x191   :  { %v659_v11 = vor.u32 1.1754944e-38, %v658_v48  ;;  %vm657_vm4 = vcmp.eq.f32.partialorder %v656_v47, 8.507059e+37  ;;  %v2665_v48 = vld [vmem:[#allocation5 + $0x198] sm:$0xff]  ;;  %v2667_v47 = vld [vmem:[#allocation5 + $0x168] sm:$0xff] }
 0x192   :  { %v678_v16 = vor.u32 1.1754944e-38, %v677_v54  ;;  %vm676_vm6 = vcmp.eq.f32.partialorder %v675_v10, 8.507059e+37  ;;  %v2668_v54 = vld [vmem:[#allocation5 + $0x170] sm:$0xff]  ;;  %v2670_v10 = vld [vmem:[#allocation5 + $0x140] sm:$0xff] }
 0x193   :  { %v2507_v56 = vpop.eup %2506 }
 0x194   :  { %v685_v52 = vadd.f32 1.0, %v2507_v56  ;;  %v2655_v56 = vld [vmem:[#allocation5 + $0x1c8] sm:$0xff] }
 0x195   :  { %v2509_v61 = vpop.eup %2508 }
 0x196   :  { %v2511_v34 = vpop.eup %2510  ;;  %v648_v42 = vmul.f32 %v2509_v61, %v646_v5  ;;  %2512 = vrcp.f32 %v685_v52  ;;  %vm653_vm14 = vweird.f32 %v2509_v61  ;;  %v697_v43 = vand.u32 2147483648, %v685_v52  ;;  %v2651_v5 = vld [vmem:[#allocation5 + $0x1e8] sm:$0xff] }
 0x197   :  { %v667_v1 = vmul.f32 %v2511_v34, %v665_v59  ;;  %2514 = vtanh.f32 %v641_v46  ;;  %vm672_vm15 = vweird.f32 %v2511_v34  ;;  %vm654_vm3 = vmor %vm652_vm1, %vm653_vm14  ;;  %vm691_vm8 = vweird.f32 %v685_v52  ;;  %v2652_v59 = vld [vmem:[#allocation5 + $0x1f0] sm:$0xff]  ;;  %v2659_v46 = vld [vmem:[#allocation5 + $0x1a8] sm:$0xff] }
 0x198   :  { %v649_v4 = vsub.f32 1.0, %v648_v42  ;;  %vm673_vm5 = vmor %vm671_vm2, %vm672_vm15  ;;  %v695_v44 = vand.u32 2147483647, %v685_v52  ;;  %v698_v49 = vor.u32 1.1754944e-38, %v697_v43  ;;  %v2661_v42 = vld [vmem:[#allocation5 + $0x1b8] sm:$0xff]  ;;  %v2687_v43 = vld [vmem:[#allocation5 + $0xc8] sm:$0xff] }
 0x199   :  { %v668_v63 = vsub.f32 1.0, %v667_v1  ;;  %v2662_v1 = vld [vmem:[#allocation5 + $0x180] sm:$0xff] }
 0x19a   :  { %v650_v58 = vmul.f32 %v2509_v61, %v649_v4  ;;  %vm696_vm10 = vcmp.eq.f32.partialorder %v695_v44, 8.507059e+37  ;;  %v2663_v4 = vld [vmem:[#allocation5 + $0x188] sm:$0xff]  ;;  %v2688_v44 = vld [vmem:[#allocation5 + $0xd0] sm:$0xff] }
 0x19b   :  { %v669_v6 = vmul.f32 %v2511_v34, %v668_v63  ;;  %v2664_v63 = vld [vmem:[#allocation5 + $0x190] sm:$0xff] }
 0x19c   :  { %v2513_v53 = vpop.eup %2512  ;;  %v651_v9 = vadd.f32 %v2509_v61, %v650_v58  ;;  %v2666_v58 = vld [vmem:[#allocation5 + $0x160] sm:$0xff] }
 0x19d   :  { %v687_v12 = vmul.f32 %v2513_v53, %v685_v52  ;;  %v670_v13 = vadd.f32 %v2511_v34, %v669_v6  ;;  %v2515_v17 = vpop.eup %2514  ;;  %vm692_vm7 = vweird.f32 %v2513_v53  ;;  %v2656_v52 = vld [vmem:[#allocation5 + $0x1d0] sm:$0xff]  ;;  %v2669_v6 = vld [vmem:[#allocation5 + $0x178] sm:$0xff] }
 0x19e   :  { %v655_v14 = vsel %vm654_vm3, %v2509_v61, %v651_v9  ;;  %vm693_vm9 = vmor %vm691_vm8, %vm692_vm7  ;;  %v2657_v61 = vld [vmem:[#allocation5 + $0x1d8] sm:$0xff]  ;;  %v2672_v9 = vld [vmem:[#allocation5 + $0x150] sm:$0xff] }
 0x19f   :  { %v660_v18 = vsel %vm657_vm4, %v659_v11, %v655_v14  ;;  %v688_v20 = vsub.f32 1.0, %v687_v12  ;;  %v674_v22 = vsel %vm673_vm5, %v2511_v34, %v670_v13  ;;  %v2660_v34 = vld [vmem:[#allocation5 + $0x1b0] sm:$0xff]  ;;  %v2673_v11 = vld [vmem:[#allocation5 + $0x158] sm:$0xff]  ;;  %v2674_v12 = vld [vmem:[#allocation5 + $0x120] sm:$0xff] }
 0x1a0   :  { %v702_v23 = vmul.f32 %v2515_v17, %v660_v18  ;;  %v679_v25 = vsel %vm676_vm6, %v678_v16, %v674_v22  ;;  %v2675_v13 = vld [vmem:[#allocation5 + $0x128] sm:$0xff]  ;;  %v2676_v14 = vld [vmem:[#allocation5 + $0x130] sm:$0xff]  ;;  %v2677_v16 = vld [vmem:[#allocation5 + $0x138] sm:$0xff] }
 0x1a1   :  { %v689_v27 = vmul.f32 %v2513_v53, %v688_v20  ;;  %v701_v31 = vmul.f32 %v679_v25, %v3458_v2  ;;  %v2678_v17 = vld [vmem:[#allocation5 + $0x100] sm:$0xff]  ;;  %v2679_v18 = vld [vmem:[#allocation5 + $0x108] sm:$0xff]  ;;  %v2680_v20 = vld [vmem:[#allocation5 + $0x110] sm:$0xff] }
 0x1a2   :  { %v2681_v22 = vld [vmem:[#allocation5 + $0x118] sm:$0xff]  ;;  %v2683_v25 = vld [vmem:[#allocation5 + $0xe8] sm:$0xff] }
 0x1a3   :  { %v3537_v40 = vadd.f32 %v702_v23, %v701_v31  ;;  %v690_v41 = vadd.f32 %v2513_v53, %v689_v27  ;;  %v2682_v23 = vld [vmem:[#allocation5 + $0xe0] sm:$0xff]  ;;  %v2684_v27 = vld [vmem:[#allocation5 + $0xf0] sm:$0xff]  ;;  %v2685_v31 = vld [vmem:[#allocation5 + $0xf8] sm:$0xff] }
 0x1a5   :  { %2516 = vtanh.f32 %v3537_v40  ;;  %v694_v45 = vsel %vm693_vm9, %v2513_v53, %v690_v41  ;;  %v2671_v53 = vld [vmem:[#allocation5 + $0x148] sm:$0xff]  ;;  %v2686_v41 = vld [vmem:[#allocation5 + $0xc0] sm:$0xff] }
 0x1a6   :  { %v699_v51 = vsel %vm696_vm10, %v698_v49, %v694_v45  ;;  %v2689_v45 = vld [vmem:[#allocation5 + $0xd8] sm:$0xff]  ;;  %v2690_v49 = vld [vmem:[#allocation5 + $0xa0] sm:$0xff] }
 0x1ab   :  { %v2517_v50 = vpop.eup %2516 }
 0x1ac   :  { %v705_v55 = vmul.f32 %v2517_v50, %v699_v51  ;;  %v2691_v50 = vld [vmem:[#allocation5 + $0xb0] sm:$0xff]  ;;  %v2692_v51 = vld [vmem:[#allocation5 + $0xb8] sm:$0xff] }
 0x1ae   :  { %v711_v57 = vmul.f32 %v3535_v36, %v705_v55  ;;  %v2693_v55 = vld [vmem:[#allocation5 + $0x80] sm:$0xff] }
 0x1b0   :  { %v3545_v0 = vadd.f32 %v718_v7, %v711_v57  ;;  %v2694_v7 = vld [vmem:[#allocation5 + $0x90] sm:$0xff]  ;;  %v2695_v57 = vld [vmem:[#allocation5 + $0x98] sm:$0xff] }
 0x1b2   :  { %739 = vmatmul.f32.vlgmr.msrb.gmra.mxu0 %v3545_v0  ;;  %759 = vmatmul.f32.vlgmr.msra.gmra.mxu1 %v3545_v0 }
 0x1b3   :  { %779 = vmatmul.f32.vlgmr.msrb.gmra.mxu2 %v3545_v0  ;;  %799 = vmatmul.f32.vlgmr.msrb.gmra.mxu3 %v3545_v0 }
 0x1b4   :  { %1051 = vmatpush.msrb.mxu0 %v2650_v8  ;;  %1071 = vmatpush.msra.mxu1 %v2651_v5  ;;  %v2696_v8 = vld [vmem:[#allocation5 + $0x60] sm:$0xff]  ;;  %v2697_v5 = vld [vmem:[#allocation5 + $0x70] sm:$0xff] }
 0x1b5   :  { %1091 = vmatpush.msrb.mxu2 %v2652_v59  ;;  %1111 = vmatpush.msrb.mxu3 %v2653_v3  ;;  %v4364_v59 = vld [vmem:[#allocation57_spill] sm:$0xff] }
 0x1b6   :  { %1052 = vmatpush.msrb.mxu0 %v2654_v60  ;;  %1072 = vmatpush.msra.mxu1 %v2655_v56 }
 0x1b7   :  { %1092 = vmatpush.msrb.mxu2 %v2656_v52  ;;  %1112 = vmatpush.msrb.mxu3 %v2657_v61 }
 0x1b8   :  { %1053 = vmatpush.msrb.mxu0 %v2658_v62  ;;  %1073 = vmatpush.msra.mxu1 %v2659_v46 }
 0x1b9   :  { %1093 = vmatpush.msrb.mxu2 %v2660_v34  ;;  %1113 = vmatpush.msrb.mxu3 %v2661_v42 }
 0x1ba   :  { %1054 = vmatpush.msrb.mxu0 %v2662_v1  ;;  %1074 = vmatpush.msra.mxu1 %v2663_v4  ;;  %v4366_v1 = vld [vmem:[#allocation55_spill] sm:$0xff] }
 0x1bb   :  { %1094 = vmatpush.msrb.mxu2 %v2664_v63  ;;  %1114 = vmatpush.msrb.mxu3 %v2665_v48 }
 0x1bc   :  { %1055 = vmatpush.msrb.mxu0 %v2666_v58  ;;  %1075 = vmatpush.msra.mxu1 %v2667_v47 }
 0x1bd   :  { %1095 = vmatpush.msrb.mxu2 %v2668_v54  ;;  %1115 = vmatpush.msrb.mxu3 %v2669_v6  ;;  %v720_v54 = vmul.f32 %v3535_v36, %v3537_v40 }
 0x1be   :  { %1056 = vmatpush.msrb.mxu0 %v2670_v10  ;;  %1076 = vmatpush.msra.mxu1 %v2671_v53 }
 0x1bf   :  { %1096 = vmatpush.msrb.mxu2 %v2672_v9  ;;  %1116 = vmatpush.msrb.mxu3 %v2673_v11 }
 0x1c0   :  { %1057 = vmatpush.msrb.mxu0 %v2674_v12  ;;  %1077 = vmatpush.msra.mxu1 %v2675_v13 }
 0x1c1   :  { %1097 = vmatpush.msrb.mxu2 %v2676_v14  ;;  %1117 = vmatpush.msrb.mxu3 %v2677_v16  ;;  %v721_v16 = vmul.f32 %v3540_v21, %v3458_v2 }
 0x1c2   :  { %1058 = vmatpush.msrb.mxu0 %v2678_v17  ;;  %1078 = vmatpush.msra.mxu1 %v2679_v18 }
 0x1c3   :  { %1098 = vmatpush.msrb.mxu2 %v2680_v20  ;;  %1118 = vmatpush.msrb.mxu3 %v2681_v22  ;;  %v3572_v20 = vadd.f32 %v721_v16, %v720_v54 }
 0x1c4   :  { %1059 = vmatpush.msrb.mxu0 %v2682_v23  ;;  %1079 = vmatpush.msra.mxu1 %v2683_v25 }
 0x1c5   :  { %1099 = vmatpush.msrb.mxu2 %v2684_v27  ;;  %1119 = vmatpush.msrb.mxu3 %v2685_v31 }
 0x1c6   :  { %1060 = vmatpush.msrb.mxu0 %v2686_v41  ;;  %1080 = vmatpush.msra.mxu1 %v2687_v43 }
 0x1c7   :  { %1100 = vmatpush.msrb.mxu2 %v2688_v44  ;;  %1120 = vmatpush.msrb.mxu3 %v2689_v45  ;;  %v873_v45 = vpop.permute.xlu2 %872 }
 0x1c8   :  { %1061 = vmatpush.msrb.mxu0 %v2690_v49  ;;  %1081 = vmatpush.msra.mxu1 %v4336_v15  ;;  %v2698_v15 = vld [vmem:[#allocation5 + $0x40] sm:$0xff] }
 0x1c9   :  { %1101 = vmatpush.msrb.mxu2 %v2691_v50  ;;  %1121 = vmatpush.msrb.mxu3 %v2692_v51 }
 0x1ca   :  { %1062 = vmatpush.msrb.mxu0 %v2693_v55  ;;  %1082 = vmatpush.msra.mxu1 %v4340_v19  ;;  %v2699_v19 = vld [vmem:[#allocation5 + $0x20] sm:$0xff] }
 0x1cb   :  { %1102 = vmatpush.msrb.mxu2 %v2694_v7  ;;  %1122 = vmatpush.msrb.mxu3 %v2695_v57 }
 0x1cc   :  { %1063 = vmatpush.msrb.mxu0 %v2696_v8  ;;  %1083 = vmatpush.msra.mxu1 %v4344_v24  ;;  %v2700_v24 = vld [vmem:[#allocation5] sm:$0xff] }
 0x1cd   :  { %1103 = vmatpush.msrb.mxu2 %v2697_v5  ;;  %1123 = vmatpush.msrb.mxu3 %v4346_v26 }
 0x1ce   :  { %1064 = vmatpush.msrb.mxu0 %v2698_v15  ;;  %1084 = vmatpush.msra.mxu1 %v4348_v28 }
 0x1cf   :  { %1104 = vmatpush.msrb.mxu2 %v4349_v29  ;;  %1124 = vmatpush.msrb.mxu3 %v4350_v30  ;;  %v4363_v29 = vld [vmem:[#allocation54_spill] sm:$0xff] }
 0x1d0   :  { %1065 = vmatpush.msrb.mxu0 %v2699_v19  ;;  %1085 = vmatpush.msra.mxu1 %v4352_v32  ;;  %v880_v19 = vpop.permute.xlu2 %879 }
 0x1d1   :  { %1105 = vmatpush.msrb.mxu2 %v4353_v33  ;;  %1125 = vmatpush.msrb.mxu3 %v4354_v35  ;;  %v4365_v35 = vld [vmem:[#allocation56_spill] sm:$0xff] }
 0x1d2   :  { %1066 = vmatpush.msrb.mxu0 %v2700_v24  ;;  %1086 = vmatpush.msra.mxu1 %v4356_v37  ;;  %v882_v24 = vmul.f32 %v880_v19, %v3545_v0 }
 0x1d3   :  { %1106 = vmatpush.msrb.mxu2 %v4357_v38  ;;  %1126 = vmatpush.msrb.mxu3 %v4358_v39 }
 0x22f   :  { %v740_v26 = vpop.f32.mrf.mxu0  ;;  %v760_v28 = vpop.f32.mrf.mxu1 }
 0x230   :  { %v803_v30 = vadd.f32 %v740_v26, %v4363_v29  ;;  %v804_v3 = vadd.f32 %v760_v28, %v4364_v59  ;;  %v4367_v59 = vld [vmem:[#allocation58_spill] sm:$0xff] }
 0x232   :  { %v2438_v60 = vmul.f32 -1.442695, %v803_v30  ;;  %v2439_v32 = vmul.f32 -1.442695, %v804_v3 }
 0x234   :  { %2518 = vpow2.f32 %v2438_v60  ;;  %v4368_v60 = vld [vmem:[#allocation61_spill] sm:$0xff] }
 0x235   :  { %2520 = vpow2.f32 %v2439_v32 }
 0x236   :  { %v800_v33 = vpop.f32.mrf.mxu3  ;;  %v780_v39 = vpop.f32.mrf.mxu2 }
 0x237   :  { %v806_v56 = vadd.f32 %v800_v33, %v4365_v35  ;;  %v805_v4 = vadd.f32 %v780_v39, %v4366_v1 }
 0x239   :  { %v2440_v52 = vmul.f32 -1.442695, %v806_v56  ;;  %v4369_v56 = vld [vmem:[#allocation60_spill] sm:$0xff] }
 0x23a   :  { %v2519_v61 = vpop.eup %2518 }
 0x23b   :  { %v2521_v37 = vpop.eup %2520  ;;  %v810_v62 = vadd.f32 1.0, %v2519_v61  ;;  %2522 = vpow2.f32 %v2440_v52 }
 0x23c   :  { %v829_v38 = vadd.f32 1.0, %v2521_v37 }
 0x23d   :  { %2524 = vrcp.f32 %v810_v62  ;;  %v822_v10 = vand.u32 2147483648, %v810_v62  ;;  %v820_v11 = vand.u32 2147483647, %v810_v62  ;;  %vm816_vm13 = vweird.f32 %v810_v62 }
 0x23e   :  { %2526 = vrcp.f32 %v829_v38  ;;  %v841_v53 = vand.u32 2147483648, %v829_v38  ;;  %v839_v13 = vand.u32 2147483647, %v829_v38  ;;  %vm835_vm14 = vweird.f32 %v829_v38 }
 0x23f   :  { %v823_v18 = vor.u32 1.1754944e-38, %v822_v10  ;;  %vm821_vm2 = vcmp.eq.f32.partialorder %v820_v11, 8.507059e+37 }
 0x240   :  { %v842_v22 = vor.u32 1.1754944e-38, %v841_v53  ;;  %vm840_vm3 = vcmp.eq.f32.partialorder %v839_v13, 8.507059e+37 }
 0x241   :  { %v2523_v46 = vpop.eup %2522 }
 0x242   :  { %v849_v34 = vadd.f32 1.0, %v2523_v46 }
 0x243   :  { %v2525_v42 = vpop.eup %2524 }
 0x244   :  { %v2527_v63 = vpop.eup %2526  ;;  %v812_v48 = vmul.f32 %v2525_v42, %v810_v62  ;;  %2528 = vrcp.f32 %v849_v34  ;;  %vm817_vm11 = vweird.f32 %v2525_v42  ;;  %v861_v51 = vand.u32 2147483648, %v849_v34 }
 0x245   :  { %v831_v58 = vmul.f32 %v2527_v63, %v829_v38  ;;  %2530 = vtanh.f32 %v805_v4  ;;  %vm836_vm12 = vweird.f32 %v2527_v63  ;;  %vm818_vm15 = vmor %vm816_vm13, %vm817_vm11  ;;  %vm855_vm5 = vweird.f32 %v849_v34  ;;  %v4370_v4 = vld [vmem:[#allocation59_spill] sm:$0xff] }
 0x246   :  { %v813_v47 = vsub.f32 1.0, %v812_v48  ;;  %vm837_vm1 = vmor %vm835_vm14, %vm836_vm12  ;;  %v859_v55 = vand.u32 2147483647, %v849_v34  ;;  %v862_v57 = vor.u32 1.1754944e-38, %v861_v51 }
 0x247   :  { %v832_v6 = vsub.f32 1.0, %v831_v58 }
 0x248   :  { %v814_v9 = vmul.f32 %v2525_v42, %v813_v47  ;;  %vm860_vm7 = vcmp.eq.f32.partialorder %v859_v55, 8.507059e+37 }
 0x249   :  { %v833_v12 = vmul.f32 %v2527_v63, %v832_v6 }
 0x24a   :  { %v2529_v14 = vpop.eup %2528  ;;  %v815_v17 = vadd.f32 %v2525_v42, %v814_v9 }
 0x24b   :  { %v834_v36 = vadd.f32 %v2527_v63, %v833_v12  ;;  %v851_v40 = vmul.f32 %v2529_v14, %v849_v34  ;;  %v2531_v25 = vpop.eup %2530  ;;  %vm856_vm4 = vweird.f32 %v2529_v14 }
 0x24c   :  { %v819_v23 = vsel %vm818_vm15, %v2525_v42, %v815_v17  ;;  %vm857_vm6 = vmor %vm855_vm5, %vm856_vm4  ;;  %v885_v17 = vmul.f32 %v880_v19, %v3572_v20  ;;  %v3593_v19 = vpop.permute.xlu0 %1036 }
 0x24d   :  { %v824_v27 = vsel %vm821_vm2, %v823_v18, %v819_v23  ;;  %v838_v31 = vsel %vm837_vm1, %v2527_v63, %v834_v36  ;;  %v852_v41 = vsub.f32 1.0, %v851_v40 }
 0x24e   :  { %v843_v43 = vsel %vm840_vm3, %v842_v22, %v838_v31  ;;  %v866_v2 = vmul.f32 %v2531_v25, %v824_v27 }
 0x24f   :  { %v865_v21 = vmul.f32 %v843_v43, %v3572_v20  ;;  %v853_v44 = vmul.f32 %v2529_v14, %v852_v41 }
 0x251   :  { %v867_v49 = vadd.f32 %v866_v2, %v865_v21  ;;  %v854_v50 = vadd.f32 %v2529_v14, %v853_v44 }
 0x253   :  { %2532 = vtanh.f32 %v867_v49  ;;  %v858_v7 = vsel %vm857_vm6, %v2529_v14, %v854_v50  ;;  %v884_v6 = vmul.f32 %v873_v45, %v867_v49 }
 0x254   :  { %v863_v5 = vsel %vm860_vm7, %v862_v57, %v858_v7 }
 0x255   :  { %v3587_v25 = vadd.f32 %v885_v17, %v884_v6  ;;  %v1263_v6 = vld [vmem:[#allocation10 + $0x170] sm:$0xff]  ;;  %v1225_v17 = vld [vmem:[#allocation10 + $0x40] sm:$0xff] }
 0x259   :  { %v2533_v8 = vpop.eup %2532 }
 0x25a   :  { %v869_v15 = vmul.f32 %v2533_v8, %v863_v5 }
 0x25c   :  { %v875_v26 = vmul.f32 %v873_v45, %v869_v15 }
 0x25e   :  { %v3576_v28 = vadd.f32 %v882_v24, %v875_v26  ;;  %v3595_v24 = vpop.permute.xlu1 %1043 }
 0x260   :  { %903 = vmatmul.f32.vlgmr.msra.gmra.mxu0 %v3576_v28  ;;  %923 = vmatmul.f32.vlgmr.msrb.gmra.mxu1 %v3576_v28 }
 0x261   :  { %943 = vmatmul.f32.vlgmr.msra.gmra.mxu2 %v3576_v28  ;;  %963 = vmatmul.f32.vlgmr.msra.gmra.mxu3 %v3576_v28 }
 0x2dd   :  { %v904_v29 = vpop.f32.mrf.mxu0  ;;  %v924_v30 = vpop.f32.mrf.mxu1 }
 0x2de   :  { %v967_v3 = vadd.f32 %v904_v29, %v4367_v59  ;;  %v968_v32 = vadd.f32 %v924_v30, %v4368_v60  ;;  %v1046_v29 = vmul.f32 %v3595_v24, %v3576_v28  ;;  %v1277_v59 = vld [vmem:[#allocation10 + $0x1e0] sm:$0xff] }
 0x2df   :  { %1281 = vmatpush.msra.mxu0 %v1277_v59  ;;  %v1269_v60 = vld [vmem:[#allocation10 + $0x1a0] sm:$0xff]  ;;  %v1234_v59 = vld [vmem:[#allocation10 + $0x88] sm:$0xff] }
 0x2e0   :  { %v2441_v33 = vmul.f32 -1.442695, %v967_v3  ;;  %v2442_v35 = vmul.f32 -1.442695, %v968_v32  ;;  %v1273_v3 = vld [vmem:[#allocation10 + $0x1c0] sm:$0xff] }
 0x2e1   :  { %1282 = vmatpush.msra.mxu0 %v1273_v3  ;;  %v1265_v32 = vld [vmem:[#allocation10 + $0x180] sm:$0xff]  ;;  %v1236_v3 = vld [vmem:[#allocation10 + $0x98] sm:$0xff] }
 0x2e2   :  { %2534 = vpow2.f32 %v2441_v33  ;;  %v1261_v33 = vld [vmem:[#allocation10 + $0x160] sm:$0xff] }
 0x2e3   :  { %2536 = vpow2.f32 %v2442_v35  ;;  %1283 = vmatpush.msra.mxu0 %v1269_v60  ;;  %v1257_v28 = vld [vmem:[#allocation10 + $0x140] sm:$0xff] }
 0x2e4   :  { %v964_v0 = vpop.f32.mrf.mxu3  ;;  %v944_v46 = vpop.f32.mrf.mxu2  ;;  %v1253_v35 = vld [vmem:[#allocation10 + $0x120] sm:$0xff] }
 0x2e5   :  { %v970_v52 = vadd.f32 %v964_v0, %v4369_v56  ;;  %v969_v63 = vadd.f32 %v944_v46, %v4370_v4  ;;  %1284 = vmatpush.msra.mxu0 %v1265_v32  ;;  %v1278_v0 = vld [vmem:[#allocation10 + $0x1e8] sm:$0xff]  ;;  %v1280_v56 = vld [vmem:[#allocation10 + $0x1f8] sm:$0xff]  ;;  %v1235_v32 = vld [vmem:[#allocation10 + $0x90] sm:$0xff] }
 0x2e6   :  { %1301 = vmatpush.msrb.mxu1 %v1278_v0  ;;  %1341 = vmatpush.msra.mxu3 %v1280_v56  ;;  %v1270_v46 = vld [vmem:[#allocation10 + $0x1a8] sm:$0xff]  ;;  %v1232_v56 = vld [vmem:[#allocation10 + $0x78] sm:$0xff] }
 0x2e7   :  { %v2443_v61 = vmul.f32 -1.442695, %v970_v52  ;;  %1285 = vmatpush.msra.mxu0 %v1261_v33  ;;  %v1279_v52 = vld [vmem:[#allocation10 + $0x1f0] sm:$0xff]  ;;  %v1266_v4 = vld [vmem:[#allocation10 + $0x188] sm:$0xff]  ;;  %v3613_v33 = vld [vmem:[#allocation11 + $0x1a0] sm:$0xff] }
 0x2e8   :  { %v2535_v37 = vpop.eup %2534  ;;  %1321 = vmatpush.msra.mxu2 %v1279_v52  ;;  %v1231_v52 = vld [vmem:[#allocation10 + $0x70] sm:$0xff] }
 0x2e9   :  { %v2537_v62 = vpop.eup %2536  ;;  %v974_v38 = vadd.f32 1.0, %v2535_v37  ;;  %2538 = vpow2.f32 %v2443_v61  ;;  %1286 = vmatpush.msra.mxu0 %v1257_v28  ;;  %v1249_v61 = vld [vmem:[#allocation10 + $0x100] sm:$0xff]  ;;  %v1274_v37 = vld [vmem:[#allocation10 + $0x1c8] sm:$0xff] }
 0x2ea   :  { %v993_v39 = vadd.f32 1.0, %v2537_v62  ;;  %v1276_v62 = vld [vmem:[#allocation10 + $0x1d8] sm:$0xff]  ;;  %1302 = vmatpush.msrb.mxu1 %v1274_v37  ;;  %v1230_v28 = vld [vmem:[#allocation10 + $0x68] sm:$0xff] }
 0x2eb   :  { %2540 = vrcp.f32 %v974_v38  ;;  %v986_v53 = vand.u32 2147483648, %v974_v38  ;;  %v984_v12 = vand.u32 2147483647, %v974_v38  ;;  %vm980_vm10 = vweird.f32 %v974_v38  ;;  %1287 = vmatpush.msra.mxu0 %v1253_v35  ;;  %1342 = vmatpush.msra.mxu3 %v1276_v62  ;;  %v4373_v35 = vld [vmem:[#allocation63_spill] sm:$0xff]  ;;  %v1226_v37 = vld [vmem:[#allocation10 + $0x48] sm:$0xff] }
 0x2ec   :  { %2542 = vrcp.f32 %v993_v39  ;;  %v1005_v9 = vand.u32 2147483648, %v993_v39  ;;  %v1003_v14 = vand.u32 2147483647, %v993_v39  ;;  %vm999_vm11 = vweird.f32 %v993_v39  ;;  %1303 = vmatpush.msrb.mxu1 %v1270_v46 }
 0x2ed   :  { %v987_v36 = vor.u32 1.1754944e-38, %v986_v53  ;;  %vm985_vm14 = vcmp.eq.f32.partialorder %v984_v12, 8.507059e+37  ;;  %1288 = vmatpush.msra.mxu0 %v1249_v61  ;;  %v1258_v53 = vld [vmem:[#allocation10 + $0x148] sm:$0xff]  ;;  %v1229_v12 = vld [vmem:[#allocation10 + $0x60] sm:$0xff] }
 0x2ee   :  { %v1006_v23 = vor.u32 1.1754944e-38, %v1005_v9  ;;  %vm1004_vm15 = vcmp.eq.f32.partialorder %v1003_v14, 8.507059e+37  ;;  %1304 = vmatpush.msrb.mxu1 %v1266_v4  ;;  %v1260_v9 = vld [vmem:[#allocation10 + $0x158] sm:$0xff]  ;;  %v3617_v61 = vld [vmem:[#allocation11 + $0x180] sm:$0xff] }
 0x2ef   :  { %v2539_v34 = vpop.eup %2538  ;;  %v1256_v14 = vld [vmem:[#allocation10 + $0x138] sm:$0xff] }
 0x2f0   :  { %v1013_v42 = vadd.f32 1.0, %v2539_v34  ;;  %v1272_v34 = vld [vmem:[#allocation10 + $0x1b8] sm:$0xff] }
 0x2f1   :  { %v2541_v1 = vpop.eup %2540  ;;  %1343 = vmatpush.msra.mxu3 %v1272_v34  ;;  %v3620_v34 = vld [vmem:[#allocation11 + $0x160] sm:$0xff] }
 0x2f2   :  { %v2543_v48 = vpop.eup %2542  ;;  %v976_v58 = vmul.f32 %v2541_v1, %v974_v38  ;;  %2544 = vrcp.f32 %v1013_v42  ;;  %vm981_vm8 = vweird.f32 %v2541_v1  ;;  %v1025_v51 = vand.u32 2147483648, %v1013_v42  ;;  %v1275_v38 = vld [vmem:[#allocation10 + $0x1d0] sm:$0xff] }
 0x2f3   :  { %v995_v47 = vmul.f32 %v2543_v48, %v993_v39  ;;  %2546 = vtanh.f32 %v969_v63  ;;  %vm1000_vm9 = vweird.f32 %v2543_v48  ;;  %vm982_vm12 = vmor %vm980_vm10, %vm981_vm8  ;;  %vm1019_vm2 = vweird.f32 %v1013_v42  ;;  %1322 = vmatpush.msra.mxu2 %v1275_v38  ;;  %v1245_v39 = vld [vmem:[#allocation10 + $0xe0] sm:$0xff]  ;;  %v1268_v63 = vld [vmem:[#allocation10 + $0x198] sm:$0xff] }
 0x2f4   :  { %v977_v54 = vsub.f32 1.0, %v976_v58  ;;  %vm1001_vm13 = vmor %vm999_vm11, %vm1000_vm9  ;;  %v1023_v55 = vand.u32 2147483647, %v1013_v42  ;;  %v1026_v57 = vor.u32 1.1754944e-38, %v1025_v51  ;;  %1289 = vmatpush.msra.mxu0 %v1245_v39  ;;  %1344 = vmatpush.msra.mxu3 %v1268_v63  ;;  %v1237_v58 = vld [vmem:[#allocation10 + $0xa0] sm:$0xff]  ;;  %v1228_v38 = vld [vmem:[#allocation10 + $0x58] sm:$0xff] }
 0x2f5   :  { %v996_v10 = vsub.f32 1.0, %v995_v47  ;;  %v1262_v47 = vld [vmem:[#allocation10 + $0x168] sm:$0xff]  ;;  %v1217_v51 = vld [vmem:[#allocation10] sm:$0xff]  ;;  %v1227_v39 = vld [vmem:[#allocation10 + $0x50] sm:$0xff] }
 0x2f6   :  { %v978_v11 = vmul.f32 %v2541_v1, %v977_v54  ;;  %vm1024_vm4 = vcmp.eq.f32.partialorder %v1023_v55, 8.507059e+37  ;;  %v1264_v54 = vld [vmem:[#allocation10 + $0x178] sm:$0xff]  ;;  %1305 = vmatpush.msrb.mxu1 %v1262_v47  ;;  %v1242_v55 = vld [vmem:[#allocation10 + $0xc8] sm:$0xff]  ;;  %v3627_v47 = vld [vmem:[#allocation11 + $0x140] sm:$0xff] }
 0x2f7   :  { %v997_v13 = vmul.f32 %v2543_v48, %v996_v10  ;;  %1345 = vmatpush.msra.mxu3 %v1264_v54  ;;  %v1233_v10 = vld [vmem:[#allocation10 + $0x80] sm:$0xff]  ;;  %v1224_v63 = vld [vmem:[#allocation10 + $0x38] sm:$0xff]  ;;  %v1218_v54 = vld [vmem:[#allocation10 + $0x8] sm:$0xff] }
 0x2f8   :  { %v2545_v16 = vpop.eup %2544  ;;  %v979_v18 = vadd.f32 %v2541_v1, %v978_v11  ;;  %1306 = vmatpush.msrb.mxu1 %v1258_v53  ;;  %v1259_v11 = vld [vmem:[#allocation10 + $0x150] sm:$0xff]  ;;  %v1214_v53 = vld [vmem:[#allocation8 + $0x8] sm:$0xff] }
 0x2f9   :  { %v998_v40 = vadd.f32 %v2543_v48, %v997_v13  ;;  %v1015_v22 = vmul.f32 %v2545_v16, %v1013_v42  ;;  %v2547_v31 = vpop.eup %2546  ;;  %vm1020_vm1 = vweird.f32 %v2545_v16  ;;  %v1271_v42 = vld [vmem:[#allocation10 + $0x1b0] sm:$0xff]  ;;  %1346 = vmatpush.msra.mxu3 %v1260_v9  ;;  %v1254_v13 = vld [vmem:[#allocation10 + $0x128] sm:$0xff]  ;;  %v1216_v9 = vld [vmem:[#allocation8 + $0x18] sm:$0xff] }
 0x2fa   :  { %v983_v27 = vsel %vm982_vm12, %v2541_v1, %v979_v18  ;;  %vm1021_vm3 = vmor %vm1019_vm2, %vm1020_vm1  ;;  %1323 = vmatpush.msra.mxu2 %v1271_v42  ;;  %v1241_v1 = vld [vmem:[#allocation10 + $0xc0] sm:$0xff]  ;;  %1307 = vmatpush.msrb.mxu1 %v1254_v13  ;;  %v1250_v18 = vld [vmem:[#allocation10 + $0x108] sm:$0xff]  ;;  %vm1361_vm2 = vcmask 64512  }
 0x2fb   :  { %v988_v41 = vsel %vm985_vm14, %v987_v36, %v983_v27  ;;  %v1002_v43 = vsel %vm1001_vm13, %v2543_v48, %v998_v40  ;;  %v1016_v2 = vsub.f32 1.0, %v1015_v22  ;;  %1290 = vmatpush.msra.mxu0 %v1241_v1  ;;  %v1267_v48 = vld [vmem:[#allocation10 + $0x190] sm:$0xff]  ;;  %1347 = vmatpush.msra.mxu3 %v1256_v14  ;;  %v1252_v36 = vld [vmem:[#allocation10 + $0x118] sm:$0xff]  ;;  %v1222_v42 = vld [vmem:[#allocation10 + $0x28] sm:$0xff] }
 0x2fc   :  { %v1007_v21 = vsel %vm1004_vm15, %v1006_v23, %v1002_v43  ;;  %v1030_v20 = vmul.f32 %v2547_v31, %v988_v41  ;;  %1324 = vmatpush.msra.mxu2 %v1267_v48  ;;  %1308 = vmatpush.msrb.mxu1 %v1250_v18  ;;  %v1251_v23 = vld [vmem:[#allocation10 + $0x110] sm:$0xff]  ;;  %v4372_v41 = vld [vmem:[#allocation64_spill] sm:$0xff]  ;;  %v4374_v18 = vld [vmem:[#allocation62_spill] sm:$0xff] }
 0x2fd   :  { %v1029_v44 = vmul.f32 %v1007_v21, %v3587_v25  ;;  %v1017_v45 = vmul.f32 %v2545_v16, %v1016_v2  ;;  %1291 = vmatpush.msra.mxu0 %v1237_v58  ;;  %v4371_v27 = vld [vmem:[#allocation49_spill] sm:$0xff]  ;;  %1348 = vmatpush.msra.mxu3 %v1252_v36  ;;  %v1221_v2 = vld [vmem:[#allocation10 + $0x20] sm:$0xff]  ;;  %v1246_v21 = vld [vmem:[#allocation10 + $0xe8] sm:$0xff] }
 0x2fe   :  { %1325 = vmatpush.msra.mxu2 %v1263_v6  ;;  %1309 = vmatpush.msrb.mxu1 %v1246_v21  ;;  %v1223_v48 = vld [vmem:[#allocation10 + $0x30] sm:$0xff]  ;;  %v1220_v6 = vld [vmem:[#allocation10 + $0x18] sm:$0xff] }
 0x2ff   :  { %v3590_v49 = vadd.f32 %v1030_v20, %v1029_v44  ;;  %v1018_v50 = vadd.f32 %v2545_v16, %v1017_v45  ;;  %1292 = vmatpush.msra.mxu0 %v1233_v10  ;;  %v1248_v20 = vld [vmem:[#allocation10 + $0xf8] sm:$0xff]  ;;  %v1247_v44 = vld [vmem:[#allocation10 + $0xf0] sm:$0xff] }
 0x300   :  { %1326 = vmatpush.msra.mxu2 %v1259_v11  ;;  %1349 = vmatpush.msra.mxu3 %v1248_v20  ;;  %v1219_v10 = vld [vmem:[#allocation10 + $0x10] sm:$0xff]  ;;  %v3633_v11 = vld [vmem:[#allocation11 + $0x120] sm:$0xff] }
 0x301   :  { %2548 = vtanh.f32 %v3590_v49  ;;  %v1022_v7 = vsel %vm1021_vm3, %v2545_v16, %v1018_v50  ;;  %1293 = vmatpush.msra.mxu0 %v1229_v12  ;;  %v1255_v16 = vld [vmem:[#allocation10 + $0x130] sm:$0xff]  ;;  %1310 = vmatpush.msrb.mxu1 %v1242_v55 }
 0x302   :  { %v1027_v5 = vsel %vm1024_vm4, %v1026_v57, %v1022_v7  ;;  %1327 = vmatpush.msra.mxu2 %v1255_v16  ;;  %v1244_v7 = vld [vmem:[#allocation10 + $0xd8] sm:$0xff]  ;;  %v1243_v57 = vld [vmem:[#allocation10 + $0xd0] sm:$0xff]  ;;  %v3638_v16 = vld [vmem:[#allocation11 + $0x100] sm:$0xff] }
 0x303   :  { %1294 = vmatpush.msra.mxu0 %v1225_v17  ;;  %1350 = vmatpush.msra.mxu3 %v1244_v7 }
 0x304   :  { %1328 = vmatpush.msra.mxu2 %v1251_v23  ;;  %v3644_v23 = vld [vmem:[#allocation11 + $0xe0] sm:$0xff] }
 0x305   :  { %1295 = vmatpush.msra.mxu0 %v1221_v2  ;;  %v1048_v2 = vmul.f32 %v3593_v19, %v3590_v49 }
 0x306   :  { %1329 = vmatpush.msra.mxu2 %v1247_v44 }
 0x307   :  { %v2549_v8 = vpop.eup %2548  ;;  %1296 = vmatpush.msra.mxu0 %v1217_v51  ;;  %v3656_v51 = vld [vmem:[#allocation11 + $0xa0] sm:$0xff] }
 0x308   :  { %v1033_v15 = vmul.f32 %v2549_v8, %v1027_v5  ;;  %v3608_v8 = vld [vmem:[#allocation11 + $0x1e0] sm:$0xff]  ;;  %1330 = vmatpush.msra.mxu2 %v1243_v57  ;;  %v1238_v5 = vld [vmem:[#allocation10 + $0xa8] sm:$0xff]  ;;  %4375 = vst [vmem:[#allocation48_spill] sm:$0xff] %v3656_v51 }
 0x309   :  { %1311 = vmatpush.msrb.mxu1 %v1238_v5 }
 0x30a   :  { %v1039_v26 = vmul.f32 %v3593_v19, %v1033_v15  ;;  %v1240_v15 = vld [vmem:[#allocation10 + $0xb8] sm:$0xff]  ;;  %v1049_v19 = vmul.f32 %v3595_v24, %v3587_v25 }
 0x30b   :  { %1351 = vmatpush.msra.mxu3 %v1240_v15  ;;  %1312 = vmatpush.msrb.mxu1 %v1234_v59  ;;  %v3665_v59 = vld [vmem:[#allocation11 + $0x80] sm:$0xff] }
 0x30c   :  { %v3600_v30 = vadd.f32 %v1046_v29, %v1039_v26  ;;  %v1239_v26 = vld [vmem:[#allocation10 + $0xb0] sm:$0xff]  ;;  %v3611_v29 = vld [vmem:[#allocation11 + $0x1c0] sm:$0xff]  ;;  %4376 = vst [vmem:[#allocation20_spill] sm:$0xff] %v3665_v59 }
 0x30d   :  { %1331 = vmatpush.msra.mxu2 %v1239_v26  ;;  %1352 = vmatpush.msra.mxu3 %v1236_v3 }
 0x30e   :  { %1067 = vmatmul.f32.vlgmr.msrb.gmra.mxu0 %v3600_v30  ;;  %1087 = vmatmul.f32.vlgmr.msra.gmra.mxu1 %v3600_v30 }
 0x30f   :  { %1107 = vmatmul.f32.vlgmr.msrb.gmra.mxu2 %v3600_v30  ;;  %1127 = vmatmul.f32.vlgmr.msrb.gmra.mxu3 %v3600_v30 }
 0x310   :  { %1523 = vmatpush.msrb.mxu0 %v3608_v8  ;;  %1332 = vmatpush.msra.mxu2 %v1235_v32 }
 0x311   :  { %1313 = vmatpush.msrb.mxu1 %v1230_v28  ;;  %1353 = vmatpush.msra.mxu3 %v1232_v56 }
 0x312   :  { %1524 = vmatpush.msrb.mxu0 %v3611_v29  ;;  %1333 = vmatpush.msra.mxu2 %v1231_v52 }
 0x313   :  { %1314 = vmatpush.msrb.mxu1 %v1226_v37  ;;  %1354 = vmatpush.msra.mxu3 %v1228_v38  ;;  %v3671_v38 = vld [vmem:[#allocation11 + $0x40] sm:$0xff] }
 0x314   :  { %1525 = vmatpush.msrb.mxu0 %v3613_v33  ;;  %1334 = vmatpush.msra.mxu2 %v1227_v39  ;;  %4378 = vst [vmem:[#allocation25_spill] sm:$0xff] %v3671_v38 }
 0x315   :  { %1315 = vmatpush.msrb.mxu1 %v1222_v42  ;;  %1355 = vmatpush.msra.mxu3 %v1224_v63 }
 0x316   :  { %1526 = vmatpush.msrb.mxu0 %v3617_v61  ;;  %1335 = vmatpush.msra.mxu2 %v1223_v48 }
 0x317   :  { %1316 = vmatpush.msrb.mxu1 %v1218_v54  ;;  %1356 = vmatpush.msra.mxu3 %v1220_v6 }
 0x318   :  { %1527 = vmatpush.msrb.mxu0 %v3620_v34  ;;  %1336 = vmatpush.msra.mxu2 %v1219_v10 }
 0x319   :  { %1400 = vmatpush.msra.mxu1 %v1214_v53  ;;  %1440 = vmatpush.msrb.mxu3 %v1216_v9  ;;  %v1208_v53 = vpop.permute.xlu0 %1207  ;;  %v1201_v9 = vpop.permute.xlu2 %1200 }
 0x31a   :  { %1528 = vmatpush.msrb.mxu0 %v3627_v47 }
 0x31c   :  { %1529 = vmatpush.msrb.mxu0 %v3633_v11 }
 0x31e   :  { %1530 = vmatpush.msrb.mxu0 %v3638_v16 }
 0x320   :  { %1531 = vmatpush.msrb.mxu0 %v3644_v23 }
 0x38b   :  { %v1068_v40 = vpop.f32.mrf.mxu0  ;;  %v1088_v22 = vpop.f32.mrf.mxu1 }
 0x38c   :  { %v1131_v31 = vadd.f32 %v1068_v40, %v4371_v27  ;;  %v1132_v43 = vadd.f32 %v1088_v22, %v4372_v41  ;;  %v3648_v41 = vld [vmem:[#allocation11 + $0xc0] sm:$0xff] }
 0x38d   :  { %1532 = vmatpush.msrb.mxu0 %v3648_v41 }
 0x38e   :  { %v2444_v45 = vmul.f32 -1.442695, %v1131_v31  ;;  %v2445_v50 = vmul.f32 -1.442695, %v1132_v43  ;;  %v1213_v43 = vld [vmem:[#allocation8] sm:$0xff] }
 0x38f   :  { %1380 = vmatpush.msrb.mxu2 %v1213_v43  ;;  %1533 = vmatpush.msrb.mxu0 %v3656_v51  ;;  %v3703_v43 = vld [vmem:[#allocation11 + $0x198] sm:$0xff] }
 0x390   :  { %2550 = vpow2.f32 %v2444_v45 }
 0x391   :  { %2552 = vpow2.f32 %v2445_v50  ;;  %1534 = vmatpush.msrb.mxu0 %v3665_v59 }
 0x392   :  { %v1128_v60 = vpop.f32.mrf.mxu3  ;;  %v1108_v12 = vpop.f32.mrf.mxu2 }
 0x393   :  { %v1134_v0 = vadd.f32 %v1128_v60, %v4373_v35  ;;  %v1133_v36 = vadd.f32 %v1108_v12, %v4374_v18  ;;  %v1050_v60 = vadd.f32 %v1049_v19, %v1048_v2  ;;  %v3684_v18 = vld [vmem:[#allocation11 + $0x1e8] sm:$0xff]  ;;  %v1212_v2 = vld [vmem:[%s4155_s5] sm:$0x1f] }
 0x394   :  { %v3737_v19 = vld [vmem:[#allocation11 + $0x138] sm:$0xff] }
 0x395   :  { %v2446_v62 = vmul.f32 -1.442695, %v1134_v0  ;;  %v3668_v0 = vld [vmem:[#allocation11 + $0x60] sm:$0xff] }
 0x396   :  { %v2551_v46 = vpop.eup %2550  ;;  %4377 = vst [vmem:[#allocation31_spill] sm:$0xff] %v3668_v0  ;;  %1535 = vmatpush.msrb.mxu0 %v3668_v0 }
 0x397   :  { %v2553_v1 = vpop.eup %2552  ;;  %v3622_v4 = vadd.f32 1.0, %v2551_v46  ;;  %2554 = vpow2.f32 %v2446_v62  ;;  %v3674_v46 = vld [vmem:[#allocation11 + $0x20] sm:$0xff] }
 0x398   :  { %v3625_v58 = vadd.f32 1.0, %v2553_v1  ;;  %1536 = vmatpush.msrb.mxu0 %v3671_v38  ;;  %4379 = vst [vmem:[#allocation26_spill] sm:$0xff] %v3674_v46 }
 0x399   :  { %2556 = vrcp.f32 %v3622_v4  ;;  %v1150_v20 = vand.u32 2147483648, %v3622_v4  ;;  %v1148_v50 = vand.u32 2147483647, %v3622_v4  ;;  %vm1144_vm7 = vweird.f32 %v3622_v4 }
 0x39a   :  { %2558 = vrcp.f32 %v3625_v58  ;;  %v1169_v44 = vand.u32 2147483648, %v3625_v58  ;;  %v1167_v7 = vand.u32 2147483647, %v3625_v58  ;;  %vm1163_vm8 = vweird.f32 %v3625_v58  ;;  %1537 = vmatpush.msrb.mxu0 %v3674_v46 }
 0x39b   :  { %v1151_v5 = vor.u32 1.1754944e-38, %v1150_v20  ;;  %vm1149_vm11 = vcmp.eq.f32.partialorder %v1148_v50, 8.507059e+37  ;;  %v3716_v20 = vld [vmem:[#allocation11 + $0x1f0] sm:$0xff] }
 0x39c   :  { %v1170_v3 = vor.u32 1.1754944e-38, %v1169_v44  ;;  %vm1168_vm12 = vcmp.eq.f32.partialorder %v1167_v7, 8.507059e+37  ;;  %v3718_v44 = vld [vmem:[#allocation11 + $0x178] sm:$0xff]  ;;  %v3726_v50 = vld [vmem:[#allocation11 + $0x1d0] sm:$0xff]  ;;  %v3732_v7 = vld [vmem:[#allocation11 + $0x128] sm:$0xff] }
 0x39d   :  { %v2555_v13 = vpop.eup %2554 }
 0x39e   :  { %v3635_v14 = vadd.f32 1.0, %v2555_v13  ;;  %v1210_v13 = vmul.f32 %v1208_v53, %v3600_v30  ;;  %v3696_v30 = vld [vmem:[#allocation11 + $0x1b8] sm:$0xff] }
 0x39f   :  { %v2557_v17 = vpop.eup %2556  ;;  %v3817_v53 = vld [vmem:[#allocation11 + $0x38] sm:$0xff] }
 0x3a0   :  { %v2559_v40 = vpop.eup %2558  ;;  %v1140_v22 = vmul.f32 %v2557_v17, %v3622_v4  ;;  %2560 = vrcp.f32 %v3635_v14  ;;  %vm1145_vm5 = vweird.f32 %v2557_v17  ;;  %v1189_v1 = vand.u32 2147483648, %v3635_v14  ;;  %v3678_v4 = vld [vmem:[#allocation11] sm:$0xff]  ;;  %4394 = vst [vmem:[#allocation45_spill] sm:$0xff] %v3817_v53 }
 0x3a1   :  { %v1159_v27 = vmul.f32 %v2559_v40, %v3625_v58  ;;  %2562 = vtanh.f32 %v1133_v36  ;;  %vm1164_vm6 = vweird.f32 %v2559_v40  ;;  %vm1146_vm9 = vmor %vm1144_vm7, %vm1145_vm5  ;;  %4380 = vst [vmem:[#allocation21_spill] sm:$0xff] %v3678_v4  ;;  %vm1183_vm14 = vweird.f32 %v3635_v14  ;;  %1538 = vmatpush.msrb.mxu0 %v3678_v4  ;;  %v3686_v36 = vld [vmem:[#allocation11 + $0x1f8] sm:$0xff] }
 0x3a2   :  { %v1141_v31 = vsub.f32 1.0, %v1140_v22  ;;  %vm1165_vm10 = vmor %vm1163_vm8, %vm1164_vm6  ;;  %v1187_v63 = vand.u32 2147483647, %v3635_v14  ;;  %v1190_v58 = vor.u32 1.1754944e-38, %v1189_v1  ;;  %v3690_v22 = vld [vmem:[#allocation11 + $0x1d8] sm:$0xff]  ;;  %v3795_v1 = vld [vmem:[#allocation11 + $0xf0] sm:$0xff] }
 0x3a3   :  { %v1160_v21 = vsub.f32 1.0, %v1159_v27  ;;  %v3694_v27 = vld [vmem:[#allocation11 + $0x1a8] sm:$0xff] }
 0x3a4   :  { %v1142_v45 = vmul.f32 %v2557_v17, %v1141_v31  ;;  %vm1188_vm1 = vcmp.eq.f32.partialorder %v1187_v63, 8.507059e+37  ;;  %v3701_v31 = vld [vmem:[#allocation11 + $0x188] sm:$0xff]  ;;  %v3797_v63 = vld [vmem:[#allocation11 + $0x78] sm:$0xff] }
 0x3a5   :  { %v1161_v55 = vmul.f32 %v2559_v40, %v1160_v21  ;;  %v3711_v21 = vld [vmem:[#allocation11 + $0x168] sm:$0xff]  ;;  %4388 = vst [vmem:[#allocation33_spill] sm:$0xff] %v3797_v63 }
 0x3a6   :  { %v2561_v49 = vpop.eup %2560  ;;  %v1143_v57 = vadd.f32 %v2557_v17, %v1142_v45  ;;  %v3722_v45 = vld [vmem:[#allocation11 + $0x148] sm:$0xff] }
 0x3a7   :  { %v1162_v15 = vadd.f32 %v2559_v40, %v1161_v55  ;;  %v1179_v26 = vmul.f32 %v2561_v49, %v3635_v14  ;;  %v2563_v25 = vpop.eup %2562  ;;  %vm1184_vm13 = vweird.f32 %v2561_v49  ;;  %v1215_v14 = vld [vmem:[#allocation8 + $0x10] sm:$0xff]  ;;  %v3728_v55 = vld [vmem:[#allocation11 + $0x158] sm:$0xff] }
 0x3a8   :  { %v1147_v32 = vsel %vm1146_vm9, %v2557_v17, %v1143_v57  ;;  %vm1185_vm15 = vmor %vm1183_vm14, %vm1184_vm13  ;;  %v4381_v57 = vmov 0.0  }
 0x3a9   :  { %v1152_v24 = vsel %vm1149_vm11, %v1151_v5, %v1147_v32  ;;  %v1166_v28 = vsel %vm1165_vm10, %v2559_v40, %v1162_v15  ;;  %v1180_v35 = vsub.f32 1.0, %v1179_v26  ;;  %v3688_v40 = vld [vmem:[#allocation11 + $0x1c8] sm:$0xff]  ;;  %v3745_v15 = vld [vmem:[#allocation11 + $0x190] sm:$0xff]  ;;  %v3747_v26 = vld [vmem:[#allocation11 + $0x118] sm:$0xff] }
 0x3aa   :  { %v1171_v56 = vsel %vm1168_vm12, %v1170_v3, %v1166_v28  ;;  %v1194_v52 = vmul.f32 %v2563_v25, %v1152_v24  ;;  %v3742_v5 = vld [vmem:[#allocation11 + $0x108] sm:$0xff]  ;;  %v3757_v32 = vld [vmem:[#allocation11 + $0xf8] sm:$0xff]  ;;  %v3766_v24 = vld [vmem:[#allocation11 + $0x150] sm:$0xff] }
 0x3ab   :  { %v1193_v37 = vmul.f32 %v1171_v56, %v1050_v60  ;;  %v1181_v62 = vmul.f32 %v2561_v49, %v1180_v35  ;;  %v3752_v3 = vld [vmem:[#allocation11 + $0xe8] sm:$0xff]  ;;  %v3755_v60 = vld [vmem:[#allocation11 + $0x170] sm:$0xff]  ;;  %v3768_v28 = vld [vmem:[#allocation11 + $0xd8] sm:$0xff] }
 0x3ac   :  { %v3762_v25 = vld [vmem:[#allocation11 + $0xc8] sm:$0xff]  ;;  %4382 = vst [vmem:[#allocation34_spill] sm:$0xff] %v3768_v28  ;;  %v3775_v56 = vld [vmem:[#allocation11 + $0x130] sm:$0xff] }
 0x3ad   :  { %v1195_v39 = vadd.f32 %v1194_v52, %v1193_v37  ;;  %v1182_v42 = vadd.f32 %v2561_v49, %v1181_v62  ;;  %v3772_v35 = vld [vmem:[#allocation11 + $0xa8] sm:$0xff]  ;;  %v3777_v52 = vld [vmem:[#allocation11 + $0xb8] sm:$0xff]  ;;  %v3785_v62 = vld [vmem:[#allocation11 + $0x110] sm:$0xff] }
 0x3ae   :  { %4383 = vst [vmem:[#allocation28_spill] sm:$0xff] %v3772_v35  ;;  %v3782_v37 = vld [vmem:[#allocation11 + $0x88] sm:$0xff] }
 0x3af   :  { %2564 = vtanh.f32 %v1195_v39  ;;  %v1186_v48 = vsel %vm1185_vm15, %v2561_v49, %v1182_v42  ;;  %v3735_v49 = vld [vmem:[#allocation11 + $0x1b0] sm:$0xff]  ;;  %4384 = vst [vmem:[#allocation29_spill] sm:$0xff] %v3777_v52  ;;  %v3787_v39 = vld [vmem:[#allocation11 + $0x98] sm:$0xff]  ;;  %v3792_v42 = vld [vmem:[#allocation11 + $0x68] sm:$0xff] }
 0x3b0   :  { %v1191_v6 = vsel %vm1188_vm1, %v1190_v58, %v1186_v48  ;;  %4385 = vst [vmem:[#allocation22_spill] sm:$0xff] %v3782_v37  ;;  %v3802_v48 = vld [vmem:[#allocation11 + $0x48] sm:$0xff]  ;;  %v3805_v58 = vld [vmem:[#allocation11 + $0xd0] sm:$0xff] }
 0x3b1   :  { %4386 = vst [vmem:[#allocation38_spill] sm:$0xff] %v3787_v39 }
 0x3b2   :  { %4387 = vst [vmem:[#allocation32_spill] sm:$0xff] %v3792_v42 }
 0x3b3   :  { %4389 = vst [vmem:[#allocation23_spill] sm:$0xff] %v3802_v48 }
 0x3b4   :  { %4390 = vst [vmem:[#allocation41_spill] sm:$0xff] %v3805_v58 }
 0x3b5   :  { %v2565_v54 = vpop.eup %2564 }
 0x3b6   :  { %v1197_v10 = vmul.f32 %v2565_v54, %v1191_v6  ;;  %v3807_v54 = vld [vmem:[#allocation11 + $0x58] sm:$0xff]  ;;  %v3812_v6 = vld [vmem:[#allocation11 + $0x28] sm:$0xff] }
 0x3b7   :  { %4391 = vst [vmem:[#allocation35_spill] sm:$0xff] %v3807_v54 }
 0x3b8   :  { %v1203_v12 = vmul.f32 %v1201_v9, %v1197_v10  ;;  %4392 = vst [vmem:[#allocation36_spill] sm:$0xff] %v3812_v6  ;;  %v3815_v10 = vld [vmem:[#allocation11 + $0xb0] sm:$0xff]  ;;  %v3822_v9 = vld [vmem:[#allocation11 + $0x8] sm:$0xff] }
 0x3b9   :  { %4393 = vst [vmem:[#allocation24_spill] sm:$0xff] %v3815_v10 }
 0x3ba   :  { %v1211_v17 = vadd.f32 %v1210_v13, %v1203_v12  ;;  %4395 = vst [vmem:[#allocation37_spill] sm:$0xff] %v3822_v9  ;;  %v3825_v12 = vld [vmem:[#allocation11 + $0x90] sm:$0xff]  ;;  %v3827_v13 = vld [vmem:[#allocation11 + $0x18] sm:$0xff] }
 0x3bb   :  { %4396 = vst [vmem:[#allocation39_spill] sm:$0xff] %v3825_v12 }
 0x3bc   :  { %1297 = vmatmul.f32.vlgmr.msra.gmra.mxu0 %v1211_v17  ;;  %1317 = vmatmul.f32.vlgmr.msrb.gmra.mxu1 %v1211_v17  ;;  %4397 = vst [vmem:[#allocation27_spill] sm:$0xff] %v3827_v13 }
 0x3bd   :  { %1337 = vmatmul.f32.vlgmr.msra.gmra.mxu2 %v1211_v17  ;;  %1357 = vmatmul.f32.vlgmr.msra.gmra.mxu3 %v1211_v17  ;;  %v3833_v17 = vld [vmem:[#allocation11 + $0x70] sm:$0xff] }
 0x3be   :  { %1543 = vmatpush.msrb.mxu1 %v3684_v18  ;;  %1583 = vmatpush.msra.mxu3 %v3686_v36  ;;  %4398 = vst [vmem:[#allocation46_spill] sm:$0xff] %v3833_v17 }
 0x3bf   :  { %1420 = vmatpush.msra.mxu2 %v1215_v14  ;;  %1670 = vmatpush.msra.mxu0 %v3608_v8  ;;  %v3840_v14 = vld [vmem:[#allocation11 + $0x50] sm:$0xff] }
 0x3c0   :  { %1544 = vmatpush.msrb.mxu1 %v3688_v40  ;;  %1584 = vmatpush.msra.mxu3 %v3690_v22  ;;  %4399 = vst [vmem:[#allocation40_spill] sm:$0xff] %v3840_v14 }
 0x3c1   :  { %1671 = vmatpush.msra.mxu0 %v3611_v29 }
 0x3c2   :  { %1545 = vmatpush.msrb.mxu1 %v3694_v27  ;;  %1585 = vmatpush.msra.mxu3 %v3696_v30 }
 0x3c3   :  { %1672 = vmatpush.msra.mxu0 %v3613_v33 }
 0x3c4   :  { %1546 = vmatpush.msrb.mxu1 %v3701_v31  ;;  %1586 = vmatpush.msra.mxu3 %v3703_v43 }
 0x3c5   :  { %2447 = vmatmul.msk.f32.vlgmr.msrb.gmra.mxu2 %vm1361_vm2, %v1212_v2  ;;  %2448 = vmatmul.msk.f32.vlgmr.msra.gmra.mxu1 %vm1361_vm2, %v1212_v2 }
 0x3c6   :  { %2450 = vmatmul.msk.f32.vlgmr.msrb.gmra.mxu3 %vm1361_vm2, %v1212_v2  ;;  %1547 = vmatpush.msrb.mxu1 %v3711_v21 }
 0x3c7   :  { %1563 = vmatpush.msrb.mxu2 %v3716_v20  ;;  %1587 = vmatpush.msra.mxu3 %v3718_v44 }
 0x3c8   :  { %1548 = vmatpush.msrb.mxu1 %v3722_v45  ;;  %1539 = vmatmul.f32.vlgmr.msrb.gmra.mxu0 %v4381_v57 }
 0x3c9   :  { %1564 = vmatpush.msrb.mxu2 %v3726_v50  ;;  %1588 = vmatpush.msra.mxu3 %v3728_v55 }
 0x3ca   :  { %1549 = vmatpush.msrb.mxu1 %v3732_v7  ;;  %1673 = vmatpush.msra.mxu0 %v3617_v61 }
 0x3cb   :  { %1565 = vmatpush.msrb.mxu2 %v3735_v49  ;;  %1589 = vmatpush.msra.mxu3 %v3737_v19 }
 0x3cc   :  { %1550 = vmatpush.msrb.mxu1 %v3742_v5  ;;  %1674 = vmatpush.msra.mxu0 %v3620_v34 }
 0x3cd   :  { %1566 = vmatpush.msrb.mxu2 %v3745_v15  ;;  %1590 = vmatpush.msra.mxu3 %v3747_v26 }
 0x3ce   :  { %2449 = vmatmul.msk.f32.vlgmr.msra.gmra.mxu2 %vm1361_vm2, %v1212_v2  ;;  %1551 = vmatpush.msrb.mxu1 %v3752_v3  ;;  %v3844_v2 = vld [vmem:[#allocation11 + $0x30] sm:$0xff] }
 0x3cf   :  { %1567 = vmatpush.msrb.mxu2 %v3755_v60  ;;  %1591 = vmatpush.msra.mxu3 %v3757_v32  ;;  %4400 = vst [vmem:[#allocation42_spill] sm:$0xff] %v3844_v2 }
 0x3d0   :  { %1552 = vmatpush.msrb.mxu1 %v3762_v25  ;;  %1675 = vmatpush.msra.mxu0 %v3627_v47 }
 0x3d1   :  { %1568 = vmatpush.msrb.mxu2 %v3766_v24  ;;  %1592 = vmatpush.msra.mxu3 %v3768_v28 }
 0x3d2   :  { %1553 = vmatpush.msrb.mxu1 %v3772_v35  ;;  %1676 = vmatpush.msra.mxu0 %v3633_v11 }
 0x3d3   :  { %1569 = vmatpush.msrb.mxu2 %v3775_v56  ;;  %1593 = vmatpush.msra.mxu3 %v3777_v52 }
 0x3d4   :  { %1554 = vmatpush.msrb.mxu1 %v3782_v37  ;;  %1677 = vmatpush.msra.mxu0 %v3638_v16 }
 0x3d5   :  { %1570 = vmatpush.msrb.mxu2 %v3785_v62  ;;  %1594 = vmatpush.msra.mxu3 %v3787_v39 }
 0x3d6   :  { %1555 = vmatpush.msrb.mxu1 %v3792_v42  ;;  %1678 = vmatpush.msra.mxu0 %v3644_v23 }
 0x3d7   :  { %1571 = vmatpush.msrb.mxu2 %v3795_v1  ;;  %1595 = vmatpush.msra.mxu3 %v3797_v63 }
 0x3d8   :  { %1556 = vmatpush.msrb.mxu1 %v3802_v48  ;;  %1679 = vmatpush.msra.mxu0 %v3648_v41 }
 0x3d9   :  { %1572 = vmatpush.msrb.mxu2 %v3805_v58  ;;  %1596 = vmatpush.msra.mxu3 %v3807_v54 }
 0x3da   :  { %1557 = vmatpush.msrb.mxu1 %v3812_v6  ;;  %1680 = vmatpush.msra.mxu0 %v3656_v51 }
 0x3db   :  { %1573 = vmatpush.msrb.mxu2 %v3815_v10  ;;  %1597 = vmatpush.msra.mxu3 %v3817_v53 }
 0x3dc   :  { %1558 = vmatpush.msrb.mxu1 %v3822_v9  ;;  %1681 = vmatpush.msra.mxu0 %v3665_v59  ;;  %v3850_v59 = vld [vmem:[#allocation11 + $0x10] sm:$0xff] }
 0x3dd   :  { %1574 = vmatpush.msrb.mxu2 %v3825_v12  ;;  %1598 = vmatpush.msra.mxu3 %v3827_v13  ;;  %4401 = vst [vmem:[#allocation30_spill] sm:$0xff] %v3850_v59 }
 0x3de   :  { %1559 = vmatmul.f32.vlgmr.msrb.gmra.mxu1 %v4381_v57  ;;  %1599 = vmatmul.f32.vlgmr.msra.gmra.mxu3 %v4381_v57 }
 0x3df   :  { %1575 = vmatpush.msrb.mxu2 %v3833_v17  ;;  %1690 = vmatpush.msra.mxu1 %v3684_v18 }
 0x3e0   :  { %1730 = vmatpush.msrb.mxu3 %v3686_v36  ;;  %1682 = vmatpush.msra.mxu0 %v3668_v0 }
 0x3e1   :  { %1576 = vmatpush.msrb.mxu2 %v3840_v14  ;;  %1691 = vmatpush.msra.mxu1 %v3688_v40 }
 0x3e2   :  { %1731 = vmatpush.msrb.mxu3 %v3690_v22  ;;  %1683 = vmatpush.msra.mxu0 %v3671_v38 }
 0x3e3   :  { %1577 = vmatpush.msrb.mxu2 %v3844_v2  ;;  %1692 = vmatpush.msra.mxu1 %v3694_v27 }
 0x3e4   :  { %1732 = vmatpush.msrb.mxu3 %v3696_v30  ;;  %1684 = vmatpush.msra.mxu0 %v3674_v46 }
 0x3e5   :  { %1578 = vmatpush.msrb.mxu2 %v3850_v59  ;;  %1693 = vmatpush.msra.mxu1 %v3701_v31 }
 0x3e6   :  { %1579 = vmatmul.f32.vlgmr.msrb.gmra.mxu2 %v4381_v57  ;;  %1733 = vmatpush.msrb.mxu3 %v3703_v43  ;;  %v4402_v57 = vld [vmem:[#allocation20_spill] sm:$0xff] }
 0x3e7   :  { %1710 = vmatpush.msra.mxu2 %v3716_v20  ;;  %1694 = vmatpush.msra.mxu1 %v3711_v21 }
 0x3e8   :  { %1734 = vmatpush.msrb.mxu3 %v3718_v44  ;;  %1685 = vmatpush.msra.mxu0 %v3678_v4 }
 0x3e9   :  { %1711 = vmatpush.msra.mxu2 %v3726_v50  ;;  %1695 = vmatpush.msra.mxu1 %v3722_v45 }
 0x3ea   :  { %1735 = vmatpush.msrb.mxu3 %v3728_v55  ;;  %1835 = vmatpush.msrb.mxu0 %v3608_v8 }
 0x3eb   :  { %1712 = vmatpush.msra.mxu2 %v3735_v49  ;;  %1696 = vmatpush.msra.mxu1 %v3732_v7 }
 0x3ec   :  { %1736 = vmatpush.msrb.mxu3 %v3737_v19  ;;  %1836 = vmatpush.msrb.mxu0 %v3611_v29 }
 0x3ed   :  { %1713 = vmatpush.msra.mxu2 %v3745_v15  ;;  %1697 = vmatpush.msra.mxu1 %v3742_v5 }
 0x3ee   :  { %1737 = vmatpush.msrb.mxu3 %v3747_v26  ;;  %1837 = vmatpush.msrb.mxu0 %v3613_v33 }
 0x3ef   :  { %1714 = vmatpush.msra.mxu2 %v3755_v60  ;;  %1698 = vmatpush.msra.mxu1 %v3752_v3 }
 0x3f0   :  { %1738 = vmatpush.msrb.mxu3 %v3757_v32  ;;  %1838 = vmatpush.msrb.mxu0 %v3617_v61 }
 0x3f1   :  { %1715 = vmatpush.msra.mxu2 %v3766_v24  ;;  %1699 = vmatpush.msra.mxu1 %v3762_v25 }
 0x3f2   :  { %1739 = vmatpush.msrb.mxu3 %v3768_v28  ;;  %1839 = vmatpush.msrb.mxu0 %v3620_v34 }
 0x3f3   :  { %1716 = vmatpush.msra.mxu2 %v3775_v56  ;;  %1700 = vmatpush.msra.mxu1 %v3772_v35 }
 0x3f4   :  { %1740 = vmatpush.msrb.mxu3 %v3777_v52  ;;  %1840 = vmatpush.msrb.mxu0 %v3627_v47 }
 0x3f5   :  { %1717 = vmatpush.msra.mxu2 %v3785_v62  ;;  %1701 = vmatpush.msra.mxu1 %v3782_v37 }
 0x3f6   :  { %1741 = vmatpush.msrb.mxu3 %v3787_v39  ;;  %1841 = vmatpush.msrb.mxu0 %v3633_v11 }
 0x3f7   :  { %1718 = vmatpush.msra.mxu2 %v3795_v1  ;;  %1702 = vmatpush.msra.mxu1 %v3792_v42 }
 0x3f8   :  { %1742 = vmatpush.msrb.mxu3 %v3797_v63  ;;  %1842 = vmatpush.msrb.mxu0 %v3638_v16 }
 0x3f9   :  { %1719 = vmatpush.msra.mxu2 %v3805_v58  ;;  %1703 = vmatpush.msra.mxu1 %v3802_v48 }
 0x3fa   :  { %1743 = vmatpush.msrb.mxu3 %v3807_v54  ;;  %1843 = vmatpush.msrb.mxu0 %v3644_v23 }
 0x3fb   :  { %1720 = vmatpush.msra.mxu2 %v3815_v10  ;;  %1704 = vmatpush.msra.mxu1 %v3812_v6 }
 0x3fc   :  { %1744 = vmatpush.msrb.mxu3 %v3817_v53  ;;  %1844 = vmatpush.msrb.mxu0 %v3648_v41 }
 0x3fd   :  { %1721 = vmatpush.msra.mxu2 %v3825_v12  ;;  %1705 = vmatpush.msra.mxu1 %v3822_v9 }
 0x3fe   :  { %1745 = vmatpush.msrb.mxu3 %v3827_v13  ;;  %1845 = vmatpush.msrb.mxu0 %v3656_v51 }
 0x3ff   :  { %1855 = vmatpush.msrb.mxu1 %v3684_v18  ;;  %1722 = vmatpush.msra.mxu2 %v3833_v17 }
 0x400   :  { %1895 = vmatpush.msra.mxu3 %v3686_v36  ;;  %1846 = vmatpush.msrb.mxu0 %v4402_v57 }
 0x401   :  { %1856 = vmatpush.msrb.mxu1 %v3688_v40  ;;  %1723 = vmatpush.msra.mxu2 %v3840_v14 }
 0x402   :  { %1896 = vmatpush.msra.mxu3 %v3690_v22  ;;  %1847 = vmatpush.msrb.mxu0 %v3668_v0 }
 0x403   :  { %1857 = vmatpush.msrb.mxu1 %v3694_v27  ;;  %1724 = vmatpush.msra.mxu2 %v3844_v2 }
 0x404   :  { %1897 = vmatpush.msra.mxu3 %v3696_v30  ;;  %1848 = vmatpush.msrb.mxu0 %v3671_v38 }
 0x405   :  { %1858 = vmatpush.msrb.mxu1 %v3701_v31  ;;  %1725 = vmatpush.msra.mxu2 %v3850_v59 }
 0x406   :  { %1898 = vmatpush.msra.mxu3 %v3703_v43  ;;  %1849 = vmatpush.msrb.mxu0 %v3674_v46 }
 0x407   :  { %1875 = vmatpush.msrb.mxu2 %v3716_v20  ;;  %1859 = vmatpush.msrb.mxu1 %v3711_v21 }
 0x408   :  { %1899 = vmatpush.msra.mxu3 %v3718_v44  ;;  %1850 = vmatpush.msrb.mxu0 %v3678_v4 }
 0x409   :  { %1876 = vmatpush.msrb.mxu2 %v3726_v50  ;;  %1860 = vmatpush.msrb.mxu1 %v3722_v45 }
 0x40a   :  { %1900 = vmatpush.msra.mxu3 %v3728_v55 }
 0x40b   :  { %1877 = vmatpush.msrb.mxu2 %v3735_v49  ;;  %1861 = vmatpush.msrb.mxu1 %v3732_v7 }
 0x40c   :  { %1901 = vmatpush.msra.mxu3 %v3737_v19 }
 0x40d   :  { %1878 = vmatpush.msrb.mxu2 %v3745_v15  ;;  %1862 = vmatpush.msrb.mxu1 %v3742_v5 }
 0x40e   :  { %1902 = vmatpush.msra.mxu3 %v3747_v26 }
 0x40f   :  { %1879 = vmatpush.msrb.mxu2 %v3755_v60  ;;  %1863 = vmatpush.msrb.mxu1 %v3752_v3 }
 0x410   :  { %1903 = vmatpush.msra.mxu3 %v3757_v32 }
 0x411   :  { %1880 = vmatpush.msrb.mxu2 %v3766_v24  ;;  %1864 = vmatpush.msrb.mxu1 %v3762_v25 }
 0x412   :  { %1904 = vmatpush.msra.mxu3 %v3768_v28 }
 0x413   :  { %1881 = vmatpush.msrb.mxu2 %v3775_v56  ;;  %1865 = vmatpush.msrb.mxu1 %v3772_v35 }
 0x414   :  { %1905 = vmatpush.msra.mxu3 %v3777_v52 }
 0x415   :  { %1882 = vmatpush.msrb.mxu2 %v3785_v62  ;;  %1866 = vmatpush.msrb.mxu1 %v3782_v37 }
 0x416   :  { %1906 = vmatpush.msra.mxu3 %v3787_v39 }
 0x417   :  { %1883 = vmatpush.msrb.mxu2 %v3795_v1  ;;  %1867 = vmatpush.msrb.mxu1 %v3792_v42 }
 0x418   :  { %1907 = vmatpush.msra.mxu3 %v3797_v63 }
 0x419   :  { %1884 = vmatpush.msrb.mxu2 %v3805_v58  ;;  %1868 = vmatpush.msrb.mxu1 %v3802_v48 }
 0x41a   :  { %1908 = vmatpush.msra.mxu3 %v3807_v54 }
 0x41b   :  { %1885 = vmatpush.msrb.mxu2 %v3815_v10  ;;  %1869 = vmatpush.msrb.mxu1 %v3812_v6 }
 0x41c   :  { %1909 = vmatpush.msra.mxu3 %v3817_v53  ;;  %v1445_v53 = vld [vmem:[%s4159_s9] sm:$0xf] }
 0x41d   :  { %1886 = vmatpush.msrb.mxu2 %v3825_v12  ;;  %1870 = vmatpush.msrb.mxu1 %v3822_v9  ;;  %v1447_v6 = vperm.slane %v1445_v53, 0  ;;  %v1448_v42 = vperm.slane %v1445_v53, 1  ;;  %v1450_v10 = vperm.slane %v1445_v53, 3 }
 0x41e   :  { %1910 = vmatpush.msra.mxu3 %v3827_v13 }
 0x41f   :  { %1887 = vmatpush.msrb.mxu2 %v3833_v17 }
 0x421   :  { %1888 = vmatpush.msrb.mxu2 %v3840_v14 }
 0x423   :  { %1889 = vmatpush.msrb.mxu2 %v3844_v2 }
 0x425   :  { %1890 = vmatpush.msrb.mxu2 %v3850_v59 }
 0x439   :  { %v1298_v46 = vpop.f32.mrf.mxu0  ;;  %v1318_v48 = vpop.f32.mrf.mxu1 }
 0x440   :  { %v1338_v4 = vpop.f32.mrf.mxu2  ;;  %v1358_v14 = vpop.f32.mrf.mxu3 }
 0x442   :  { %v1402_v2 = vpop.f32.mrf.mxu1 }
 0x443   :  { %v1403_v59 = vadd.f32 %v1402_v2, %v1318_v48 }
 0x445   :  { %v1540_v38 = vpop.f32.mrf.mxu0  ;;  %v3973_v37 = vadd.f32 %v1448_v42, %v1403_v59  ;;  %v1449_v42 = vperm.slane %v1445_v53, 2 }
 0x447   :  { %4404 = vst [vmem:[#allocation43_spill] sm:$0xff] %v3973_v37 }
 0x448   :  { %v1382_v54 = vpop.f32.mrf.mxu2 }
 0x449   :  { %v1383_v9 = vadd.f32 %v1382_v54, %v1298_v46  ;;  %v1442_v39 = vpop.f32.mrf.mxu3 }
 0x44a   :  { %v1443_v52 = vadd.f32 %v1442_v39, %v1358_v14 }
 0x44b   :  { %v3970_v13 = vadd.f32 %v1447_v6, %v1383_v9 }
 0x44c   :  { %v3976_v6 = vadd.f32 %v1450_v10, %v1443_v52 }
 0x44d   :  { %4403 = vst [vmem:[#allocation47_spill] sm:$0xff] %v3970_v13  ;;  %v1603_v63 = vadd.f32 %v1540_v38, %v3970_v13 }
 0x44e   :  { %4405 = vst [vmem:[#allocation44_spill] sm:$0xff] %v3976_v6 }
 0x44f   :  { %v2451_v17 = vmul.f32 -1.442695, %v1603_v63 }
 0x451   :  { %2566 = vpow2.f32 %v2451_v17  ;;  %v1422_v63 = vpop.f32.mrf.mxu2 }
 0x452   :  { %v1423_v59 = vadd.f32 %v1422_v63, %v1338_v4 }
 0x457   :  { %v2567_v0 = vpop.eup %2566 }
 0x458   :  { %v1610_v12 = vadd.f32 1.0, %v2567_v0 }
 0x45a   :  { %2568 = vrcp.f32 %v1610_v12  ;;  %vm1616_vm4 = vweird.f32 %v1610_v12  ;;  %v1622_v53 = vand.u32 2147483648, %v1610_v12 }
 0x45b   :  { %v1560_v57 = vpop.f32.mrf.mxu1 }
 0x45c   :  { %v1604_v46 = vadd.f32 %v1560_v57, %v3973_v37  ;;  %v3979_v37 = vadd.f32 %v1449_v42, %v1423_v59 }
 0x45e   :  { %v2452_v54 = vmul.f32 -1.442695, %v1604_v46  ;;  %4406 = vst [vmem:[#allocation50_spill] sm:$0xff] %v3979_v37 }
 0x460   :  { %2570 = vpow2.f32 %v2452_v54  ;;  %v2569_v9 = vpop.eup %2568 }
 0x461   :  { %v1600_v38 = vpop.f32.mrf.mxu3  ;;  %v1612_v0 = vmul.f32 %v2569_v9, %v1610_v12  ;;  %vm1617_vm3 = vweird.f32 %v2569_v9 }
 0x462   :  { %v1606_v48 = vadd.f32 %v1600_v38, %v3976_v6  ;;  %vm1618_vm6 = vmor %vm1616_vm4, %vm1617_vm3 }
 0x463   :  { %v1613_v14 = vsub.f32 1.0, %v1612_v0 }
 0x464   :  { %v2453_v17 = vmul.f32 -1.442695, %v1606_v48 }
 0x465   :  { %v1614_v54 = vmul.f32 %v2569_v9, %v1613_v14 }
 0x466   :  { %v2571_v2 = vpop.eup %2570  ;;  %2572 = vpow2.f32 %v2453_v17  ;;  %v1620_v17 = vand.u32 2147483647, %v1610_v12 }
 0x467   :  { %v1629_v39 = vadd.f32 1.0, %v2571_v2  ;;  %v1615_v6 = vadd.f32 %v2569_v9, %v1614_v54 }
 0x468   :  { %vm1621_vm9 = vcmp.eq.f32.partialorder %v1620_v17, 8.507059e+37  ;;  %v4423_v17 = vld [vmem:[#allocation23_spill] sm:$0xff] }
 0x469   :  { %2574 = vrcp.f32 %v1629_v39  ;;  %v1580_v57 = vpop.f32.mrf.mxu2  ;;  %v1641_v4 = vand.u32 2147483648, %v1629_v39  ;;  %v1639_v2 = vand.u32 2147483647, %v1629_v39  ;;  %vm1635_vm7 = vweird.f32 %v1629_v39 }
 0x46a   :  { %v1605_v46 = vadd.f32 %v1580_v57, %v3979_v37  ;;  %v1619_v42 = vsel %vm1618_vm6, %v2569_v9, %v1615_v6  ;;  %v1623_v37 = vor.u32 1.1754944e-38, %v1622_v53 }
 0x46b   :  { %vm1640_vm10 = vcmp.eq.f32.partialorder %v1639_v2, 8.507059e+37  ;;  %v4424_v2 = vld [vmem:[#allocation40_spill] sm:$0xff] }
 0x46c   :  { %v2573_v52 = vpop.eup %2572 }
 0x46d   :  { %v1649_v10 = vadd.f32 1.0, %v2573_v52  ;;  %v1642_v52 = vor.u32 1.1754944e-38, %v1641_v4 }
 0x46f   :  { %v2575_v13 = vpop.eup %2574  ;;  %2576 = vrcp.f32 %v1649_v10  ;;  %v1661_v58 = vand.u32 2147483648, %v1649_v10  ;;  %vm1655_vm12 = vweird.f32 %v1649_v10  ;;  %v1659_v6 = vand.u32 2147483647, %v1649_v10 }
 0x470   :  { %v1631_v38 = vmul.f32 %v2575_v13, %v1629_v39  ;;  %2578 = vtanh.f32 %v1605_v46  ;;  %vm1636_vm5 = vweird.f32 %v2575_v13 }
 0x471   :  { %vm1637_vm8 = vmor %vm1635_vm7, %vm1636_vm5  ;;  %v1662_v4 = vor.u32 1.1754944e-38, %v1661_v58  ;;  %vm1660_vm14 = vcmp.eq.f32.partialorder %v1659_v6, 8.507059e+37  ;;  %v4420_v58 = vld [vmem:[#allocation46_spill] sm:$0xff] }
 0x472   :  { %v1632_v48 = vsub.f32 1.0, %v1631_v38  ;;  %v1624_v38 = vsel %vm1621_vm9, %v1623_v37, %v1619_v42  ;;  %v4427_v42 = vld [vmem:[#allocation36_spill] sm:$0xff] }
 0x474   :  { %v1633_v63 = vmul.f32 %v2575_v13, %v1632_v48 }
 0x475   :  { %v2577_v0 = vpop.eup %2576 }
 0x476   :  { %v1651_v59 = vmul.f32 %v2577_v0, %v1649_v10  ;;  %v1634_v14 = vadd.f32 %v2575_v13, %v1633_v63  ;;  %v2579_v57 = vpop.eup %2578  ;;  %vm1656_vm11 = vweird.f32 %v2577_v0  ;;  %v4421_v10 = vld [vmem:[#allocation33_spill] sm:$0xff] }
 0x477   :  { %v1666_v51 = vmul.f32 %v2579_v57, %v1624_v38  ;;  %vm1657_vm13 = vmor %vm1655_vm12, %vm1656_vm11  ;;  %v4422_v63 = vld [vmem:[#allocation25_spill] sm:$0xff]  ;;  %v4433_v38 = vld [vmem:[#allocation27_spill] sm:$0xff] }
 0x478   :  { %v1652_v46 = vsub.f32 1.0, %v1651_v59  ;;  %v1638_v54 = vsel %vm1637_vm8, %v2575_v13, %v1634_v14  ;;  %v4426_v59 = vld [vmem:[#allocation26_spill] sm:$0xff]  ;;  %v4429_v57 = vld [vmem:[#allocation45_spill] sm:$0xff] }
 0x479   :  { %v1643_v35 = vsel %vm1640_vm10, %v1642_v52, %v1638_v54  ;;  %v4428_v14 = vld [vmem:[#allocation42_spill] sm:$0xff]  ;;  %v4430_v52 = vld [vmem:[#allocation21_spill] sm:$0xff] }
 0x47a   :  { %v1653_v48 = vmul.f32 %v2577_v0, %v1652_v46  ;;  %v1665_v12 = vmul.f32 0.0, %v1643_v35  ;;  %v4419_v35 = vld [vmem:[#allocation32_spill] sm:$0xff]  ;;  %v4431_v46 = vld [vmem:[#allocation37_spill] sm:$0xff]  ;;  %v4432_v54 = vld [vmem:[#allocation30_spill] sm:$0xff] }
 0x47c   :  { %v3982_v28 = vadd.f32 %v1666_v51, %v1665_v12  ;;  %v1654_v39 = vadd.f32 %v2577_v0, %v1653_v48  ;;  %v4418_v51 = vld [vmem:[#allocation31_spill] sm:$0xff] }
 0x47e   :  { %2580 = vtanh.f32 %v3982_v28  ;;  %v1658_v9 = vsel %vm1657_vm13, %v2577_v0, %v1654_v39  ;;  %v4425_v0 = vld [vmem:[#allocation35_spill] sm:$0xff] }
 0x47f   :  { %v1663_v53 = vsel %vm1660_vm14, %v1662_v4, %v1658_v9  ;;  %v4434_v9 = vld [vmem:[#allocation47_spill] sm:$0xff] }
 0x484   :  { %v2581_v13 = vpop.eup %2580 }
 0x485   :  { %v3985_v37 = vmul.f32 %v2581_v13, %v1663_v53  ;;  %v4435_v13 = vld [vmem:[#allocation43_spill] sm:$0xff] }
 0x487   :  { %4407 = vst [vmem:[#allocation53_spill] sm:$0xff] %v3985_v37  ;;  %1686 = vmatmul.f32.vlgmr.msra.gmra.mxu0 %v3985_v37  ;;  %1706 = vmatmul.f32.vlgmr.msra.gmra.mxu1 %v3985_v37 }
 0x488   :  { %1726 = vmatmul.f32.vlgmr.msra.gmra.mxu2 %v3985_v37  ;;  %1746 = vmatmul.f32.vlgmr.msrb.gmra.mxu3 %v3985_v37 }
 0x489   :  { %2000 = vmatpush.msra.mxu0 %v3608_v8  ;;  %2020 = vmatpush.msra.mxu1 %v3684_v18  ;;  %v4408_v8 = vld [vmem:[#allocation41_spill] sm:$0xff] }
 0x48a   :  { %2040 = vmatpush.msra.mxu2 %v3716_v20  ;;  %2060 = vmatpush.msrb.mxu3 %v3686_v36 }
 0x48b   :  { %2001 = vmatpush.msra.mxu0 %v3611_v29  ;;  %2021 = vmatpush.msra.mxu1 %v3688_v40  ;;  %v4409_v29 = vld [vmem:[#allocation34_spill] sm:$0xff] }
 0x48c   :  { %2041 = vmatpush.msra.mxu2 %v3726_v50  ;;  %2061 = vmatpush.msrb.mxu3 %v3690_v22 }
 0x48d   :  { %2002 = vmatpush.msra.mxu0 %v3613_v33  ;;  %2022 = vmatpush.msra.mxu1 %v3694_v27  ;;  %v4410_v33 = vld [vmem:[#allocation48_spill] sm:$0xff] }
 0x48e   :  { %2042 = vmatpush.msra.mxu2 %v3735_v49  ;;  %2062 = vmatpush.msrb.mxu3 %v3696_v30 }
 0x48f   :  { %2003 = vmatpush.msra.mxu0 %v3617_v61  ;;  %2023 = vmatpush.msra.mxu1 %v3701_v31  ;;  %v4411_v61 = vld [vmem:[#allocation28_spill] sm:$0xff] }
 0x490   :  { %2043 = vmatpush.msra.mxu2 %v3745_v15  ;;  %2063 = vmatpush.msrb.mxu3 %v3703_v43 }
 0x491   :  { %2004 = vmatpush.msra.mxu0 %v3620_v34  ;;  %2024 = vmatpush.msra.mxu1 %v3711_v21  ;;  %v4412_v34 = vld [vmem:[#allocation24_spill] sm:$0xff] }
 0x492   :  { %2044 = vmatpush.msra.mxu2 %v3755_v60  ;;  %2064 = vmatpush.msrb.mxu3 %v3718_v44 }
 0x493   :  { %2005 = vmatpush.msra.mxu0 %v3627_v47  ;;  %2025 = vmatpush.msra.mxu1 %v3722_v45  ;;  %v4413_v47 = vld [vmem:[#allocation29_spill] sm:$0xff] }
 0x494   :  { %2045 = vmatpush.msra.mxu2 %v3766_v24  ;;  %2065 = vmatpush.msrb.mxu3 %v3728_v55 }
 0x495   :  { %2006 = vmatpush.msra.mxu0 %v3633_v11  ;;  %2026 = vmatpush.msra.mxu1 %v3732_v7  ;;  %v4414_v11 = vld [vmem:[#allocation20_spill] sm:$0xff] }
 0x496   :  { %2046 = vmatpush.msra.mxu2 %v3775_v56  ;;  %2066 = vmatpush.msrb.mxu3 %v3737_v19 }
 0x497   :  { %2007 = vmatpush.msra.mxu0 %v3638_v16  ;;  %2027 = vmatpush.msra.mxu1 %v3742_v5  ;;  %v4415_v16 = vld [vmem:[#allocation22_spill] sm:$0xff] }
 0x498   :  { %2047 = vmatpush.msra.mxu2 %v3785_v62  ;;  %2067 = vmatpush.msrb.mxu3 %v3747_v26 }
 0x499   :  { %2008 = vmatpush.msra.mxu0 %v3644_v23  ;;  %2028 = vmatpush.msra.mxu1 %v3752_v3  ;;  %v4416_v23 = vld [vmem:[#allocation39_spill] sm:$0xff] }
 0x49a   :  { %2048 = vmatpush.msra.mxu2 %v3795_v1  ;;  %2068 = vmatpush.msrb.mxu3 %v3757_v32 }
 0x49b   :  { %2009 = vmatpush.msra.mxu0 %v3648_v41  ;;  %2029 = vmatpush.msra.mxu1 %v3762_v25  ;;  %v4417_v41 = vld [vmem:[#allocation38_spill] sm:$0xff] }
 0x49c   :  { %2049 = vmatpush.msra.mxu2 %v4408_v8  ;;  %2069 = vmatpush.msrb.mxu3 %v4409_v29 }
 0x49d   :  { %2010 = vmatpush.msra.mxu0 %v4410_v33  ;;  %2030 = vmatpush.msra.mxu1 %v4411_v61 }
 0x49e   :  { %2050 = vmatpush.msra.mxu2 %v4412_v34  ;;  %2070 = vmatpush.msrb.mxu3 %v4413_v47 }
 0x49f   :  { %2011 = vmatpush.msra.mxu0 %v4414_v11  ;;  %2031 = vmatpush.msra.mxu1 %v4415_v16 }
 0x4a0   :  { %2051 = vmatpush.msra.mxu2 %v4416_v23  ;;  %2071 = vmatpush.msrb.mxu3 %v4417_v41 }
 0x4a1   :  { %2012 = vmatpush.msra.mxu0 %v4418_v51  ;;  %2032 = vmatpush.msra.mxu1 %v4419_v35 }
 0x4a2   :  { %2052 = vmatpush.msra.mxu2 %v4420_v58  ;;  %2072 = vmatpush.msrb.mxu3 %v4421_v10 }
 0x4a3   :  { %2013 = vmatpush.msra.mxu0 %v4422_v63  ;;  %2033 = vmatpush.msra.mxu1 %v4423_v17 }
 0x4a4   :  { %2053 = vmatpush.msra.mxu2 %v4424_v2  ;;  %2073 = vmatpush.msrb.mxu3 %v4425_v0 }
 0x4a5   :  { %2014 = vmatpush.msra.mxu0 %v4426_v59  ;;  %2034 = vmatpush.msra.mxu1 %v4427_v42  ;;  %v4436_v59 = vld [vmem:[#allocation44_spill] sm:$0xff] }
 0x4a6   :  { %2054 = vmatpush.msra.mxu2 %v4428_v14  ;;  %2074 = vmatpush.msrb.mxu3 %v4429_v57 }
 0x4a7   :  { %2015 = vmatpush.msra.mxu0 %v4430_v52  ;;  %2035 = vmatpush.msra.mxu1 %v4431_v46 }
 0x4a8   :  { %2055 = vmatpush.msra.mxu2 %v4432_v54  ;;  %2075 = vmatpush.msrb.mxu3 %v4433_v38 }
 0x504   :  { %v1687_v48 = vpop.f32.mrf.mxu0  ;;  %v1707_v12 = vpop.f32.mrf.mxu1 }
 0x505   :  { %v1754_v39 = vrot.slane %v1687_v48, 7  ;;  %v1755_v6 = vrot.slane %v1707_v12, 7 }
 0x507   :  { %v1762_v4 = vadd.f32 %v1754_v39, %v4434_v9  ;;  %v1763_v53 = vadd.f32 %v1755_v6, %v4435_v13 }
 0x509   :  { %v2454_v33 = vmul.f32 -1.442695, %v1762_v4  ;;  %v2455_v11 = vmul.f32 -1.442695, %v1763_v53  ;;  %v4437_v53 = vld [vmem:[#allocation50_spill] sm:$0xff] }
 0x50b   :  { %2582 = vpow2.f32 %v2454_v33  ;;  %v1747_v51 = vpop.f32.mrf.mxu3  ;;  %v1727_v48 = vpop.f32.mrf.mxu2 }
 0x50c   :  { %2584 = vpow2.f32 %v2455_v11  ;;  %v1757_v63 = vrot.slane %v1747_v51, 7  ;;  %v1756_v12 = vrot.slane %v1727_v48, 7 }
 0x50e   :  { %v1765_v52 = vadd.f32 %v1757_v63, %v4436_v59  ;;  %v1764_v33 = vadd.f32 %v1756_v12, %v4437_v53 }
 0x510   :  { %v2456_v37 = vmul.f32 -1.442695, %v1765_v52 }
 0x511   :  { %v2583_v54 = vpop.eup %2582 }
 0x512   :  { %v2585_v46 = vpop.eup %2584  ;;  %v1769_v38 = vadd.f32 1.0, %v2583_v54  ;;  %2586 = vpow2.f32 %v2456_v37 }
 0x513   :  { %v1788_v57 = vadd.f32 1.0, %v2585_v46 }
 0x514   :  { %2588 = vrcp.f32 %v1769_v38  ;;  %v1781_v59 = vand.u32 2147483648, %v1769_v38  ;;  %v1779_v46 = vand.u32 2147483647, %v1769_v38  ;;  %vm1775_vm2 = vweird.f32 %v1769_v38 }
 0x515   :  { %2590 = vrcp.f32 %v1788_v57  ;;  %v1800_v54 = vand.u32 2147483648, %v1788_v57  ;;  %v1798_v48 = vand.u32 2147483647, %v1788_v57  ;;  %vm1794_vm3 = vweird.f32 %v1788_v57 }
 0x516   :  { %v1782_v12 = vor.u32 1.1754944e-38, %v1781_v59  ;;  %vm1780_vm6 = vcmp.eq.f32.partialorder %v1779_v46, 8.507059e+37 }
 0x517   :  { %vm1799_vm7 = vcmp.eq.f32.partialorder %v1798_v48, 8.507059e+37 }
 0x518   :  { %v2587_v39 = vpop.eup %2586 }
 0x519   :  { %v1808_v6 = vadd.f32 1.0, %v2587_v39 }
 0x51a   :  { %v2589_v4 = vpop.eup %2588 }
 0x51b   :  { %v2591_v13 = vpop.eup %2590  ;;  %v1771_v11 = vmul.f32 %v2589_v4, %v1769_v38  ;;  %2592 = vrcp.f32 %v1808_v6  ;;  %vm1776_vm15 = vweird.f32 %v2589_v4  ;;  %vm1814_vm9 = vweird.f32 %v1808_v6 }
 0x51c   :  { %v1790_v51 = vmul.f32 %v2591_v13, %v1788_v57  ;;  %2594 = vtanh.f32 %v1764_v33  ;;  %vm1795_vm1 = vweird.f32 %v2591_v13  ;;  %vm1777_vm4 = vmor %vm1775_vm2, %vm1776_vm15 }
 0x51d   :  { %v1772_v63 = vsub.f32 1.0, %v1771_v11  ;;  %v1825_v11 = vrot.slane %v3982_v28, 7  ;;  %vm1796_vm5 = vmor %vm1794_vm3, %vm1795_vm1  ;;  %v1820_v28 = vand.u32 2147483648, %v1808_v6 }
 0x51e   :  { %v1791_v52 = vsub.f32 1.0, %v1790_v51  ;;  %v1801_v51 = vor.u32 1.1754944e-38, %v1800_v54 }
 0x51f   :  { %v1773_v37 = vmul.f32 %v2589_v4, %v1772_v63  ;;  %v1821_v54 = vor.u32 1.1754944e-38, %v1820_v28 }
 0x520   :  { %v1792_v9 = vmul.f32 %v2591_v13, %v1791_v52 }
 0x521   :  { %v2593_v14 = vpop.eup %2592  ;;  %v1774_v39 = vadd.f32 %v2589_v4, %v1773_v37 }
 0x522   :  { %v1793_v53 = vadd.f32 %v2591_v13, %v1792_v9  ;;  %v1810_v42 = vmul.f32 %v2593_v14, %v1808_v6  ;;  %v2595_v63 = vpop.eup %2594  ;;  %vm1815_vm8 = vweird.f32 %v2593_v14  ;;  %v1818_v9 = vand.u32 2147483647, %v1808_v6 }
 0x523   :  { %v1778_v33 = vsel %vm1777_vm4, %v2589_v4, %v1774_v39  ;;  %vm1816_vm10 = vmor %vm1814_vm9, %vm1815_vm8  ;;  %vm2327_vm9 = vcmask 1040384  }
 0x524   :  { %v1783_v0 = vsel %vm1780_vm6, %v1782_v12, %v1778_v33  ;;  %v1797_v2 = vsel %vm1796_vm5, %v2591_v13, %v1793_v53  ;;  %v1811_v52 = vsub.f32 1.0, %v1810_v42  ;;  %vm1819_vm11 = vcmp.eq.f32.partialorder %v1818_v9, 8.507059e+37 }
 0x525   :  { %v1802_v17 = vsel %vm1799_vm7, %v1801_v51, %v1797_v2  ;;  %v1828_v10 = vmul.f32 %v2595_v63, %v1783_v0  ;;  %v2702_v2 = vld [vmem:[#allocation11 + $0x1c0] sm:$0xff]  ;;  %v4451_v63 = vld [vmem:[#allocation50_spill] sm:$0xff] }
 0x526   :  { %v1827_v37 = vmul.f32 %v1825_v11, %v1802_v17  ;;  %v1812_v38 = vmul.f32 %v2593_v14, %v1811_v52  ;;  %v2703_v0 = vld [vmem:[#allocation11 + $0x1a0] sm:$0xff] }
 0x528   :  { %v4060_v57 = vadd.f32 %v1828_v10, %v1827_v37  ;;  %v1813_v59 = vadd.f32 %v2593_v14, %v1812_v38  ;;  %v2701_v10 = vld [vmem:[#allocation11 + $0x1e0] sm:$0xff] }
 0x52a   :  { %2596 = vtanh.f32 %v4060_v57  ;;  %v1817_v4 = vsel %vm1816_vm10, %v2593_v14, %v1813_v59  ;;  %vm2329_vm10 = vcmask 1041408  }
 0x52b   :  { %v1822_v53 = vsel %vm1819_vm11, %v1821_v54, %v1817_v4 }
 0x530   :  { %v2597_v13 = vpop.eup %2596 }
 0x531   :  { %v4063_v42 = vmul.f32 %v2597_v13, %v1822_v53 }
 0x533   :  { %v1833_v17 = vrot.slane %v4063_v42, 1 }
 0x535   :  { %1851 = vmatmul.f32.vlgmr.msrb.gmra.mxu0 %v1833_v17  ;;  %1871 = vmatmul.f32.vlgmr.msrb.gmra.mxu1 %v1833_v17 }
 0x536   :  { %1891 = vmatmul.f32.vlgmr.msrb.gmra.mxu2 %v1833_v17  ;;  %1911 = vmatmul.f32.vlgmr.msra.gmra.mxu3 %v1833_v17 }
 0x537   :  { %2165 = vmatpush.msrb.mxu0 %v2701_v10  ;;  %2185 = vmatpush.msrb.mxu1 %v3684_v18  ;;  %v2704_v18 = vld [vmem:[#allocation11 + $0x180] sm:$0xff] }
 0x538   :  { %2205 = vmatpush.msrb.mxu2 %v3716_v20  ;;  %2225 = vmatpush.msra.mxu3 %v3686_v36  ;;  %v2705_v36 = vld [vmem:[#allocation11 + $0x160] sm:$0xff] }
 0x539   :  { %2166 = vmatpush.msrb.mxu0 %v2702_v2  ;;  %2186 = vmatpush.msrb.mxu1 %v3688_v40  ;;  %v2706_v40 = vld [vmem:[#allocation11 + $0x140] sm:$0xff] }
 0x53a   :  { %2206 = vmatpush.msrb.mxu2 %v3726_v50  ;;  %2226 = vmatpush.msra.mxu3 %v3690_v22  ;;  %v2707_v22 = vld [vmem:[#allocation11 + $0x120] sm:$0xff] }
 0x53b   :  { %2167 = vmatpush.msrb.mxu0 %v2703_v0  ;;  %2187 = vmatpush.msrb.mxu1 %v3694_v27  ;;  %v2708_v27 = vld [vmem:[#allocation11 + $0x100] sm:$0xff] }
 0x53c   :  { %2207 = vmatpush.msrb.mxu2 %v3735_v49  ;;  %2227 = vmatpush.msra.mxu3 %v3696_v30  ;;  %v2709_v30 = vld [vmem:[#allocation11 + $0xe0] sm:$0xff] }
 0x53d   :  { %2168 = vmatpush.msrb.mxu0 %v2704_v18  ;;  %2188 = vmatpush.msrb.mxu1 %v3701_v31  ;;  %v2710_v31 = vld [vmem:[#allocation11 + $0xc0] sm:$0xff] }
 0x53e   :  { %2208 = vmatpush.msrb.mxu2 %v3745_v15  ;;  %2228 = vmatpush.msra.mxu3 %v3703_v43  ;;  %v2711_v43 = vld [vmem:[#allocation11 + $0xa0] sm:$0xff]  ;;  %v4444_v15 = vld [vmem:[#allocation45_spill] sm:$0xff] }
 0x53f   :  { %2169 = vmatpush.msrb.mxu0 %v2705_v36  ;;  %2189 = vmatpush.msrb.mxu1 %v3711_v21  ;;  %v2712_v21 = vld [vmem:[#allocation11 + $0x80] sm:$0xff] }
 0x540   :  { %2209 = vmatpush.msrb.mxu2 %v3755_v60  ;;  %2229 = vmatpush.msra.mxu3 %v3718_v44  ;;  %v2713_v20 = vld [vmem:[#allocation11 + $0x60] sm:$0xff]  ;;  %v4438_v44 = vld [vmem:[#allocation33_spill] sm:$0xff]  ;;  %v4446_v60 = vld [vmem:[#allocation30_spill] sm:$0xff] }
 0x541   :  { %2170 = vmatpush.msrb.mxu0 %v2706_v40  ;;  %2190 = vmatpush.msrb.mxu1 %v3722_v45  ;;  %v2714_v45 = vld [vmem:[#allocation11 + $0x40] sm:$0xff] }
 0x542   :  { %2210 = vmatpush.msrb.mxu2 %v3766_v24  ;;  %2230 = vmatpush.msra.mxu3 %v3728_v55  ;;  %v4439_v50 = vld [vmem:[#allocation23_spill] sm:$0xff]  ;;  %v4440_v55 = vld [vmem:[#allocation40_spill] sm:$0xff] }
 0x543   :  { %2171 = vmatpush.msrb.mxu0 %v2707_v22  ;;  %2191 = vmatpush.msrb.mxu1 %v3732_v7  ;;  %v4441_v7 = vld [vmem:[#allocation35_spill] sm:$0xff]  ;;  %v1990_v22 = vrot.slane %v4060_v57, 7 }
 0x544   :  { %2211 = vmatpush.msrb.mxu2 %v3775_v56  ;;  %2231 = vmatpush.msra.mxu3 %v3737_v19  ;;  %v2715_v49 = vld [vmem:[#allocation11 + $0x20] sm:$0xff]  ;;  %v4442_v19 = vld [vmem:[#allocation36_spill] sm:$0xff] }
 0x545   :  { %2172 = vmatpush.msrb.mxu0 %v2708_v27  ;;  %2192 = vmatpush.msrb.mxu1 %v3742_v5  ;;  %v4443_v5 = vld [vmem:[#allocation42_spill] sm:$0xff] }
 0x546   :  { %2212 = vmatpush.msrb.mxu2 %v3785_v62  ;;  %2232 = vmatpush.msra.mxu3 %v3747_v26  ;;  %v2716_v26 = vld [vmem:[#allocation11] sm:$0xff] }
 0x547   :  { %2173 = vmatpush.msrb.mxu0 %v2709_v30  ;;  %2193 = vmatpush.msrb.mxu1 %v3752_v3  ;;  %v4445_v3 = vld [vmem:[#allocation37_spill] sm:$0xff] }
 0x548   :  { %2213 = vmatpush.msrb.mxu2 %v3795_v1  ;;  %2233 = vmatpush.msra.mxu3 %v3757_v32  ;;  %v4447_v32 = vld [vmem:[#allocation27_spill] sm:$0xff] }
 0x549   :  { %2174 = vmatpush.msrb.mxu0 %v2710_v31  ;;  %2194 = vmatpush.msrb.mxu1 %v3762_v25  ;;  %v4448_v1 = vld [vmem:[#allocation47_spill] sm:$0xff] }
 0x54a   :  { %2214 = vmatpush.msrb.mxu2 %v4408_v8  ;;  %2234 = vmatpush.msra.mxu3 %v4409_v29  ;;  %v4449_v29 = vld [vmem:[#allocation43_spill] sm:$0xff] }
 0x54b   :  { %2175 = vmatpush.msrb.mxu0 %v2711_v43  ;;  %2195 = vmatpush.msrb.mxu1 %v4411_v61 }
 0x54c   :  { %2215 = vmatpush.msrb.mxu2 %v4412_v34  ;;  %2235 = vmatpush.msra.mxu3 %v4413_v47 }
 0x54d   :  { %2176 = vmatpush.msrb.mxu0 %v2712_v21  ;;  %2196 = vmatpush.msrb.mxu1 %v4415_v16 }
 0x54e   :  { %2216 = vmatpush.msrb.mxu2 %v4416_v23  ;;  %2236 = vmatpush.msra.mxu3 %v4417_v41  ;;  %v4450_v41 = vld [vmem:[#allocation44_spill] sm:$0xff] }
 0x54f   :  { %2177 = vmatpush.msrb.mxu0 %v2713_v20  ;;  %2197 = vmatpush.msrb.mxu1 %v4419_v35 }
 0x550   :  { %2217 = vmatpush.msrb.mxu2 %v4420_v58  ;;  %2237 = vmatpush.msra.mxu3 %v4438_v44 }
 0x551   :  { %2178 = vmatpush.msrb.mxu0 %v2714_v45  ;;  %2198 = vmatpush.msrb.mxu1 %v4439_v50 }
 0x552   :  { %2218 = vmatpush.msrb.mxu2 %v4440_v55  ;;  %2238 = vmatpush.msra.mxu3 %v4441_v7 }
 0x553   :  { %2179 = vmatpush.msrb.mxu0 %v2715_v49  ;;  %2199 = vmatpush.msrb.mxu1 %v4442_v19 }
 0x554   :  { %2219 = vmatpush.msrb.mxu2 %v4443_v5  ;;  %2239 = vmatpush.msra.mxu3 %v4444_v15 }
 0x555   :  { %2180 = vmatpush.msrb.mxu0 %v2716_v26  ;;  %2200 = vmatpush.msrb.mxu1 %v4445_v3 }
 0x556   :  { %2220 = vmatpush.msrb.mxu2 %v4446_v60  ;;  %2240 = vmatpush.msra.mxu3 %v4447_v32  ;;  %v4452_v32 = vld [vmem:[#allocation53_spill] sm:$0xff] }
 0x5b2   :  { %v1852_v25 = vpop.f32.mrf.mxu0  ;;  %v1872_v24 = vpop.f32.mrf.mxu1 }
 0x5b3   :  { %v1919_v56 = vrot.slane %v1852_v25, 6  ;;  %v1920_v62 = vrot.slane %v1872_v24, 6  ;;  %v2328_v25 = vsel %vm2327_vm9, %v4452_v32, %v4063_v42 }
 0x5b5   :  { %v1927_v8 = vadd.f32 %v1919_v56, %v4448_v1  ;;  %v1928_v61 = vadd.f32 %v1920_v62, %v4449_v29 }
 0x5b7   :  { %v2457_v34 = vmul.f32 -1.442695, %v1927_v8  ;;  %v2458_v47 = vmul.f32 -1.442695, %v1928_v61 }
 0x5b9   :  { %2598 = vpow2.f32 %v2457_v34  ;;  %v1912_v16 = vpop.f32.mrf.mxu3  ;;  %v1892_v39 = vpop.f32.mrf.mxu2 }
 0x5ba   :  { %2600 = vpow2.f32 %v2458_v47  ;;  %v1922_v23 = vrot.slane %v1912_v16, 6  ;;  %v1921_v12 = vrot.slane %v1892_v39, 6 }
 0x5bc   :  { %v1930_v35 = vadd.f32 %v1922_v23, %v4450_v41  ;;  %v1929_v52 = vadd.f32 %v1921_v12, %v4451_v63 }
 0x5be   :  { %v2459_v58 = vmul.f32 -1.442695, %v1930_v35 }
 0x5bf   :  { %v2599_v14 = vpop.eup %2598 }
 0x5c0   :  { %v2601_v6 = vpop.eup %2600  ;;  %v1934_v46 = vadd.f32 1.0, %v2599_v14  ;;  %2602 = vpow2.f32 %v2459_v58 }
 0x5c1   :  { %v1953_v48 = vadd.f32 1.0, %v2601_v6 }
 0x5c2   :  { %2604 = vrcp.f32 %v1934_v46  ;;  %v1946_v4 = vand.u32 2147483648, %v1934_v46  ;;  %v1944_v53 = vand.u32 2147483647, %v1934_v46  ;;  %vm1940_vm14 = vweird.f32 %v1934_v46 }
 0x5c3   :  { %2606 = vrcp.f32 %v1953_v48  ;;  %v1965_v54 = vand.u32 2147483648, %v1953_v48  ;;  %v1963_v10 = vand.u32 2147483647, %v1953_v48  ;;  %vm1959_vm15 = vweird.f32 %v1953_v48 }
 0x5c4   :  { %v1947_v18 = vor.u32 1.1754944e-38, %v1946_v4  ;;  %vm1945_vm3 = vcmp.eq.f32.partialorder %v1944_v53, 8.507059e+37 }
 0x5c5   :  { %v1966_v27 = vor.u32 1.1754944e-38, %v1965_v54  ;;  %vm1964_vm4 = vcmp.eq.f32.partialorder %v1963_v10, 8.507059e+37 }
 0x5c6   :  { %v2603_v11 = vpop.eup %2602 }
 0x5c7   :  { %v1973_v51 = vadd.f32 1.0, %v2603_v11 }
 0x5c8   :  { %v2605_v33 = vpop.eup %2604 }
 0x5c9   :  { %v2607_v37 = vpop.eup %2606  ;;  %v1936_v38 = vmul.f32 %v2605_v33, %v1934_v46  ;;  %2608 = vrcp.f32 %v1973_v51  ;;  %vm1941_vm12 = vweird.f32 %v2605_v33  ;;  %v1985_v57 = vand.u32 2147483648, %v1973_v51 }
 0x5ca   :  { %v1955_v59 = vmul.f32 %v2607_v37, %v1953_v48  ;;  %2610 = vtanh.f32 %v1929_v52  ;;  %vm1960_vm13 = vweird.f32 %v2607_v37  ;;  %vm1942_vm1 = vmor %vm1940_vm14, %vm1941_vm12  ;;  %vm1979_vm6 = vweird.f32 %v1973_v51 }
 0x5cb   :  { %v1937_v28 = vsub.f32 1.0, %v1936_v38  ;;  %vm1961_vm2 = vmor %vm1959_vm15, %vm1960_vm13  ;;  %v1983_v19 = vand.u32 2147483647, %v1973_v51  ;;  %v1986_v15 = vor.u32 1.1754944e-38, %v1985_v57 }
 0x5cc   :  { %v1956_v9 = vsub.f32 1.0, %v1955_v59 }
 0x5cd   :  { %v1938_v13 = vmul.f32 %v2605_v33, %v1937_v28  ;;  %vm1984_vm8 = vcmp.eq.f32.partialorder %v1983_v19, 8.507059e+37 }
 0x5ce   :  { %v1957_v17 = vmul.f32 %v2607_v37, %v1956_v9 }
 0x5cf   :  { %v2609_v2 = vpop.eup %2608  ;;  %v1939_v0 = vadd.f32 %v2605_v33, %v1938_v13 }
 0x5d0   :  { %v1958_v36 = vadd.f32 %v2607_v37, %v1957_v17  ;;  %v1975_v40 = vmul.f32 %v2609_v2, %v1973_v51  ;;  %v2611_v31 = vpop.eup %2610  ;;  %vm1980_vm5 = vweird.f32 %v2609_v2 }
 0x5d1   :  { %v1943_v30 = vsel %vm1942_vm1, %v2605_v33, %v1939_v0  ;;  %vm1981_vm7 = vmor %vm1979_vm6, %vm1980_vm5 }
 0x5d2   :  { %v1948_v43 = vsel %vm1945_vm3, %v1947_v18, %v1943_v30  ;;  %v1962_v21 = vsel %vm1961_vm2, %v2607_v37, %v1958_v36  ;;  %v1976_v20 = vsub.f32 1.0, %v1975_v40 }
 0x5d3   :  { %v1967_v44 = vsel %vm1964_vm4, %v1966_v27, %v1962_v21  ;;  %v1993_v45 = vmul.f32 %v2611_v31, %v1948_v43 }
 0x5d4   :  { %v1992_v50 = vmul.f32 %v1990_v22, %v1967_v44  ;;  %v1977_v55 = vmul.f32 %v2609_v2, %v1976_v20 }
 0x5d6   :  { %v4119_v7 = vadd.f32 %v1993_v45, %v1992_v50  ;;  %v1978_v49 = vadd.f32 %v2609_v2, %v1977_v55 }
 0x5d8   :  { %2612 = vtanh.f32 %v4119_v7  ;;  %v1982_v5 = vsel %vm1981_vm7, %v2609_v2, %v1978_v49  ;;  %v2155_v30 = vrot.slane %v4119_v7, 7 }
 0x5d9   :  { %v1987_v3 = vsel %vm1984_vm8, %v1986_v15, %v1982_v5  ;;  %vm2331_vm8 = vcmask 1042432  }
 0x5de   :  { %v2613_v26 = vpop.eup %2612 }
 0x5df   :  { %v1996_v60 = vmul.f32 %v2613_v26, %v1987_v3 }
 0x5e1   :  { %v1998_v24 = vrot.slane %v1996_v60, 2  ;;  %v4124_v56 = vsel %vm2329_vm10, %v2328_v25, %v1996_v60 }
 0x5e3   :  { %2016 = vmatmul.f32.vlgmr.msra.gmra.mxu0 %v1998_v24  ;;  %2036 = vmatmul.f32.vlgmr.msra.gmra.mxu1 %v1998_v24 }
 0x5e4   :  { %2056 = vmatmul.f32.vlgmr.msra.gmra.mxu2 %v1998_v24  ;;  %2076 = vmatmul.f32.vlgmr.msrb.gmra.mxu3 %v1998_v24 }
 0x660   :  { %v2017_v62 = vpop.f32.mrf.mxu0  ;;  %v2037_v8 = vpop.f32.mrf.mxu1 }
 0x661   :  { %v2084_v61 = vrot.slane %v2017_v62, 5  ;;  %v2085_v34 = vrot.slane %v2037_v8, 5  ;;  %v2349_v8 = vld [vmem:[#allocation13 + $0x78] sm:$0xff] }
 0x662   :  { %2354 = vmatpush.msra.mxu0 %v2349_v8 }
 0x663   :  { %v2092_v47 = vadd.f32 %v2084_v61, %v4448_v1  ;;  %v2093_v16 = vadd.f32 %v2085_v34, %v4449_v29  ;;  %v2348_v61 = vld [vmem:[#allocation13 + $0x70] sm:$0xff]  ;;  %v2347_v34 = vld [vmem:[#allocation13 + $0x68] sm:$0xff] }
 0x664   :  { %2355 = vmatpush.msra.mxu0 %v2348_v61 }
 0x665   :  { %v2460_v23 = vmul.f32 -1.442695, %v2092_v47  ;;  %v2461_v35 = vmul.f32 -1.442695, %v2093_v16  ;;  %v2346_v47 = vld [vmem:[#allocation13 + $0x60] sm:$0xff]  ;;  %v2345_v16 = vld [vmem:[#allocation13 + $0x58] sm:$0xff] }
 0x666   :  { %2356 = vmatpush.msra.mxu0 %v2347_v34 }
 0x667   :  { %2614 = vpow2.f32 %v2460_v23  ;;  %v2077_v58 = vpop.f32.mrf.mxu3  ;;  %v2057_v11 = vpop.f32.mrf.mxu2  ;;  %v2344_v23 = vld [vmem:[#allocation13 + $0x50] sm:$0xff] }
 0x668   :  { %2616 = vpow2.f32 %v2461_v35  ;;  %v2087_v42 = vrot.slane %v2077_v58, 5  ;;  %v2086_v51 = vrot.slane %v2057_v11, 5  ;;  %2357 = vmatpush.msra.mxu0 %v2346_v47  ;;  %v2343_v35 = vld [vmem:[#allocation13 + $0x48] sm:$0xff] }
 0x669   :  { %v2339_v11 = vld [vmem:[#allocation13 + $0x28] sm:$0xff] }
 0x66a   :  { %v2095_v14 = vadd.f32 %v2087_v42, %v4450_v41  ;;  %v2094_v38 = vadd.f32 %v2086_v51, %v4451_v63  ;;  %2358 = vmatpush.msra.mxu0 %v2345_v16 }
 0x66c   :  { %v2462_v6 = vmul.f32 -1.442695, %v2095_v14  ;;  %2359 = vmatpush.msra.mxu0 %v2344_v23  ;;  %v2341_v14 = vld [vmem:[#allocation13 + $0x38] sm:$0xff] }
 0x66d   :  { %v2615_v46 = vpop.eup %2614 }
 0x66e   :  { %v2617_v48 = vpop.eup %2616  ;;  %v2099_v39 = vadd.f32 1.0, %v2615_v46  ;;  %2618 = vpow2.f32 %v2462_v6  ;;  %2360 = vmatpush.msra.mxu0 %v2343_v35 }
 0x66f   :  { %v2118_v12 = vadd.f32 1.0, %v2617_v48  ;;  %v2340_v48 = vld [vmem:[#allocation13 + $0x30] sm:$0xff] }
 0x670   :  { %2620 = vrcp.f32 %v2099_v39  ;;  %v2111_v13 = vand.u32 2147483648, %v2099_v39  ;;  %v2109_v10 = vand.u32 2147483647, %v2099_v39  ;;  %vm2105_vm13 = vweird.f32 %v2099_v39 }
 0x671   :  { %2622 = vrcp.f32 %v2118_v12  ;;  %v2130_v53 = vand.u32 2147483648, %v2118_v12  ;;  %v2128_v0 = vand.u32 2147483647, %v2118_v12  ;;  %vm2124_vm14 = vweird.f32 %v2118_v12 }
 0x672   :  { %v2112_v40 = vor.u32 1.1754944e-38, %v2111_v13  ;;  %vm2110_vm2 = vcmp.eq.f32.partialorder %v2109_v10, 8.507059e+37 }
 0x673   :  { %v2131_v31 = vor.u32 1.1754944e-38, %v2130_v53  ;;  %vm2129_vm3 = vcmp.eq.f32.partialorder %v2128_v0, 8.507059e+37 }
 0x674   :  { %v2619_v33 = vpop.eup %2618 }
 0x675   :  { %v2138_v52 = vadd.f32 1.0, %v2619_v33 }
 0x676   :  { %v2621_v37 = vpop.eup %2620 }
 0x677   :  { %v2623_v59 = vpop.eup %2622  ;;  %v2101_v28 = vmul.f32 %v2621_v37, %v2099_v39  ;;  %2624 = vrcp.f32 %v2138_v52  ;;  %vm2106_vm11 = vweird.f32 %v2621_v37  ;;  %v2150_v7 = vand.u32 2147483648, %v2138_v52 }
 0x678   :  { %v2120_v9 = vmul.f32 %v2623_v59, %v2118_v12  ;;  %2626 = vtanh.f32 %v2094_v38  ;;  %vm2125_vm12 = vweird.f32 %v2623_v59  ;;  %vm2107_vm15 = vmor %vm2105_vm13, %vm2106_vm11  ;;  %vm2144_vm5 = vweird.f32 %v2138_v52 }
 0x679   :  { %v2102_v4 = vsub.f32 1.0, %v2101_v28  ;;  %vm2126_vm1 = vmor %vm2124_vm14, %vm2125_vm12  ;;  %v2148_v15 = vand.u32 2147483647, %v2138_v52  ;;  %v2151_v3 = vor.u32 1.1754944e-38, %v2150_v7  ;;  %v2336_v28 = vld [vmem:[#allocation13 + $0x10] sm:$0xff] }
 0x67a   :  { %v2121_v54 = vsub.f32 1.0, %v2120_v9 }
 0x67b   :  { %v2103_v17 = vmul.f32 %v2621_v37, %v2102_v4  ;;  %vm2149_vm7 = vcmp.eq.f32.partialorder %v2148_v15, 8.507059e+37  ;;  %v2335_v4 = vld [vmem:[#allocation13 + $0x8] sm:$0xff] }
 0x67c   :  { %v2122_v2 = vmul.f32 %v2623_v59, %v2121_v54 }
 0x67d   :  { %v2625_v18 = vpop.eup %2624  ;;  %v2104_v36 = vadd.f32 %v2621_v37, %v2103_v17 }
 0x67e   :  { %v2123_v22 = vadd.f32 %v2623_v59, %v2122_v2  ;;  %v2140_v27 = vmul.f32 %v2625_v18, %v2138_v52  ;;  %v2627_v21 = vpop.eup %2626  ;;  %vm2145_vm4 = vweird.f32 %v2625_v18  ;;  %v2338_v52 = vld [vmem:[#allocation13 + $0x20] sm:$0xff] }
 0x67f   :  { %v2108_v43 = vsel %vm2107_vm15, %v2621_v37, %v2104_v36  ;;  %vm2146_vm6 = vmor %vm2144_vm5, %vm2145_vm4  ;;  %v2337_v37 = vld [vmem:[#allocation13 + $0x18] sm:$0xff] }
 0x680   :  { %v2113_v20 = vsel %vm2110_vm2, %v2112_v40, %v2108_v43  ;;  %v2127_v44 = vsel %vm2126_vm1, %v2623_v59, %v2123_v22  ;;  %v2141_v45 = vsub.f32 1.0, %v2140_v27 }
 0x681   :  { %v2132_v50 = vsel %vm2129_vm3, %v2131_v31, %v2127_v44  ;;  %v2158_v55 = vmul.f32 %v2627_v21, %v2113_v20 }
 0x682   :  { %v2157_v49 = vmul.f32 %v2155_v30, %v2132_v50  ;;  %v2142_v57 = vmul.f32 %v2625_v18, %v2141_v45 }
 0x684   :  { %v4131_v19 = vadd.f32 %v2158_v55, %v2157_v49  ;;  %v2143_v5 = vadd.f32 %v2625_v18, %v2142_v57 }
 0x686   :  { %2628 = vtanh.f32 %v4131_v19  ;;  %v2147_v26 = vsel %vm2146_vm6, %v2625_v18, %v2143_v5  ;;  %v2320_v7 = vrot.slane %v4131_v19, 7  ;;  %vm2374_vm6 = vcmask 1044480  }
 0x687   :  { %v2152_v32 = vsel %vm2149_vm7, %v2151_v3, %v2147_v26 }
 0x68c   :  { %v2629_v60 = vpop.eup %2628 }
 0x68d   :  { %v2161_v25 = vmul.f32 %v2629_v60, %v2152_v32 }
 0x68f   :  { %v2163_v24 = vrot.slane %v2161_v25, 3  ;;  %v4135_v62 = vsel %vm2331_vm8, %v4124_v56, %v2161_v25  ;;  %v2342_v56 = vld [vmem:[#allocation13 + $0x40] sm:$0xff] }
 0x690   :  { %2361 = vmatpush.msra.mxu0 %v2342_v56 }
 0x691   :  { %2181 = vmatmul.f32.vlgmr.msrb.gmra.mxu0 %v2163_v24  ;;  %2201 = vmatmul.f32.vlgmr.msrb.gmra.mxu1 %v2163_v24 }
 0x692   :  { %2221 = vmatmul.f32.vlgmr.msrb.gmra.mxu2 %v2163_v24  ;;  %2241 = vmatmul.f32.vlgmr.msra.gmra.mxu3 %v2163_v24 }
 0x693   :  { %2362 = vmatpush.msra.mxu0 %v2341_v14 }
 0x695   :  { %2363 = vmatpush.msra.mxu0 %v2340_v48 }
 0x697   :  { %2364 = vmatpush.msra.mxu0 %v2339_v11 }
 0x699   :  { %2365 = vmatpush.msra.mxu0 %v2338_v52 }
 0x69b   :  { %2366 = vmatpush.msra.mxu0 %v2337_v37 }
 0x69d   :  { %2367 = vmatpush.msra.mxu0 %v2336_v28 }
 0x69f   :  { %2368 = vmatpush.msra.mxu0 %v2335_v4 }
 0x70e   :  { %v2182_v58 = vpop.f32.mrf.mxu0  ;;  %v2202_v42 = vpop.f32.mrf.mxu1 }
 0x70f   :  { %v2249_v6 = vrot.slane %v2182_v58, 4  ;;  %v2250_v46 = vrot.slane %v2202_v42, 4 }
 0x711   :  { %v2257_v39 = vadd.f32 %v2249_v6, %v4448_v1  ;;  %v2258_v12 = vadd.f32 %v2250_v46, %v4449_v29  ;;  %v2334_v29 = vld [vmem:[#allocation13] sm:$0xff]  ;;  %v2485_v46 = vld [vmem:[%s4161_s11] ss:$0 sm:$0xff]  ;;  %s2395_s11 = sshll.u32 %s4162_s12, 4  ;;  %s2396_s11 = int_to_ptr.hbm [resolvable:$true] %s2395_s11 }
 0x712   :  { %2369 = vmatpush.msra.mxu0 %v2334_v29 }
 0x713   :  { %v2463_v51 = vmul.f32 -1.442695, %v2257_v39  ;;  %v2464_v33 = vmul.f32 -1.442695, %v2258_v12 }
 0x715   :  { %2630 = vpow2.f32 %v2463_v51  ;;  %v2242_v38 = vpop.f32.mrf.mxu3  ;;  %v2222_v10 = vpop.f32.mrf.mxu2 }
 0x716   :  { %2632 = vpow2.f32 %v2464_v33  ;;  %v2252_v59 = vrot.slane %v2242_v38, 4  ;;  %v2251_v2 = vrot.slane %v2222_v10, 4 }
 0x718   :  { %v2260_v9 = vadd.f32 %v2252_v59, %v4450_v41  ;;  %v2259_v41 = vadd.f32 %v2251_v2, %v4451_v63 }
 0x71a   :  { %v2465_v1 = vmul.f32 -1.442695, %v2260_v9 }
 0x71b   :  { %v2631_v54 = vpop.eup %2630 }
 0x71c   :  { %v2633_v13 = vpop.eup %2632  ;;  %v2264_v53 = vadd.f32 1.0, %v2631_v54  ;;  %2634 = vpow2.f32 %v2465_v1 }
 0x71d   :  { %v2283_v17 = vadd.f32 1.0, %v2633_v13 }
 0x71e   :  { %2636 = vrcp.f32 %v2264_v53  ;;  %v2276_v43 = vand.u32 2147483648, %v2264_v53  ;;  %v2274_v44 = vand.u32 2147483647, %v2264_v53  ;;  %vm2270_vm11 = vweird.f32 %v2264_v53 }
 0x71f   :  { %2638 = vrcp.f32 %v2283_v17  ;;  %v2295_v21 = vand.u32 2147483648, %v2283_v17  ;;  %v2293_v50 = vand.u32 2147483647, %v2283_v17  ;;  %vm2289_vm12 = vweird.f32 %v2283_v17 }
 0x720   :  { %v2277_v63 = vor.u32 1.1754944e-38, %v2276_v43  ;;  %vm2275_vm15 = vcmp.eq.f32.partialorder %v2274_v44, 8.507059e+37 }
 0x721   :  { %v2296_v15 = vor.u32 1.1754944e-38, %v2295_v21  ;;  %vm2294_vm1 = vcmp.eq.f32.partialorder %v2293_v50, 8.507059e+37 }
 0x722   :  { %v2635_v0 = vpop.eup %2634 }
 0x723   :  { %v2303_v18 = vadd.f32 1.0, %v2635_v0 }
 0x724   :  { %v2637_v36 = vpop.eup %2636 }
 0x725   :  { %v2639_v40 = vpop.eup %2638  ;;  %v2266_v22 = vmul.f32 %v2637_v36, %v2264_v53  ;;  %2640 = vrcp.f32 %v2303_v18  ;;  %vm2271_vm9 = vweird.f32 %v2637_v36  ;;  %v2315_v23 = vand.u32 2147483648, %v2303_v18 }
 0x726   :  { %v2285_v27 = vmul.f32 %v2639_v40, %v2283_v17  ;;  %2642 = vtanh.f32 %v2259_v41  ;;  %vm2290_vm10 = vweird.f32 %v2639_v40  ;;  %vm2272_vm13 = vmor %vm2270_vm11, %vm2271_vm9  ;;  %vm2309_vm3 = vweird.f32 %v2303_v18 }
 0x727   :  { %v2267_v30 = vsub.f32 1.0, %v2266_v22  ;;  %vm2291_vm14 = vmor %vm2289_vm12, %vm2290_vm10  ;;  %v2313_v19 = vand.u32 2147483647, %v2303_v18  ;;  %v2316_v56 = vor.u32 1.1754944e-38, %v2315_v23 }
 0x728   :  { %v2286_v31 = vsub.f32 1.0, %v2285_v27 }
 0x729   :  { %v2268_v20 = vmul.f32 %v2637_v36, %v2267_v30  ;;  %vm2314_vm5 = vcmp.eq.f32.partialorder %v2313_v19, 8.507059e+37 }
 0x72a   :  { %v2287_v45 = vmul.f32 %v2639_v40, %v2286_v31 }
 0x72b   :  { %v2641_v55 = vpop.eup %2640  ;;  %v2269_v49 = vadd.f32 %v2637_v36, %v2268_v20 }
 0x72c   :  { %v2288_v57 = vadd.f32 %v2639_v40, %v2287_v45  ;;  %v2305_v5 = vmul.f32 %v2641_v55, %v2303_v18  ;;  %v2643_v3 = vpop.eup %2642  ;;  %vm2310_vm2 = vweird.f32 %v2641_v55 }
 0x72d   :  { %v2273_v26 = vsel %vm2272_vm13, %v2637_v36, %v2269_v49  ;;  %vm2311_vm4 = vmor %vm2309_vm3, %vm2310_vm2 }
 0x72e   :  { %v2278_v60 = vsel %vm2275_vm15, %v2277_v63, %v2273_v26  ;;  %v2292_v32 = vsel %vm2291_vm14, %v2639_v40, %v2288_v57  ;;  %v2306_v25 = vsub.f32 1.0, %v2305_v5 }
 0x72f   :  { %v2297_v24 = vsel %vm2294_vm1, %v2296_v15, %v2292_v32  ;;  %v2323_v8 = vmul.f32 %v2643_v3, %v2278_v60 }
 0x730   :  { %v2322_v61 = vmul.f32 %v2320_v7, %v2297_v24  ;;  %v2307_v34 = vmul.f32 %v2641_v55, %v2306_v25 }
 0x732   :  { %v2324_v47 = vadd.f32 %v2323_v8, %v2322_v61  ;;  %v2308_v16 = vadd.f32 %v2641_v55, %v2307_v34 }
 0x734   :  { %2644 = vtanh.f32 %v2324_v47  ;;  %v2312_v35 = vsel %vm2311_vm4, %v2641_v55, %v2308_v16 }
 0x735   :  { %v2317_v42 = vsel %vm2314_vm5, %v2316_v56, %v2312_v35 }
 0x73a   :  { %v2645_v58 = vpop.eup %2644 }
 0x73b   :  { %v2326_v14 = vmul.f32 %v2645_v58, %v2317_v42 }
 0x73d   :  { %v2333_v6 = vsel %vm186_vm0, %v4135_v62, %v2326_v14 }
 0x73e   :  { %2370 = vmatmul.f32.vlgmr.msra.gmra.mxu0 %v2333_v6 }
 0x7bb   :  { %v2371_v48 = vpop.f32.mrf.mxu0 }
 0x7bc   :  { %v2372_v39 = vadd.f32 %v2485_v46, %v2371_v48 }
 0x7be   :  { %v2375_v12 = vsel %vm2374_vm6, %v2372_v39, -inf }
 0x7bf   :  { %2376 = vmax.xlane.f32.xlu1 %v2375_v12 }
 0x832   :  { %v2377_v11 = vpop.xlane.xlu1 %2376 }
 0x833   :  { %v2378_v51 = vsub.f32 %v2372_v39, %v2377_v11 }
 0x835   :  { %v2379_v33 = vmul.f32 1.442695, %v2378_v51 }
 0x837   :  { %2646 = vpow2.f32 %v2379_v33 }
 0x83d   :  { %v2647_v52 = vpop.eup %2646 }
 0x83e   :  { %v2381_v37 = vsel %vm2374_vm6, %v2647_v52, 0.0 }
 0x83f   :  { %2382 = vadd.xlane.f32.xlu2 %v2381_v37 }
 0x8b2   :  { %v2383_v38 = vpop.xlane.xlu2 %2382 }
 0x8b3   :  { %2648 = vlog2.f32 %v2383_v38 }
 0x8b9   :  { %v2649_v62 = vpop.eup %2648 }
 0x8ba   :  { %v2385_v59 = vmul.f32 0.6931472, %v2649_v62 }
 0x8bc   :  { %v2386_v28 = vsub.f32 %v2378_v51, %v2385_v59 }
 0x8be   :  { %2387 = vst [vmem:[#allocation14] sm:$0x1f] %v2386_v28 }
 0x8bf   :  { %2398 = dma.vmem_to_hbm [thread:$0]  %s2394_s7, 128, %s2396_s11, [#allocation4]  }
 0x8c0   :  { %2917 = dma.done.wait [#allocation4], 128  }
 0x8c1   :  { %2918 = vsyncadd [#allocation4], 4294967168 }
 0x8c2   :  { %2403 = vsyncpa [#allocation3], 1 }
 0x8c3   :  { %2404 = vsyncpa [#allocation6], 1 }
 0x8c4   :  { %2405 = vsyncpa [#allocation9], 1 }
 0x8c5   :  { %2406 = vsyncpa [#allocation12], 1 }
 0x8c6   :  { %2407 = vsyncpa [#allocation4], 1 }

</bundles_post_ra>
